<compile_context>
chip_gen: v6e
topology: v6e:2x2x1
jax: 0.10.0
libtpu: 0.0.40
codegen_flags: <defaults>
</compile_context>

<pallas_src>
import functools

import jax
import jax.numpy as jnp
from jax.experimental import pallas as pl
from jax.experimental.pallas import tpu as pltpu

BN_EPS = 1e-5
LANE = 128            # channel axis padded to this (TPU lane width)
MAX_TILE_ROWS = 2048  # target matmul rows per grid step (VMEM budget)


def _round_up(x, m):
    return (x + m - 1) // m * m


def _pick_row_tile(h, wp2, max_rows=MAX_TILE_ROWS):
    """Largest divisor `th` of h with th*(W+2) <= max_rows (fallback 1)."""
    best = 1
    for th in range(1, h + 1):
        if h % th == 0 and th * wp2 <= max_rows:
            best = th
    return best


# ----------------------------------------------------------------------------
# Pallas kernels
# ----------------------------------------------------------------------------
def _conv3x3_bn_relu_kernel(x_ref, w_ref, b_ref, o_ref, *, wp2):
    """3x3 conv (stride 1, pad 1) + folded-BN bias + ReLU on one row tile.

    x_ref: (th*(W+2) + 2*(W+2) + 2, C) bf16  flattened padded rows (1-row halo,
                                             +2 guard rows for the junk columns)
    w_ref: (9, C, C)                   bf16  HWIO taps, BN scale pre-folded
    b_ref: (1, C)                      f32   folded BN bias (0 on padded channels)
    o_ref: (th*(W+2), C)               bf16  flattened output rows; 2 junk
                                             columns/row are sliced off outside
    """
    m = o_ref.shape[0]
    acc = jnp.zeros(o_ref.shape, jnp.float32)
    for dy in range(3):
        for dx in range(3):
            off = dy * wp2 + dx
            acc = acc + jnp.dot(x_ref[off:off + m, :], w_ref[dy * 3 + dx],
                                preferred_element_type=jnp.float32)
    o_ref[...] = jnp.maximum(acc + b_ref[...], 0.0).astype(o_ref.dtype)


def _avgpool4_kernel(a_ref, b_ref, c_ref, d_ref, o_ref):
    """AvgPool2d(2, stride 2): mean of the 4 strided sub-grids (lane-dense C)."""
    s = (a_ref[...].astype(jnp.float32) + b_ref[...].astype(jnp.float32)
         + c_ref[...].astype(jnp.float32) + d_ref[...].astype(jnp.float32))
    o_ref[...] = (0.25 * s).astype(o_ref.dtype)


# ----------------------------------------------------------------------------
# Wrappers (glue in plain JAX, hot path in Pallas)
# ----------------------------------------------------------------------------
def conv3x3_bn_relu(x, wk, bias):
    """x: (N, H, W, C) bf16 channel-padded NHWC; wk: (9, C, C) bf16 (BN scale
    folded); bias: (1, C) f32.  Returns (N, H, W, C) bf16."""
    n, h, w, c = x.shape
    wp2 = w + 2
    th = _pick_row_tile(h, wp2)
    nt = h // th
    lo = th * wp2                      # output rows per tile (incl. junk cols)
    lp = (th + 2) * wp2 + 2            # input rows per tile (halo + guard rows)

    # Spatial pad + halo row tiles (XLA glue; nt == 1 is a pure reshape).
    xp = jnp.pad(x, ((0, 0), (1, 1), (1, 1), (0, 0)))
    if nt == 1:
        xt = xp.reshape(n, 1, (h + 2) * wp2, c)
    else:
        xt = jnp.stack([xp[:, r * th:r * th + th + 2] for r in range(nt)],
                       axis=1).reshape(n, nt, (th + 2) * wp2, c)
    xt = jnp.pad(xt, ((0, 0), (0, 0), (0, 2), (0, 0)))   # guard rows

    flops = 2 * n * nt * 9 * lo * c * c
    bytes_accessed = (xt.size * xt.dtype.itemsize
                      + wk.size * wk.dtype.itemsize
                      + bias.size * bias.dtype.itemsize
                      + n * nt * lo * c * x.dtype.itemsize)
    vmem_limit = 2 * (lp * c * 2 + lo * c * 2) + 9 * c * c * 2 + lo * c * 4
    vmem_limit = int(min(32 << 20, max(16 << 20, vmem_limit + (4 << 20))))

    out = pl.pallas_call(
        functools.partial(_conv3x3_bn_relu_kernel, wp2=wp2),
        out_shape=jax.ShapeDtypeStruct((n, nt, lo, c), x.dtype),
        grid=(n, nt),
        in_specs=[
            pl.BlockSpec((None, None, lp, c), lambda i, r: (i, r, 0, 0)),
            pl.BlockSpec((9, c, c), lambda i, r: (0, 0, 0)),
            pl.BlockSpec((1, c), lambda i, r: (0, 0)),
        ],
        out_specs=pl.BlockSpec((None, None, lo, c), lambda i, r: (i, r, 0, 0)),
        compiler_params=pltpu.CompilerParams(
            dimension_semantics=("parallel", "parallel"),
            vmem_limit_bytes=vmem_limit),
        cost_estimate=pl.CostEstimate(flops=flops, transcendentals=0,
                                      bytes_accessed=bytes_accessed),
    )(xt, wk, bias)

    # Drop the 2 junk columns per output row (XLA glue).
    return out.reshape(n, h, wp2, c)[:, :, :w, :]


def avg_pool_2x2(x):
    """x: (N, H, W, C) bf16, H and W even -> (N, H/2, W/2, C) bf16."""
    n, h, w, c = x.shape
    ho, wo = h // 2, w // 2
    m = n * ho * wo
    a = x[:, 0::2, 0::2, :].reshape(m, c)
    b = x[:, 0::2, 1::2, :].reshape(m, c)
    cc = x[:, 1::2, 0::2, :].reshape(m, c)
    d = x[:, 1::2, 1::2, :].reshape(m, c)

    if m <= MAX_TILE_ROWS:
        tm = m
    else:
        tm = m
        for t in range(MAX_TILE_ROWS, 7, -8):   # multiples of 8, descending
            if m % t == 0:
                tm = t
                break

    out = pl.pallas_call(
        _avgpool4_kernel,
        out_shape=jax.ShapeDtypeStruct((m, c), x.dtype),
        grid=(m // tm,),
        in_specs=[pl.BlockSpec((tm, c), lambda i: (i, 0))] * 4,
        out_specs=pl.BlockSpec((tm, c), lambda i: (i, 0)),
        compiler_params=pltpu.CompilerParams(
            dimension_semantics=("parallel",)),
    )(a, b, cc, d)
    return out.reshape(n, ho, wo, c)


def _fold_and_pad(w, scale, bias, cpad):
    """w: (Cout, Cin, 3, 3) f32 -> wk (9, cpad, cpad) bf16 (scale folded),
    b (1, cpad) f32."""
    cout, cin = w.shape[0], w.shape[1]
    w_eff = w * scale[:, None, None, None]
    wk = jnp.transpose(w_eff, (2, 3, 1, 0)).reshape(9, cin, cout)
    wk = jnp.pad(wk, ((0, 0), (0, cpad - cin), (0, cpad - cout)))
    b = jnp.pad(bias, (0, cpad - cout)).reshape(1, cpad)
    return wk.astype(jnp.bfloat16), b.astype(jnp.float32)


def unet_encoder_forward(x_nchw, params):
    """Mirror of UnetEncoder.forward.

    x_nchw: (N, Cin, H, W) f32; returns list of per-block features, each NCHW f32.
    """
    n, cin, h, w = x_nchw.shape
    cpad = LANE
    for blk in params:
        cpad = max(cpad, _round_up(blk["w1"].shape[0], LANE))

    x = jnp.transpose(x_nchw, (0, 2, 3, 1))                      # NCHW -> NHWC
    x = jnp.pad(x, ((0, 0), (0, 0), (0, 0), (0, cpad - cin)))    # lane-pad C
    x = x.astype(jnp.bfloat16)

    features = []
    for blk in params:
        cout = blk["w1"].shape[0]
        wk1, b1 = _fold_and_pad(blk["w1"], blk["s1"], blk["b1"], cpad)
        wk2, b2 = _fold_and_pad(blk["w2"], blk["s2"], blk["b2"], cpad)
        x = conv3x3_bn_relu(x, wk1, b1)
        x = conv3x3_bn_relu(x, wk2, b2)
        # Padded channels are exact zeros -> slice true channels for the feature.
        features.append(
            jnp.transpose(x[..., :cout].astype(jnp.float32), (0, 3, 1, 2)))
        # TODO(synk): fuse conv1+conv2+pool of a block into one pallas_call that
        # keeps the intermediate activation resident in VMEM (saves one HBM
        # round-trip per block).
        x = avg_pool_2x2(x)
    return features


# ----------------------------------------------------------------------------
# Deterministic synthetic parameters (BatchNorm folded, inference mode)
# ----------------------------------------------------------------------------
def make_params(key, num_input_channels, layer_output_channels):
    params = []
    cin = num_input_channels
    for cout in layer_output_channels:
        blk = {}
        for tag, ci in (("1", cin), ("2", cout)):
            key, kw, kg, kb, km, kv = jax.random.split(key, 6)
            w = 0.1 * jax.random.normal(kw, (cout, ci, 3, 3), jnp.float32)
            gamma = 1.0 + 0.1 * jax.random.normal(kg, (cout,), jnp.float32)
            beta = 0.1 * jax.random.normal(kb, (cout,), jnp.float32)
            mean = 0.1 * jax.random.normal(km, (cout,), jnp.float32)
            var = 1.0 + 0.1 * jnp.abs(jax.random.normal(kv, (cout,), jnp.float32))
            scale = gamma / jnp.sqrt(var + BN_EPS)
            bias = beta - mean * scale
            blk["w" + tag] = w
            blk["s" + tag] = scale
            blk["b" + tag] = bias
        params.append(blk)
        cin = cout
    return params


# ----------------------------------------------------------------------------
# Plain-JAX reference (mirrors the kernel's bf16 quantization points)
# ----------------------------------------------------------------------------
def ref_forward(x_nchw, params):
    x = jnp.transpose(x_nchw, (0, 2, 3, 1))
    feats = []
    for blk in params:
        for w, s, b in ((blk["w1"], blk["s1"], blk["b1"]),
                        (blk["w2"], blk["s2"], blk["b2"])):
            w_eff = (w * s[:, None, None, None]).astype(jnp.bfloat16)
            y = jax.lax.conv_general_dilated(
                x.astype(jnp.bfloat16), jnp.transpose(w_eff, (2, 3, 1, 0)),
                (1, 1), "SAME",
                dimension_numbers=("NHWC", "HWIO", "NHWC"),
                preferred_element_type=jnp.float32)
            x = jnp.maximum(y + b, 0.0).astype(jnp.bfloat16)
        feats.append(jnp.transpose(x.astype(jnp.float32), (0, 3, 1, 2)))
        xf = x.astype(jnp.float32)
        x = ((xf[:, 0::2, 0::2] + xf[:, 0::2, 1::2]
              + xf[:, 1::2, 0::2] + xf[:, 1::2, 1::2]) * 0.25).astype(jnp.bfloat16)
    return feats


# ----------------------------------------------------------------------------
if __name__ == "__main__":
    num_input_channels = 3
    layer_output_channels = [8, 16, 32]
    N, H, W = 2, 16, 16

    key = jax.random.PRNGKey(0)
    key, kx = jax.random.split(key)
    x = jax.random.normal(kx, (N, num_input_channels, H, W), jnp.float32)
    params = make_params(key, num_input_channels, layer_output_channels)

    fwd = jax.jit(functools.partial(unet_encoder_forward, params=params))
    features = fwd(x)
    features = [jax.block_until_ready(f) for f in features]

    # Shape check (same as the PyTorch module: one NCHW feature per block).
    expect_hw = [(H, W), (H // 2, W // 2), (H // 4, W // 4)]
    for f, c, (eh, ew) in zip(features, layer_output_channels, expect_hw):
        assert f.shape == (N, c, eh, ew), f.shape

    # Numerical check against a reference with matching bf16 quantization points.
    refs = ref_forward(x, params)
    for f, r in zip(features, refs):
        err = float(jnp.max(jnp.abs(f - r)))
        assert jnp.allclose(f, r, rtol=2e-2, atol=2e-2), err

    print("KERNEL_OK")
</pallas_src>

<mosaic_0001>
module attributes {stable_mosaic.version = 11 : i64} {
  func.func @_conv3x3_bn_relu_kernel(%arg0: i32, %arg1: i32, %arg2: memref<1x1x326x128xbf16, #tpu.memory_space<vmem>>, %arg3: memref<9x128x128xbf16, #tpu.memory_space<vmem>>, %arg4: memref<1x128xf32, #tpu.memory_space<vmem>>, %arg5: memref<1x1x288x128xbf16, #tpu.memory_space<vmem>>) attributes {dimension_semantics = [#tpu.dimension_semantics<parallel>, #tpu.dimension_semantics<parallel>], iteration_bounds = array<i64: 2, 1>, scalar_prefetch = 0 : i64, scratch_operands = 0 : i64, tpu.core_type = #tpu.core_type<tc>, window_params = [{transform_indices = @transform_0, window_bounds = array<i64: 1, 1, 326, 128>}, {pipeline_mode = #tpu.pipeline_mode<synchronous>, transform_indices = @transform_1, window_bounds = array<i64: 9, 128, 128>}, {pipeline_mode = #tpu.pipeline_mode<synchronous>, transform_indices = @transform_2, window_bounds = array<i64: 1, 128>}, {transform_indices = @transform_3, window_bounds = array<i64: 1, 1, 288, 128>}]} {
    %cst = arith.constant 0.000000e+00 : f32
    %0 = vector.broadcast %cst : f32 to vector<288x128xf32>
    %c0 = arith.constant 0 : index
    %c0_0 = arith.constant 0 : index
    %c0_1 = arith.constant 0 : index
    %c0_2 = arith.constant 0 : index
    %1 = vector.load %arg2[%c0, %c0_0, %c0_1, %c0_2] : memref<1x1x326x128xbf16, #tpu.memory_space<vmem>>, vector<1x1x288x128xbf16>
    %2 = vector.shape_cast %1 : vector<1x1x288x128xbf16> to vector<288x128xbf16>
    %c0_3 = arith.constant 0 : index
    %c0_4 = arith.constant 0 : index
    %c0_5 = arith.constant 0 : index
    %3 = vector.load %arg3[%c0_3, %c0_4, %c0_5] : memref<9x128x128xbf16, #tpu.memory_space<vmem>>, vector<1x128x128xbf16>
    %4 = vector.shape_cast %3 : vector<1x128x128xbf16> to vector<128x128xbf16>
    %cst_6 = arith.constant dense<0.000000e+00> : vector<288x128xf32>
    %5 = tpu.matmul %2, %4, %cst_6 {dimension_numbers = #tpu.dot_dimension_numbers<[1], [0], [0], [1], [0, 0, 1, 1], [], []>} : vector<288x128xbf16>, vector<128x128xbf16>, vector<288x128xf32> -> vector<288x128xf32>
    %6 = arith.addf %0, %5 : vector<288x128xf32>
    %c0_7 = arith.constant 0 : index
    %c0_8 = arith.constant 0 : index
    %c1 = arith.constant 1 : index
    %c0_9 = arith.constant 0 : index
    %7 = vector.load %arg2[%c0_7, %c0_8, %c1, %c0_9] : memref<1x1x326x128xbf16, #tpu.memory_space<vmem>>, vector<1x1x288x128xbf16>
    %8 = vector.shape_cast %7 : vector<1x1x288x128xbf16> to vector<288x128xbf16>
    %c1_10 = arith.constant 1 : index
    %c0_11 = arith.constant 0 : index
    %c0_12 = arith.constant 0 : index
    %9 = vector.load %arg3[%c1_10, %c0_11, %c0_12] : memref<9x128x128xbf16, #tpu.memory_space<vmem>>, vector<1x128x128xbf16>
    %10 = vector.shape_cast %9 : vector<1x128x128xbf16> to vector<128x128xbf16>
    %cst_13 = arith.constant dense<0.000000e+00> : vector<288x128xf32>
    %11 = tpu.matmul %8, %10, %cst_13 {dimension_numbers = #tpu.dot_dimension_numbers<[1], [0], [0], [1], [0, 0, 1, 1], [], []>} : vector<288x128xbf16>, vector<128x128xbf16>, vector<288x128xf32> -> vector<288x128xf32>
    %12 = arith.addf %6, %11 : vector<288x128xf32>
    %c0_14 = arith.constant 0 : index
    %c0_15 = arith.constant 0 : index
    %c2 = arith.constant 2 : index
    %c0_16 = arith.constant 0 : index
    %13 = vector.load %arg2[%c0_14, %c0_15, %c2, %c0_16] : memref<1x1x326x128xbf16, #tpu.memory_space<vmem>>, vector<1x1x288x128xbf16>
    %14 = vector.shape_cast %13 : vector<1x1x288x128xbf16> to vector<288x128xbf16>
    %c2_17 = arith.constant 2 : index
    %c0_18 = arith.constant 0 : index
    %c0_19 = arith.constant 0 : index
    %15 = vector.load %arg3[%c2_17, %c0_18, %c0_19] : memref<9x128x128xbf16, #tpu.memory_space<vmem>>, vector<1x128x128xbf16>
    %16 = vector.shape_cast %15 : vector<1x128x128xbf16> to vector<128x128xbf16>
    %cst_20 = arith.constant dense<0.000000e+00> : vector<288x128xf32>
    %17 = tpu.matmul %14, %16, %cst_20 {dimension_numbers = #tpu.dot_dimension_numbers<[1], [0], [0], [1], [0, 0, 1, 1], [], []>} : vector<288x128xbf16>, vector<128x128xbf16>, vector<288x128xf32> -> vector<288x128xf32>
    %18 = arith.addf %12, %17 : vector<288x128xf32>
    %c0_21 = arith.constant 0 : index
    %c0_22 = arith.constant 0 : index
    %c18 = arith.constant 18 : index
    %c0_23 = arith.constant 0 : index
    %19 = vector.load %arg2[%c0_21, %c0_22, %c18, %c0_23] : memref<1x1x326x128xbf16, #tpu.memory_space<vmem>>, vector<1x1x288x128xbf16>
    %20 = vector.shape_cast %19 : vector<1x1x288x128xbf16> to vector<288x128xbf16>
    %c3 = arith.constant 3 : index
    %c0_24 = arith.constant 0 : index
    %c0_25 = arith.constant 0 : index
    %21 = vector.load %arg3[%c3, %c0_24, %c0_25] : memref<9x128x128xbf16, #tpu.memory_space<vmem>>, vector<1x128x128xbf16>
    %22 = vector.shape_cast %21 : vector<1x128x128xbf16> to vector<128x128xbf16>
    %cst_26 = arith.constant dense<0.000000e+00> : vector<288x128xf32>
    %23 = tpu.matmul %20, %22, %cst_26 {dimension_numbers = #tpu.dot_dimension_numbers<[1], [0], [0], [1], [0, 0, 1, 1], [], []>} : vector<288x128xbf16>, vector<128x128xbf16>, vector<288x128xf32> -> vector<288x128xf32>
    %24 = arith.addf %18, %23 : vector<288x128xf32>
    %c0_27 = arith.constant 0 : index
    %c0_28 = arith.constant 0 : index
    %c19 = arith.constant 19 : index
    %c0_29 = arith.constant 0 : index
    %25 = vector.load %arg2[%c0_27, %c0_28, %c19, %c0_29] : memref<1x1x326x128xbf16, #tpu.memory_space<vmem>>, vector<1x1x288x128xbf16>
    %26 = vector.shape_cast %25 : vector<1x1x288x128xbf16> to vector<288x128xbf16>
    %c4 = arith.constant 4 : index
    %c0_30 = arith.constant 0 : index
    %c0_31 = arith.constant 0 : index
    %27 = vector.load %arg3[%c4, %c0_30, %c0_31] : memref<9x128x128xbf16, #tpu.memory_space<vmem>>, vector<1x128x128xbf16>
    %28 = vector.shape_cast %27 : vector<1x128x128xbf16> to vector<128x128xbf16>
    %cst_32 = arith.constant dense<0.000000e+00> : vector<288x128xf32>
    %29 = tpu.matmul %26, %28, %cst_32 {dimension_numbers = #tpu.dot_dimension_numbers<[1], [0], [0], [1], [0, 0, 1, 1], [], []>} : vector<288x128xbf16>, vector<128x128xbf16>, vector<288x128xf32> -> vector<288x128xf32>
    %30 = arith.addf %24, %29 : vector<288x128xf32>
    %c0_33 = arith.constant 0 : index
    %c0_34 = arith.constant 0 : index
    %c20 = arith.constant 20 : index
    %c0_35 = arith.constant 0 : index
    %31 = vector.load %arg2[%c0_33, %c0_34, %c20, %c0_35] : memref<1x1x326x128xbf16, #tpu.memory_space<vmem>>, vector<1x1x288x128xbf16>
    %32 = vector.shape_cast %31 : vector<1x1x288x128xbf16> to vector<288x128xbf16>
    %c5 = arith.constant 5 : index
    %c0_36 = arith.constant 0 : index
    %c0_37 = arith.constant 0 : index
    %33 = vector.load %arg3[%c5, %c0_36, %c0_37] : memref<9x128x128xbf16, #tpu.memory_space<vmem>>, vector<1x128x128xbf16>
    %34 = vector.shape_cast %33 : vector<1x128x128xbf16> to vector<128x128xbf16>
    %cst_38 = arith.constant dense<0.000000e+00> : vector<288x128xf32>
    %35 = tpu.matmul %32, %34, %cst_38 {dimension_numbers = #tpu.dot_dimension_numbers<[1], [0], [0], [1], [0, 0, 1, 1], [], []>} : vector<288x128xbf16>, vector<128x128xbf16>, vector<288x128xf32> -> vector<288x128xf32>
    %36 = arith.addf %30, %35 : vector<288x128xf32>
    %c0_39 = arith.constant 0 : index
    %c0_40 = arith.constant 0 : index
    %c36 = arith.constant 36 : index
    %c0_41 = arith.constant 0 : index
    %37 = vector.load %arg2[%c0_39, %c0_40, %c36, %c0_41] : memref<1x1x326x128xbf16, #tpu.memory_space<vmem>>, vector<1x1x288x128xbf16>
    %38 = vector.shape_cast %37 : vector<1x1x288x128xbf16> to vector<288x128xbf16>
    %c6 = arith.constant 6 : index
    %c0_42 = arith.constant 0 : index
    %c0_43 = arith.constant 0 : index
    %39 = vector.load %arg3[%c6, %c0_42, %c0_43] : memref<9x128x128xbf16, #tpu.memory_space<vmem>>, vector<1x128x128xbf16>
    %40 = vector.shape_cast %39 : vector<1x128x128xbf16> to vector<128x128xbf16>
    %cst_44 = arith.constant dense<0.000000e+00> : vector<288x128xf32>
    %41 = tpu.matmul %38, %40, %cst_44 {dimension_numbers = #tpu.dot_dimension_numbers<[1], [0], [0], [1], [0, 0, 1, 1], [], []>} : vector<288x128xbf16>, vector<128x128xbf16>, vector<288x128xf32> -> vector<288x128xf32>
    %42 = arith.addf %36, %41 : vector<288x128xf32>
    %c0_45 = arith.constant 0 : index
    %c0_46 = arith.constant 0 : index
    %c37 = arith.constant 37 : index
    %c0_47 = arith.constant 0 : index
    %43 = vector.load %arg2[%c0_45, %c0_46, %c37, %c0_47] : memref<1x1x326x128xbf16, #tpu.memory_space<vmem>>, vector<1x1x288x128xbf16>
    %44 = vector.shape_cast %43 : vector<1x1x288x128xbf16> to vector<288x128xbf16>
    %c7 = arith.constant 7 : index
    %c0_48 = arith.constant 0 : index
    %c0_49 = arith.constant 0 : index
    %45 = vector.load %arg3[%c7, %c0_48, %c0_49] : memref<9x128x128xbf16, #tpu.memory_space<vmem>>, vector<1x128x128xbf16>
    %46 = vector.shape_cast %45 : vector<1x128x128xbf16> to vector<128x128xbf16>
    %cst_50 = arith.constant dense<0.000000e+00> : vector<288x128xf32>
    %47 = tpu.matmul %44, %46, %cst_50 {dimension_numbers = #tpu.dot_dimension_numbers<[1], [0], [0], [1], [0, 0, 1, 1], [], []>} : vector<288x128xbf16>, vector<128x128xbf16>, vector<288x128xf32> -> vector<288x128xf32>
    %48 = arith.addf %42, %47 : vector<288x128xf32>
    %c0_51 = arith.constant 0 : index
    %c0_52 = arith.constant 0 : index
    %c38 = arith.constant 38 : index
    %c0_53 = arith.constant 0 : index
    %49 = vector.load %arg2[%c0_51, %c0_52, %c38, %c0_53] : memref<1x1x326x128xbf16, #tpu.memory_space<vmem>>, vector<1x1x288x128xbf16>
    %50 = vector.shape_cast %49 : vector<1x1x288x128xbf16> to vector<288x128xbf16>
    %c8 = arith.constant 8 : index
    %c0_54 = arith.constant 0 : index
    %c0_55 = arith.constant 0 : index
    %51 = vector.load %arg3[%c8, %c0_54, %c0_55] : memref<9x128x128xbf16, #tpu.memory_space<vmem>>, vector<1x128x128xbf16>
    %52 = vector.shape_cast %51 : vector<1x128x128xbf16> to vector<128x128xbf16>
    %cst_56 = arith.constant dense<0.000000e+00> : vector<288x128xf32>
    %53 = tpu.matmul %50, %52, %cst_56 {dimension_numbers = #tpu.dot_dimension_numbers<[1], [0], [0], [1], [0, 0, 1, 1], [], []>} : vector<288x128xbf16>, vector<128x128xbf16>, vector<288x128xf32> -> vector<288x128xf32>
    %54 = arith.addf %48, %53 : vector<288x128xf32>
    %c0_57 = arith.constant 0 : index
    %c0_58 = arith.constant 0 : index
    %55 = vector.load %arg4[%c0_57, %c0_58] : memref<1x128xf32, #tpu.memory_space<vmem>>, vector<1x128xf32>
    %56 = vector.broadcast %55 : vector<1x128xf32> to vector<288x128xf32>
    %57 = arith.addf %54, %56 : vector<288x128xf32>
    %cst_59 = arith.constant 0.000000e+00 : f32
    %58 = vector.broadcast %cst_59 : f32 to vector<288x128xf32>
    %59 = arith.maximumf %57, %58 : vector<288x128xf32>
    %60 = arith.truncf %59 : vector<288x128xf32> to vector<288x128xbf16>
    %c0_60 = arith.constant 0 : index
    %c0_61 = arith.constant 0 : index
    %c0_62 = arith.constant 0 : index
    %c0_63 = arith.constant 0 : index
    %61 = vector.load %arg5[%c0_60, %c0_61, %c0_62, %c0_63] : memref<1x1x288x128xbf16, #tpu.memory_space<vmem>>, vector<1x1x288x128xbf16>
    %62 = vector.shape_cast %61 : vector<1x1x288x128xbf16> to vector<288x128xbf16>
    %63 = vector.shape_cast %60 : vector<288x128xbf16> to vector<1x1x288x128xbf16>
    tpu.vector_store %arg5[%c0_60, %c0_61, %c0_62, %c0_63], %63 {strides = array<i32>} : memref<1x1x288x128xbf16, #tpu.memory_space<vmem>>, vector<1x1x288x128xbf16>,
    return
  }
  func.func @transform_0(%arg0: i32, %arg1: i32) -> (i32, i32, i32, i32) {
    %c0_i32 = arith.constant 0 : i32
    %c0_i32_0 = arith.constant 0 : i32
    %c0_i32_1 = arith.constant 0 : i32
    return %arg0, %arg1, %c0_i32, %c0_i32_0 : i32, i32, i32, i32
  }
  func.func @transform_1(%arg0: i32, %arg1: i32) -> (i32, i32, i32) {
    %c0_i32 = arith.constant 0 : i32
    %c0_i32_0 = arith.constant 0 : i32
    %c0_i32_1 = arith.constant 0 : i32
    %c0_i32_2 = arith.constant 0 : i32
    return %c0_i32, %c0_i32_0, %c0_i32_1 : i32, i32, i32
  }
  func.func @transform_2(%arg0: i32, %arg1: i32) -> (i32, i32) {
    %c0_i32 = arith.constant 0 : i32
    %c0_i32_0 = arith.constant 0 : i32
    %c0_i32_1 = arith.constant 0 : i32
    return %c0_i32, %c0_i32_0 : i32, i32
  }
  func.func @transform_3(%arg0: i32, %arg1: i32) -> (i32, i32, i32, i32) {
    %c0_i32 = arith.constant 0 : i32
    %c0_i32_0 = arith.constant 0 : i32
    %c0_i32_1 = arith.constant 0 : i32
    return %arg0, %arg1, %c0_i32, %c0_i32_0 : i32, i32, i32, i32
  }
}

module attributes {stable_mosaic.version = 11 : i64} {
  func.func @_avgpool4_kernel(%arg0: i32, %arg1: memref<128x128xbf16, #tpu.memory_space<vmem>>, %arg2: memref<128x128xbf16, #tpu.memory_space<vmem>>, %arg3: memref<128x128xbf16, #tpu.memory_space<vmem>>, %arg4: memref<128x128xbf16, #tpu.memory_space<vmem>>, %arg5: memref<128x128xbf16, #tpu.memory_space<vmem>>) attributes {dimension_semantics = [#tpu.dimension_semantics<parallel>], iteration_bounds = array<i64: 1>, scalar_prefetch = 0 : i64, scratch_operands = 0 : i64, tpu.core_type = #tpu.core_type<tc>, window_params = [{transform_indices = @transform_0, window_bounds = array<i64: 128, 128>}, {transform_indices = @transform_1, window_bounds = array<i64: 128, 128>}, {transform_indices = @transform_2, window_bounds = array<i64: 128, 128>}, {transform_indices = @transform_3, window_bounds = array<i64: 128, 128>}, {transform_indices = @transform_4, window_bounds = array<i64: 128, 128>}]} {
    %c0 = arith.constant 0 : index
    %c0_0 = arith.constant 0 : index
    %0 = vector.load %arg1[%c0, %c0_0] : memref<128x128xbf16, #tpu.memory_space<vmem>>, vector<128x128xbf16>
    %1 = arith.extf %0 : vector<128x128xbf16> to vector<128x128xf32>
    %c0_1 = arith.constant 0 : index
    %c0_2 = arith.constant 0 : index
    %2 = vector.load %arg2[%c0_1, %c0_2] : memref<128x128xbf16, #tpu.memory_space<vmem>>, vector<128x128xbf16>
    %3 = arith.extf %2 : vector<128x128xbf16> to vector<128x128xf32>
    %4 = arith.addf %1, %3 : vector<128x128xf32>
    %c0_3 = arith.constant 0 : index
    %c0_4 = arith.constant 0 : index
    %5 = vector.load %arg3[%c0_3, %c0_4] : memref<128x128xbf16, #tpu.memory_space<vmem>>, vector<128x128xbf16>
    %6 = arith.extf %5 : vector<128x128xbf16> to vector<128x128xf32>
    %7 = arith.addf %4, %6 : vector<128x128xf32>
    %c0_5 = arith.constant 0 : index
    %c0_6 = arith.constant 0 : index
    %8 = vector.load %arg4[%c0_5, %c0_6] : memref<128x128xbf16, #tpu.memory_space<vmem>>, vector<128x128xbf16>
    %9 = arith.extf %8 : vector<128x128xbf16> to vector<128x128xf32>
    %10 = arith.addf %7, %9 : vector<128x128xf32>
    %cst = arith.constant 2.500000e-01 : f32
    %11 = vector.broadcast %cst : f32 to vector<128x128xf32>
    %12 = arith.mulf %11, %10 : vector<128x128xf32>
    %13 = arith.truncf %12 : vector<128x128xf32> to vector<128x128xbf16>
    %c0_7 = arith.constant 0 : index
    %c0_8 = arith.constant 0 : index
    %14 = vector.load %arg5[%c0_7, %c0_8] : memref<128x128xbf16, #tpu.memory_space<vmem>>, vector<128x128xbf16>
    tpu.vector_store %arg5[%c0_7, %c0_8], %13 {strides = array<i32>} : memref<128x128xbf16, #tpu.memory_space<vmem>>, vector<128x128xbf16>,
    return
  }
  func.func @transform_0(%arg0: i32) -> (i32, i32) {
    %c0_i32 = arith.constant 0 : i32
    %c0_i32_0 = arith.constant 0 : i32
    return %arg0, %c0_i32 : i32, i32
  }
  func.func @transform_1(%arg0: i32) -> (i32, i32) {
    %c0_i32 = arith.constant 0 : i32
    %c0_i32_0 = arith.constant 0 : i32
    return %arg0, %c0_i32 : i32, i32
  }
  func.func @transform_2(%arg0: i32) -> (i32, i32) {
    %c0_i32 = arith.constant 0 : i32
    %c0_i32_0 = arith.constant 0 : i32
    return %arg0, %c0_i32 : i32, i32
  }
  func.func @transform_3(%arg0: i32) -> (i32, i32) {
    %c0_i32 = arith.constant 0 : i32
    %c0_i32_0 = arith.constant 0 : i32
    return %arg0, %c0_i32 : i32, i32
  }
  func.func @transform_4(%arg0: i32) -> (i32, i32) {
    %c0_i32 = arith.constant 0 : i32
    %c0_i32_0 = arith.constant 0 : i32
    return %arg0, %c0_i32 : i32, i32
  }
}

module attributes {stable_mosaic.version = 11 : i64} {
  func.func @_conv3x3_bn_relu_kernel(%arg0: i32, %arg1: i32, %arg2: memref<1x1x102x128xbf16, #tpu.memory_space<vmem>>, %arg3: memref<9x128x128xbf16, #tpu.memory_space<vmem>>, %arg4: memref<1x128xf32, #tpu.memory_space<vmem>>, %arg5: memref<1x1x80x128xbf16, #tpu.memory_space<vmem>>) attributes {dimension_semantics = [#tpu.dimension_semantics<parallel>, #tpu.dimension_semantics<parallel>], iteration_bounds = array<i64: 2, 1>, scalar_prefetch = 0 : i64, scratch_operands = 0 : i64, tpu.core_type = #tpu.core_type<tc>, window_params = [{transform_indices = @transform_0, window_bounds = array<i64: 1, 1, 102, 128>}, {pipeline_mode = #tpu.pipeline_mode<synchronous>, transform_indices = @transform_1, window_bounds = array<i64: 9, 128, 128>}, {pipeline_mode = #tpu.pipeline_mode<synchronous>, transform_indices = @transform_2, window_bounds = array<i64: 1, 128>}, {transform_indices = @transform_3, window_bounds = array<i64: 1, 1, 80, 128>}]} {
    %cst = arith.constant 0.000000e+00 : f32
    %0 = vector.broadcast %cst : f32 to vector<80x128xf32>
    %c0 = arith.constant 0 : index
    %c0_0 = arith.constant 0 : index
    %c0_1 = arith.constant 0 : index
    %c0_2 = arith.constant 0 : index
    %1 = vector.load %arg2[%c0, %c0_0, %c0_1, %c0_2] : memref<1x1x102x128xbf16, #tpu.memory_space<vmem>>, vector<1x1x80x128xbf16>
    %2 = vector.shape_cast %1 : vector<1x1x80x128xbf16> to vector<80x128xbf16>
    %c0_3 = arith.constant 0 : index
    %c0_4 = arith.constant 0 : index
    %c0_5 = arith.constant 0 : index
    %3 = vector.load %arg3[%c0_3, %c0_4, %c0_5] : memref<9x128x128xbf16, #tpu.memory_space<vmem>>, vector<1x128x128xbf16>
    %4 = vector.shape_cast %3 : vector<1x128x128xbf16> to vector<128x128xbf16>
    %cst_6 = arith.constant dense<0.000000e+00> : vector<80x128xf32>
    %5 = tpu.matmul %2, %4, %cst_6 {dimension_numbers = #tpu.dot_dimension_numbers<[1], [0], [0], [1], [0, 0, 1, 1], [], []>} : vector<80x128xbf16>, vector<128x128xbf16>, vector<80x128xf32> -> vector<80x128xf32>
    %6 = arith.addf %0, %5 : vector<80x128xf32>
    %c0_7 = arith.constant 0 : index
    %c0_8 = arith.constant 0 : index
    %c1 = arith.constant 1 : index
    %c0_9 = arith.constant 0 : index
    %7 = vector.load %arg2[%c0_7, %c0_8, %c1, %c0_9] : memref<1x1x102x128xbf16, #tpu.memory_space<vmem>>, vector<1x1x80x128xbf16>
    %8 = vector.shape_cast %7 : vector<1x1x80x128xbf16> to vector<80x128xbf16>
    %c1_10 = arith.constant 1 : index
    %c0_11 = arith.constant 0 : index
    %c0_12 = arith.constant 0 : index
    %9 = vector.load %arg3[%c1_10, %c0_11, %c0_12] : memref<9x128x128xbf16, #tpu.memory_space<vmem>>, vector<1x128x128xbf16>
    %10 = vector.shape_cast %9 : vector<1x128x128xbf16> to vector<128x128xbf16>
    %cst_13 = arith.constant dense<0.000000e+00> : vector<80x128xf32>
    %11 = tpu.matmul %8, %10, %cst_13 {dimension_numbers = #tpu.dot_dimension_numbers<[1], [0], [0], [1], [0, 0, 1, 1], [], []>} : vector<80x128xbf16>, vector<128x128xbf16>, vector<80x128xf32> -> vector<80x128xf32>
    %12 = arith.addf %6, %11 : vector<80x128xf32>
    %c0_14 = arith.constant 0 : index
    %c0_15 = arith.constant 0 : index
    %c2 = arith.constant 2 : index
    %c0_16 = arith.constant 0 : index
    %13 = vector.load %arg2[%c0_14, %c0_15, %c2, %c0_16] : memref<1x1x102x128xbf16, #tpu.memory_space<vmem>>, vector<1x1x80x128xbf16>
    %14 = vector.shape_cast %13 : vector<1x1x80x128xbf16> to vector<80x128xbf16>
    %c2_17 = arith.constant 2 : index
    %c0_18 = arith.constant 0 : index
    %c0_19 = arith.constant 0 : index
    %15 = vector.load %arg3[%c2_17, %c0_18, %c0_19] : memref<9x128x128xbf16, #tpu.memory_space<vmem>>, vector<1x128x128xbf16>
    %16 = vector.shape_cast %15 : vector<1x128x128xbf16> to vector<128x128xbf16>
    %cst_20 = arith.constant dense<0.000000e+00> : vector<80x128xf32>
    %17 = tpu.matmul %14, %16, %cst_20 {dimension_numbers = #tpu.dot_dimension_numbers<[1], [0], [0], [1], [0, 0, 1, 1], [], []>} : vector<80x128xbf16>, vector<128x128xbf16>, vector<80x128xf32> -> vector<80x128xf32>
    %18 = arith.addf %12, %17 : vector<80x128xf32>
    %c0_21 = arith.constant 0 : index
    %c0_22 = arith.constant 0 : index
    %c10 = arith.constant 10 : index
    %c0_23 = arith.constant 0 : index
    %19 = vector.load %arg2[%c0_21, %c0_22, %c10, %c0_23] : memref<1x1x102x128xbf16, #tpu.memory_space<vmem>>, vector<1x1x80x128xbf16>
    %20 = vector.shape_cast %19 : vector<1x1x80x128xbf16> to vector<80x128xbf16>
    %c3 = arith.constant 3 : index
    %c0_24 = arith.constant 0 : index
    %c0_25 = arith.constant 0 : index
    %21 = vector.load %arg3[%c3, %c0_24, %c0_25] : memref<9x128x128xbf16, #tpu.memory_space<vmem>>, vector<1x128x128xbf16>
    %22 = vector.shape_cast %21 : vector<1x128x128xbf16> to vector<128x128xbf16>
    %cst_26 = arith.constant dense<0.000000e+00> : vector<80x128xf32>
    %23 = tpu.matmul %20, %22, %cst_26 {dimension_numbers = #tpu.dot_dimension_numbers<[1], [0], [0], [1], [0, 0, 1, 1], [], []>} : vector<80x128xbf16>, vector<128x128xbf16>, vector<80x128xf32> -> vector<80x128xf32>
    %24 = arith.addf %18, %23 : vector<80x128xf32>
    %c0_27 = arith.constant 0 : index
    %c0_28 = arith.constant 0 : index
    %c11 = arith.constant 11 : index
    %c0_29 = arith.constant 0 : index
    %25 = vector.load %arg2[%c0_27, %c0_28, %c11, %c0_29] : memref<1x1x102x128xbf16, #tpu.memory_space<vmem>>, vector<1x1x80x128xbf16>
    %26 = vector.shape_cast %25 : vector<1x1x80x128xbf16> to vector<80x128xbf16>
    %c4 = arith.constant 4 : index
    %c0_30 = arith.constant 0 : index
    %c0_31 = arith.constant 0 : index
    %27 = vector.load %arg3[%c4, %c0_30, %c0_31] : memref<9x128x128xbf16, #tpu.memory_space<vmem>>, vector<1x128x128xbf16>
    %28 = vector.shape_cast %27 : vector<1x128x128xbf16> to vector<128x128xbf16>
    %cst_32 = arith.constant dense<0.000000e+00> : vector<80x128xf32>
    %29 = tpu.matmul %26, %28, %cst_32 {dimension_numbers = #tpu.dot_dimension_numbers<[1], [0], [0], [1], [0, 0, 1, 1], [], []>} : vector<80x128xbf16>, vector<128x128xbf16>, vector<80x128xf32> -> vector<80x128xf32>
    %30 = arith.addf %24, %29 : vector<80x128xf32>
    %c0_33 = arith.constant 0 : index
    %c0_34 = arith.constant 0 : index
    %c12 = arith.constant 12 : index
    %c0_35 = arith.constant 0 : index
    %31 = vector.load %arg2[%c0_33, %c0_34, %c12, %c0_35] : memref<1x1x102x128xbf16, #tpu.memory_space<vmem>>, vector<1x1x80x128xbf16>
    %32 = vector.shape_cast %31 : vector<1x1x80x128xbf16> to vector<80x128xbf16>
    %c5 = arith.constant 5 : index
    %c0_36 = arith.constant 0 : index
    %c0_37 = arith.constant 0 : index
    %33 = vector.load %arg3[%c5, %c0_36, %c0_37] : memref<9x128x128xbf16, #tpu.memory_space<vmem>>, vector<1x128x128xbf16>
    %34 = vector.shape_cast %33 : vector<1x128x128xbf16> to vector<128x128xbf16>
    %cst_38 = arith.constant dense<0.000000e+00> : vector<80x128xf32>
    %35 = tpu.matmul %32, %34, %cst_38 {dimension_numbers = #tpu.dot_dimension_numbers<[1], [0], [0], [1], [0, 0, 1, 1], [], []>} : vector<80x128xbf16>, vector<128x128xbf16>, vector<80x128xf32> -> vector<80x128xf32>
    %36 = arith.addf %30, %35 : vector<80x128xf32>
    %c0_39 = arith.constant 0 : index
    %c0_40 = arith.constant 0 : index
    %c20 = arith.constant 20 : index
    %c0_41 = arith.constant 0 : index
    %37 = vector.load %arg2[%c0_39, %c0_40, %c20, %c0_41] : memref<1x1x102x128xbf16, #tpu.memory_space<vmem>>, vector<1x1x80x128xbf16>
    %38 = vector.shape_cast %37 : vector<1x1x80x128xbf16> to vector<80x128xbf16>
    %c6 = arith.constant 6 : index
    %c0_42 = arith.constant 0 : index
    %c0_43 = arith.constant 0 : index
    %39 = vector.load %arg3[%c6, %c0_42, %c0_43] : memref<9x128x128xbf16, #tpu.memory_space<vmem>>, vector<1x128x128xbf16>
    %40 = vector.shape_cast %39 : vector<1x128x128xbf16> to vector<128x128xbf16>
    %cst_44 = arith.constant dense<0.000000e+00> : vector<80x128xf32>
    %41 = tpu.matmul %38, %40, %cst_44 {dimension_numbers = #tpu.dot_dimension_numbers<[1], [0], [0], [1], [0, 0, 1, 1], [], []>} : vector<80x128xbf16>, vector<128x128xbf16>, vector<80x128xf32> -> vector<80x128xf32>
    %42 = arith.addf %36, %41 : vector<80x128xf32>
    %c0_45 = arith.constant 0 : index
    %c0_46 = arith.constant 0 : index
    %c21 = arith.constant 21 : index
    %c0_47 = arith.constant 0 : index
    %43 = vector.load %arg2[%c0_45, %c0_46, %c21, %c0_47] : memref<1x1x102x128xbf16, #tpu.memory_space<vmem>>, vector<1x1x80x128xbf16>
    %44 = vector.shape_cast %43 : vector<1x1x80x128xbf16> to vector<80x128xbf16>
    %c7 = arith.constant 7 : index
    %c0_48 = arith.constant 0 : index
    %c0_49 = arith.constant 0 : index
    %45 = vector.load %arg3[%c7, %c0_48, %c0_49] : memref<9x128x128xbf16, #tpu.memory_space<vmem>>, vector<1x128x128xbf16>
    %46 = vector.shape_cast %45 : vector<1x128x128xbf16> to vector<128x128xbf16>
    %cst_50 = arith.constant dense<0.000000e+00> : vector<80x128xf32>
    %47 = tpu.matmul %44, %46, %cst_50 {dimension_numbers = #tpu.dot_dimension_numbers<[1], [0], [0], [1], [0, 0, 1, 1], [], []>} : vector<80x128xbf16>, vector<128x128xbf16>, vector<80x128xf32> -> vector<80x128xf32>
    %48 = arith.addf %42, %47 : vector<80x128xf32>
    %c0_51 = arith.constant 0 : index
    %c0_52 = arith.constant 0 : index
    %c22 = arith.constant 22 : index
    %c0_53 = arith.constant 0 : index
    %49 = vector.load %arg2[%c0_51, %c0_52, %c22, %c0_53] : memref<1x1x102x128xbf16, #tpu.memory_space<vmem>>, vector<1x1x80x128xbf16>
    %50 = vector.shape_cast %49 : vector<1x1x80x128xbf16> to vector<80x128xbf16>
    %c8 = arith.constant 8 : index
    %c0_54 = arith.constant 0 : index
    %c0_55 = arith.constant 0 : index
    %51 = vector.load %arg3[%c8, %c0_54, %c0_55] : memref<9x128x128xbf16, #tpu.memory_space<vmem>>, vector<1x128x128xbf16>
    %52 = vector.shape_cast %51 : vector<1x128x128xbf16> to vector<128x128xbf16>
    %cst_56 = arith.constant dense<0.000000e+00> : vector<80x128xf32>
    %53 = tpu.matmul %50, %52, %cst_56 {dimension_numbers = #tpu.dot_dimension_numbers<[1], [0], [0], [1], [0, 0, 1, 1], [], []>} : vector<80x128xbf16>, vector<128x128xbf16>, vector<80x128xf32> -> vector<80x128xf32>
    %54 = arith.addf %48, %53 : vector<80x128xf32>
    %c0_57 = arith.constant 0 : index
    %c0_58 = arith.constant 0 : index
    %55 = vector.load %arg4[%c0_57, %c0_58] : memref<1x128xf32, #tpu.memory_space<vmem>>, vector<1x128xf32>
    %56 = vector.broadcast %55 : vector<1x128xf32> to vector<80x128xf32>
    %57 = arith.addf %54, %56 : vector<80x128xf32>
    %cst_59 = arith.constant 0.000000e+00 : f32
    %58 = vector.broadcast %cst_59 : f32 to vector<80x128xf32>
    %59 = arith.maximumf %57, %58 : vector<80x128xf32>
    %60 = arith.truncf %59 : vector<80x128xf32> to vector<80x128xbf16>
    %c0_60 = arith.constant 0 : index
    %c0_61 = arith.constant 0 : index
    %c0_62 = arith.constant 0 : index
    %c0_63 = arith.constant 0 : index
    %61 = vector.load %arg5[%c0_60, %c0_61, %c0_62, %c0_63] : memref<1x1x80x128xbf16, #tpu.memory_space<vmem>>, vector<1x1x80x128xbf16>
    %62 = vector.shape_cast %61 : vector<1x1x80x128xbf16> to vector<80x128xbf16>
    %63 = vector.shape_cast %60 : vector<80x128xbf16> to vector<1x1x80x128xbf16>
    tpu.vector_store %arg5[%c0_60, %c0_61, %c0_62, %c0_63], %63 {strides = array<i32>} : memref<1x1x80x128xbf16, #tpu.memory_space<vmem>>, vector<1x1x80x128xbf16>,
    return
  }
  func.func @transform_0(%arg0: i32, %arg1: i32) -> (i32, i32, i32, i32) {
    %c0_i32 = arith.constant 0 : i32
    %c0_i32_0 = arith.constant 0 : i32
    %c0_i32_1 = arith.constant 0 : i32
    return %arg0, %arg1, %c0_i32, %c0_i32_0 : i32, i32, i32, i32
  }
  func.func @transform_1(%arg0: i32, %arg1: i32) -> (i32, i32, i32) {
    %c0_i32 = arith.constant 0 : i32
    %c0_i32_0 = arith.constant 0 : i32
    %c0_i32_1 = arith.constant 0 : i32
    %c0_i32_2 = arith.constant 0 : i32
    return %c0_i32, %c0_i32_0, %c0_i32_1 : i32, i32, i32
  }
  func.func @transform_2(%arg0: i32, %arg1: i32) -> (i32, i32) {
    %c0_i32 = arith.constant 0 : i32
    %c0_i32_0 = arith.constant 0 : i32
    %c0_i32_1 = arith.constant 0 : i32
    return %c0_i32, %c0_i32_0 : i32, i32
  }
  func.func @transform_3(%arg0: i32, %arg1: i32) -> (i32, i32, i32, i32) {
    %c0_i32 = arith.constant 0 : i32
    %c0_i32_0 = arith.constant 0 : i32
    %c0_i32_1 = arith.constant 0 : i32
    return %arg0, %arg1, %c0_i32, %c0_i32_0 : i32, i32, i32, i32
  }
}

module attributes {stable_mosaic.version = 11 : i64} {
  func.func @_avgpool4_kernel(%arg0: i32, %arg1: memref<32x128xbf16, #tpu.memory_space<vmem>>, %arg2: memref<32x128xbf16, #tpu.memory_space<vmem>>, %arg3: memref<32x128xbf16, #tpu.memory_space<vmem>>, %arg4: memref<32x128xbf16, #tpu.memory_space<vmem>>, %arg5: memref<32x128xbf16, #tpu.memory_space<vmem>>) attributes {dimension_semantics = [#tpu.dimension_semantics<parallel>], iteration_bounds = array<i64: 1>, scalar_prefetch = 0 : i64, scratch_operands = 0 : i64, tpu.core_type = #tpu.core_type<tc>, window_params = [{transform_indices = @transform_0, window_bounds = array<i64: 32, 128>}, {transform_indices = @transform_1, window_bounds = array<i64: 32, 128>}, {transform_indices = @transform_2, window_bounds = array<i64: 32, 128>}, {transform_indices = @transform_3, window_bounds = array<i64: 32, 128>}, {transform_indices = @transform_4, window_bounds = array<i64: 32, 128>}]} {
    %c0 = arith.constant 0 : index
    %c0_0 = arith.constant 0 : index
    %0 = vector.load %arg1[%c0, %c0_0] : memref<32x128xbf16, #tpu.memory_space<vmem>>, vector<32x128xbf16>
    %1 = arith.extf %0 : vector<32x128xbf16> to vector<32x128xf32>
    %c0_1 = arith.constant 0 : index
    %c0_2 = arith.constant 0 : index
    %2 = vector.load %arg2[%c0_1, %c0_2] : memref<32x128xbf16, #tpu.memory_space<vmem>>, vector<32x128xbf16>
    %3 = arith.extf %2 : vector<32x128xbf16> to vector<32x128xf32>
    %4 = arith.addf %1, %3 : vector<32x128xf32>
    %c0_3 = arith.constant 0 : index
    %c0_4 = arith.constant 0 : index
    %5 = vector.load %arg3[%c0_3, %c0_4] : memref<32x128xbf16, #tpu.memory_space<vmem>>, vector<32x128xbf16>
    %6 = arith.extf %5 : vector<32x128xbf16> to vector<32x128xf32>
    %7 = arith.addf %4, %6 : vector<32x128xf32>
    %c0_5 = arith.constant 0 : index
    %c0_6 = arith.constant 0 : index
    %8 = vector.load %arg4[%c0_5, %c0_6] : memref<32x128xbf16, #tpu.memory_space<vmem>>, vector<32x128xbf16>
    %9 = arith.extf %8 : vector<32x128xbf16> to vector<32x128xf32>
    %10 = arith.addf %7, %9 : vector<32x128xf32>
    %cst = arith.constant 2.500000e-01 : f32
    %11 = vector.broadcast %cst : f32 to vector<32x128xf32>
    %12 = arith.mulf %11, %10 : vector<32x128xf32>
    %13 = arith.truncf %12 : vector<32x128xf32> to vector<32x128xbf16>
    %c0_7 = arith.constant 0 : index
    %c0_8 = arith.constant 0 : index
    %14 = vector.load %arg5[%c0_7, %c0_8] : memref<32x128xbf16, #tpu.memory_space<vmem>>, vector<32x128xbf16>
    tpu.vector_store %arg5[%c0_7, %c0_8], %13 {strides = array<i32>} : memref<32x128xbf16, #tpu.memory_space<vmem>>, vector<32x128xbf16>,
    return
  }
  func.func @transform_0(%arg0: i32) -> (i32, i32) {
    %c0_i32 = arith.constant 0 : i32
    %c0_i32_0 = arith.constant 0 : i32
    return %arg0, %c0_i32 : i32, i32
  }
  func.func @transform_1(%arg0: i32) -> (i32, i32) {
    %c0_i32 = arith.constant 0 : i32
    %c0_i32_0 = arith.constant 0 : i32
    return %arg0, %c0_i32 : i32, i32
  }
  func.func @transform_2(%arg0: i32) -> (i32, i32) {
    %c0_i32 = arith.constant 0 : i32
    %c0_i32_0 = arith.constant 0 : i32
    return %arg0, %c0_i32 : i32, i32
  }
  func.func @transform_3(%arg0: i32) -> (i32, i32) {
    %c0_i32 = arith.constant 0 : i32
    %c0_i32_0 = arith.constant 0 : i32
    return %arg0, %c0_i32 : i32, i32
  }
  func.func @transform_4(%arg0: i32) -> (i32, i32) {
    %c0_i32 = arith.constant 0 : i32
    %c0_i32_0 = arith.constant 0 : i32
    return %arg0, %c0_i32 : i32, i32
  }
}

module attributes {stable_mosaic.version = 11 : i64} {
  func.func @_conv3x3_bn_relu_kernel(%arg0: i32, %arg1: i32, %arg2: memref<1x1x38x128xbf16, #tpu.memory_space<vmem>>, %arg3: memref<9x128x128xbf16, #tpu.memory_space<vmem>>, %arg4: memref<1x128xf32, #tpu.memory_space<vmem>>, %arg5: memref<1x1x24x128xbf16, #tpu.memory_space<vmem>>) attributes {dimension_semantics = [#tpu.dimension_semantics<parallel>, #tpu.dimension_semantics<parallel>], iteration_bounds = array<i64: 2, 1>, scalar_prefetch = 0 : i64, scratch_operands = 0 : i64, tpu.core_type = #tpu.core_type<tc>, window_params = [{transform_indices = @transform_0, window_bounds = array<i64: 1, 1, 38, 128>}, {pipeline_mode = #tpu.pipeline_mode<synchronous>, transform_indices = @transform_1, window_bounds = array<i64: 9, 128, 128>}, {pipeline_mode = #tpu.pipeline_mode<synchronous>, transform_indices = @transform_2, window_bounds = array<i64: 1, 128>}, {transform_indices = @transform_3, window_bounds = array<i64: 1, 1, 24, 128>}]} {
    %cst = arith.constant 0.000000e+00 : f32
    %0 = vector.broadcast %cst : f32 to vector<24x128xf32>
    %c0 = arith.constant 0 : index
    %c0_0 = arith.constant 0 : index
    %c0_1 = arith.constant 0 : index
    %c0_2 = arith.constant 0 : index
    %1 = vector.load %arg2[%c0, %c0_0, %c0_1, %c0_2] : memref<1x1x38x128xbf16, #tpu.memory_space<vmem>>, vector<1x1x24x128xbf16>
    %2 = vector.shape_cast %1 : vector<1x1x24x128xbf16> to vector<24x128xbf16>
    %c0_3 = arith.constant 0 : index
    %c0_4 = arith.constant 0 : index
    %c0_5 = arith.constant 0 : index
    %3 = vector.load %arg3[%c0_3, %c0_4, %c0_5] : memref<9x128x128xbf16, #tpu.memory_space<vmem>>, vector<1x128x128xbf16>
    %4 = vector.shape_cast %3 : vector<1x128x128xbf16> to vector<128x128xbf16>
    %cst_6 = arith.constant dense<0.000000e+00> : vector<24x128xf32>
    %5 = tpu.matmul %2, %4, %cst_6 {dimension_numbers = #tpu.dot_dimension_numbers<[1], [0], [0], [1], [0, 0, 1, 1], [], []>} : vector<24x128xbf16>, vector<128x128xbf16>, vector<24x128xf32> -> vector<24x128xf32>
    %6 = arith.addf %0, %5 : vector<24x128xf32>
    %c0_7 = arith.constant 0 : index
    %c0_8 = arith.constant 0 : index
    %c1 = arith.constant 1 : index
    %c0_9 = arith.constant 0 : index
    %7 = vector.load %arg2[%c0_7, %c0_8, %c1, %c0_9] : memref<1x1x38x128xbf16, #tpu.memory_space<vmem>>, vector<1x1x24x128xbf16>
    %8 = vector.shape_cast %7 : vector<1x1x24x128xbf16> to vector<24x128xbf16>
    %c1_10 = arith.constant 1 : index
    %c0_11 = arith.constant 0 : index
    %c0_12 = arith.constant 0 : index
    %9 = vector.load %arg3[%c1_10, %c0_11, %c0_12] : memref<9x128x128xbf16, #tpu.memory_space<vmem>>, vector<1x128x128xbf16>
    %10 = vector.shape_cast %9 : vector<1x128x128xbf16> to vector<128x128xbf16>
    %cst_13 = arith.constant dense<0.000000e+00> : vector<24x128xf32>
    %11 = tpu.matmul %8, %10, %cst_13 {dimension_numbers = #tpu.dot_dimension_numbers<[1], [0], [0], [1], [0, 0, 1, 1], [], []>} : vector<24x128xbf16>, vector<128x128xbf16>, vector<24x128xf32> -> vector<24x128xf32>
    %12 = arith.addf %6, %11 : vector<24x128xf32>
    %c0_14 = arith.constant 0 : index
    %c0_15 = arith.constant 0 : index
    %c2 = arith.constant 2 : index
    %c0_16 = arith.constant 0 : index
    %13 = vector.load %arg2[%c0_14, %c0_15, %c2, %c0_16] : memref<1x1x38x128xbf16, #tpu.memory_space<vmem>>, vector<1x1x24x128xbf16>
    %14 = vector.shape_cast %13 : vector<1x1x24x128xbf16> to vector<24x128xbf16>
    %c2_17 = arith.constant 2 : index
    %c0_18 = arith.constant 0 : index
    %c0_19 = arith.constant 0 : index
    %15 = vector.load %arg3[%c2_17, %c0_18, %c0_19] : memref<9x128x128xbf16, #tpu.memory_space<vmem>>, vector<1x128x128xbf16>
    %16 = vector.shape_cast %15 : vector<1x128x128xbf16> to vector<128x128xbf16>
    %cst_20 = arith.constant dense<0.000000e+00> : vector<24x128xf32>
    %17 = tpu.matmul %14, %16, %cst_20 {dimension_numbers = #tpu.dot_dimension_numbers<[1], [0], [0], [1], [0, 0, 1, 1], [], []>} : vector<24x128xbf16>, vector<128x128xbf16>, vector<24x128xf32> -> vector<24x128xf32>
    %18 = arith.addf %12, %17 : vector<24x128xf32>
    %c0_21 = arith.constant 0 : index
    %c0_22 = arith.constant 0 : index
    %c6 = arith.constant 6 : index
    %c0_23 = arith.constant 0 : index
    %19 = vector.load %arg2[%c0_21, %c0_22, %c6, %c0_23] : memref<1x1x38x128xbf16, #tpu.memory_space<vmem>>, vector<1x1x24x128xbf16>
    %20 = vector.shape_cast %19 : vector<1x1x24x128xbf16> to vector<24x128xbf16>
    %c3 = arith.constant 3 : index
    %c0_24 = arith.constant 0 : index
    %c0_25 = arith.constant 0 : index
    %21 = vector.load %arg3[%c3, %c0_24, %c0_25] : memref<9x128x128xbf16, #tpu.memory_space<vmem>>, vector<1x128x128xbf16>
    %22 = vector.shape_cast %21 : vector<1x128x128xbf16> to vector<128x128xbf16>
    %cst_26 = arith.constant dense<0.000000e+00> : vector<24x128xf32>
    %23 = tpu.matmul %20, %22, %cst_26 {dimension_numbers = #tpu.dot_dimension_numbers<[1], [0], [0], [1], [0, 0, 1, 1], [], []>} : vector<24x128xbf16>, vector<128x128xbf16>, vector<24x128xf32> -> vector<24x128xf32>
    %24 = arith.addf %18, %23 : vector<24x128xf32>
    %c0_27 = arith.constant 0 : index
    %c0_28 = arith.constant 0 : index
    %c7 = arith.constant 7 : index
    %c0_29 = arith.constant 0 : index
    %25 = vector.load %arg2[%c0_27, %c0_28, %c7, %c0_29] : memref<1x1x38x128xbf16, #tpu.memory_space<vmem>>, vector<1x1x24x128xbf16>
    %26 = vector.shape_cast %25 : vector<1x1x24x128xbf16> to vector<24x128xbf16>
    %c4 = arith.constant 4 : index
    %c0_30 = arith.constant 0 : index
    %c0_31 = arith.constant 0 : index
    %27 = vector.load %arg3[%c4, %c0_30, %c0_31] : memref<9x128x128xbf16, #tpu.memory_space<vmem>>, vector<1x128x128xbf16>
    %28 = vector.shape_cast %27 : vector<1x128x128xbf16> to vector<128x128xbf16>
    %cst_32 = arith.constant dense<0.000000e+00> : vector<24x128xf32>
    %29 = tpu.matmul %26, %28, %cst_32 {dimension_numbers = #tpu.dot_dimension_numbers<[1], [0], [0], [1], [0, 0, 1, 1], [], []>} : vector<24x128xbf16>, vector<128x128xbf16>, vector<24x128xf32> -> vector<24x128xf32>
    %30 = arith.addf %24, %29 : vector<24x128xf32>
    %c0_33 = arith.constant 0 : index
    %c0_34 = arith.constant 0 : index
    %c8 = arith.constant 8 : index
    %c0_35 = arith.constant 0 : index
    %31 = vector.load %arg2[%c0_33, %c0_34, %c8, %c0_35] : memref<1x1x38x128xbf16, #tpu.memory_space<vmem>>, vector<1x1x24x128xbf16>
    %32 = vector.shape_cast %31 : vector<1x1x24x128xbf16> to vector<24x128xbf16>
    %c5 = arith.constant 5 : index
    %c0_36 = arith.constant 0 : index
    %c0_37 = arith.constant 0 : index
    %33 = vector.load %arg3[%c5, %c0_36, %c0_37] : memref<9x128x128xbf16, #tpu.memory_space<vmem>>, vector<1x128x128xbf16>
    %34 = vector.shape_cast %33 : vector<1x128x128xbf16> to vector<128x128xbf16>
    %cst_38 = arith.constant dense<0.000000e+00> : vector<24x128xf32>
    %35 = tpu.matmul %32, %34, %cst_38 {dimension_numbers = #tpu.dot_dimension_numbers<[1], [0], [0], [1], [0, 0, 1, 1], [], []>} : vector<24x128xbf16>, vector<128x128xbf16>, vector<24x128xf32> -> vector<24x128xf32>
    %36 = arith.addf %30, %35 : vector<24x128xf32>
    %c0_39 = arith.constant 0 : index
    %c0_40 = arith.constant 0 : index
    %c12 = arith.constant 12 : index
    %c0_41 = arith.constant 0 : index
    %37 = vector.load %arg2[%c0_39, %c0_40, %c12, %c0_41] : memref<1x1x38x128xbf16, #tpu.memory_space<vmem>>, vector<1x1x24x128xbf16>
    %38 = vector.shape_cast %37 : vector<1x1x24x128xbf16> to vector<24x128xbf16>
    %c6_42 = arith.constant 6 : index
    %c0_43 = arith.constant 0 : index
    %c0_44 = arith.constant 0 : index
    %39 = vector.load %arg3[%c6_42, %c0_43, %c0_44] : memref<9x128x128xbf16, #tpu.memory_space<vmem>>, vector<1x128x128xbf16>
    %40 = vector.shape_cast %39 : vector<1x128x128xbf16> to vector<128x128xbf16>
    %cst_45 = arith.constant dense<0.000000e+00> : vector<24x128xf32>
    %41 = tpu.matmul %38, %40, %cst_45 {dimension_numbers = #tpu.dot_dimension_numbers<[1], [0], [0], [1], [0, 0, 1, 1], [], []>} : vector<24x128xbf16>, vector<128x128xbf16>, vector<24x128xf32> -> vector<24x128xf32>
    %42 = arith.addf %36, %41 : vector<24x128xf32>
    %c0_46 = arith.constant 0 : index
    %c0_47 = arith.constant 0 : index
    %c13 = arith.constant 13 : index
    %c0_48 = arith.constant 0 : index
    %43 = vector.load %arg2[%c0_46, %c0_47, %c13, %c0_48] : memref<1x1x38x128xbf16, #tpu.memory_space<vmem>>, vector<1x1x24x128xbf16>
    %44 = vector.shape_cast %43 : vector<1x1x24x128xbf16> to vector<24x128xbf16>
    %c7_49 = arith.constant 7 : index
    %c0_50 = arith.constant 0 : index
    %c0_51 = arith.constant 0 : index
    %45 = vector.load %arg3[%c7_49, %c0_50, %c0_51] : memref<9x128x128xbf16, #tpu.memory_space<vmem>>, vector<1x128x128xbf16>
    %46 = vector.shape_cast %45 : vector<1x128x128xbf16> to vector<128x128xbf16>
    %cst_52 = arith.constant dense<0.000000e+00> : vector<24x128xf32>
    %47 = tpu.matmul %44, %46, %cst_52 {dimension_numbers = #tpu.dot_dimension_numbers<[1], [0], [0], [1], [0, 0, 1, 1], [], []>} : vector<24x128xbf16>, vector<128x128xbf16>, vector<24x128xf32> -> vector<24x128xf32>
    %48 = arith.addf %42, %47 : vector<24x128xf32>
    %c0_53 = arith.constant 0 : index
    %c0_54 = arith.constant 0 : index
    %c14 = arith.constant 14 : index
    %c0_55 = arith.constant 0 : index
    %49 = vector.load %arg2[%c0_53, %c0_54, %c14, %c0_55] : memref<1x1x38x128xbf16, #tpu.memory_space<vmem>>, vector<1x1x24x128xbf16>
    %50 = vector.shape_cast %49 : vector<1x1x24x128xbf16> to vector<24x128xbf16>
    %c8_56 = arith.constant 8 : index
    %c0_57 = arith.constant 0 : index
    %c0_58 = arith.constant 0 : index
    %51 = vector.load %arg3[%c8_56, %c0_57, %c0_58] : memref<9x128x128xbf16, #tpu.memory_space<vmem>>, vector<1x128x128xbf16>
    %52 = vector.shape_cast %51 : vector<1x128x128xbf16> to vector<128x128xbf16>
    %cst_59 = arith.constant dense<0.000000e+00> : vector<24x128xf32>
    %53 = tpu.matmul %50, %52, %cst_59 {dimension_numbers = #tpu.dot_dimension_numbers<[1], [0], [0], [1], [0, 0, 1, 1], [], []>} : vector<24x128xbf16>, vector<128x128xbf16>, vector<24x128xf32> -> vector<24x128xf32>
    %54 = arith.addf %48, %53 : vector<24x128xf32>
    %c0_60 = arith.constant 0 : index
    %c0_61 = arith.constant 0 : index
    %55 = vector.load %arg4[%c0_60, %c0_61] : memref<1x128xf32, #tpu.memory_space<vmem>>, vector<1x128xf32>
    %56 = vector.broadcast %55 : vector<1x128xf32> to vector<24x128xf32>
    %57 = arith.addf %54, %56 : vector<24x128xf32>
    %cst_62 = arith.constant 0.000000e+00 : f32
    %58 = vector.broadcast %cst_62 : f32 to vector<24x128xf32>
    %59 = arith.maximumf %57, %58 : vector<24x128xf32>
    %60 = arith.truncf %59 : vector<24x128xf32> to vector<24x128xbf16>
    %c0_63 = arith.constant 0 : index
    %c0_64 = arith.constant 0 : index
    %c0_65 = arith.constant 0 : index
    %c0_66 = arith.constant 0 : index
    %61 = vector.load %arg5[%c0_63, %c0_64, %c0_65, %c0_66] : memref<1x1x24x128xbf16, #tpu.memory_space<vmem>>, vector<1x1x24x128xbf16>
    %62 = vector.shape_cast %61 : vector<1x1x24x128xbf16> to vector<24x128xbf16>
    %63 = vector.shape_cast %60 : vector<24x128xbf16> to vector<1x1x24x128xbf16>
    tpu.vector_store %arg5[%c0_63, %c0_64, %c0_65, %c0_66], %63 {strides = array<i32>} : memref<1x1x24x128xbf16, #tpu.memory_space<vmem>>, vector<1x1x24x128xbf16>,
    return
  }
  func.func @transform_0(%arg0: i32, %arg1: i32) -> (i32, i32, i32, i32) {
    %c0_i32 = arith.constant 0 : i32
    %c0_i32_0 = arith.constant 0 : i32
    %c0_i32_1 = arith.constant 0 : i32
    return %arg0, %arg1, %c0_i32, %c0_i32_0 : i32, i32, i32, i32
  }
  func.func @transform_1(%arg0: i32, %arg1: i32) -> (i32, i32, i32) {
    %c0_i32 = arith.constant 0 : i32
    %c0_i32_0 = arith.constant 0 : i32
    %c0_i32_1 = arith.constant 0 : i32
    %c0_i32_2 = arith.constant 0 : i32
    return %c0_i32, %c0_i32_0, %c0_i32_1 : i32, i32, i32
  }
  func.func @transform_2(%arg0: i32, %arg1: i32) -> (i32, i32) {
    %c0_i32 = arith.constant 0 : i32
    %c0_i32_0 = arith.constant 0 : i32
    %c0_i32_1 = arith.constant 0 : i32
    return %c0_i32, %c0_i32_0 : i32, i32
  }
  func.func @transform_3(%arg0: i32, %arg1: i32) -> (i32, i32, i32, i32) {
    %c0_i32 = arith.constant 0 : i32
    %c0_i32_0 = arith.constant 0 : i32
    %c0_i32_1 = arith.constant 0 : i32
    return %arg0, %arg1, %c0_i32, %c0_i32_0 : i32, i32, i32, i32
  }
}

</mosaic_0001>

<bundles_post_ra>
// kernel: unet_encoder_forward.10
= control target key start
LH: loop header
LB: loop body
LE: loop exit
PB: predicated region body
PF: predicated region fallthrough
CT: control target
= control target key end

     0   :  { %s673_s0 = inlined_call_operand.vmem [shape: bf16[128,128], index: 0, kind: input, shape index: {}]   ;;  %s674_s1 = inlined_call_operand.vmem [shape: bf16[128,128], index: 1, kind: input, shape index: {}]   ;;  %s675_s2 = inlined_call_operand.vmem [shape: bf16[128,128], index: 2, kind: input, shape index: {}]   ;;  %s676_s3 = inlined_call_operand.vmem [shape: bf16[128,128], index: 3, kind: input, shape index: {}]   ;;  %s677_s4 = inlined_call_operand.vmem [shape: bf16[128,128], index: 4, kind: output, shape index: {}]  }
   0x1   :  { %v326_v0 = vld [vmem:[%s673_s0] sm:$0xff]   ;;  %v493_v8 = vld [vmem:[%s673_s0 + $0x8] sm:$0xff]   ;;  %v494_v20 = vld [vmem:[%s673_s0 + $0x10] sm:$0xff]  }
   0x2   :  { %v358_v1 = vld [vmem:[%s674_s1] sm:$0xff]   ;;  %v327_v3 = vunpack.c.l.bf16 %v326_v0  ;;  %v328_v4 = vunpack.c.h.bf16 %v326_v0  ;;  %v500_v9 = vld [vmem:[%s674_s1 + $0x8] sm:$0xff]   ;;  %v331_v18 = vunpack.c.l.bf16 %v493_v8  ;;  %v332_v19 = vunpack.c.h.bf16 %v493_v8  ;;  %v501_v25 = vld [vmem:[%s674_s1 + $0x10] sm:$0xff]  }
   0x3   :  { %v390_v2 = vld [vmem:[%s675_s2] sm:$0xff]   ;;  %v359_v5 = vunpack.c.l.bf16 %v358_v1  ;;  %v360_v6 = vunpack.c.h.bf16 %v358_v1  ;;  %v507_v14 = vld [vmem:[%s675_s2 + $0x8] sm:$0xff]   ;;  %v363_v21 = vunpack.c.l.bf16 %v500_v9  ;;  %v364_v22 = vunpack.c.h.bf16 %v500_v9  ;;  %v508_v30 = vld [vmem:[%s675_s2 + $0x10] sm:$0xff]  }
   0x4   :  { %v422_v7 = vld [vmem:[%s676_s3] sm:$0xff]   ;;  %v391_v10 = vunpack.c.l.bf16 %v390_v2  ;;  %v392_v11 = vunpack.c.h.bf16 %v390_v2  ;;  %v514_v15 = vld [vmem:[%s676_s3 + $0x8] sm:$0xff]   ;;  %v395_v23 = vunpack.c.l.bf16 %v507_v14  ;;  %v396_v24 = vunpack.c.h.bf16 %v507_v14  ;;  %v515_v39 = vld [vmem:[%s676_s3 + $0x10] sm:$0xff]  }
   0x5   :  { %v423_v12 = vunpack.c.l.bf16 %v422_v7  ;;  %v424_v13 = vunpack.c.h.bf16 %v422_v7  ;;  %v81_v16 = vadd.f32 %v359_v5, %v327_v3  ;;  %v82_v17 = vadd.f32 %v360_v6, %v328_v4  ;;  %v495_v44 = vld [vmem:[%s673_s0 + $0x18] sm:$0xff]   ;;  %v496_v4 = vld [vmem:[%s673_s0 + $0x20] sm:$0xff]  }
   0x6   :  { %v427_v28 = vunpack.c.l.bf16 %v514_v15  ;;  %v428_v29 = vunpack.c.h.bf16 %v514_v15  ;;  %v83_v31 = vadd.f32 %v363_v21, %v331_v18  ;;  %v84_v32 = vadd.f32 %v364_v22, %v332_v19  ;;  %v502_v49 = vld [vmem:[%s674_s1 + $0x18] sm:$0xff]   ;;  %v503_v5 = vld [vmem:[%s674_s1 + $0x20] sm:$0xff]  }
   0x7   :  { %v129_v26 = vadd.f32 %v391_v10, %v81_v16  ;;  %v130_v27 = vadd.f32 %v392_v11, %v82_v17  ;;  %v335_v33 = vunpack.c.l.bf16 %v494_v20  ;;  %v336_v34 = vunpack.c.h.bf16 %v494_v20  ;;  %v509_v54 = vld [vmem:[%s675_s2 + $0x18] sm:$0xff]   ;;  %v510_v10 = vld [vmem:[%s675_s2 + $0x20] sm:$0xff]   ;;  %v497_v20 = vld [vmem:[%s673_s0 + $0x28] sm:$0xff]  }
   0x8   :  { %v367_v37 = vunpack.c.l.bf16 %v501_v25  ;;  %v368_v38 = vunpack.c.h.bf16 %v501_v25  ;;  %v131_v40 = vadd.f32 %v395_v23, %v83_v31  ;;  %v132_v41 = vadd.f32 %v396_v24, %v84_v32  ;;  %v516_v59 = vld [vmem:[%s676_s3 + $0x18] sm:$0xff]   ;;  %v517_v15 = vld [vmem:[%s676_s3 + $0x20] sm:$0xff]   ;;  %v504_v25 = vld [vmem:[%s674_s1 + $0x28] sm:$0xff]  }
   0x9   :  { %v177_v35 = vadd.f32 %v423_v12, %v129_v26  ;;  %v178_v36 = vadd.f32 %v424_v13, %v130_v27  ;;  %v399_v42 = vunpack.c.l.bf16 %v508_v30  ;;  %v400_v43 = vunpack.c.h.bf16 %v508_v30  ;;  %v511_v30 = vld [vmem:[%s675_s2 + $0x28] sm:$0xff]  }
   0xa   :  { %v85_v47 = vadd.f32 %v367_v37, %v335_v33  ;;  %v86_v48 = vadd.f32 %v368_v38, %v336_v34  ;;  %v179_v50 = vadd.f32 %v427_v28, %v131_v40  ;;  %v180_v51 = vadd.f32 %v428_v29, %v132_v41 }
   0xb   :  { %v193_v45 = vmul.f32 0.25, %v177_v35  ;;  %v194_v46 = vmul.f32 0.25, %v178_v36  ;;  %v431_v52 = vunpack.c.l.bf16 %v515_v39  ;;  %v432_v53 = vunpack.c.h.bf16 %v515_v39  ;;  %v518_v35 = vld [vmem:[%s676_s3 + $0x28] sm:$0xff]  }
   0xc   :  { %v133_v56 = vadd.f32 %v399_v42, %v85_v47  ;;  %v134_v57 = vadd.f32 %v400_v43, %v86_v48  ;;  %v339_v58 = vunpack.c.l.bf16 %v495_v44  ;;  %v195_v60 = vmul.f32 0.25, %v179_v50 }
   0xd   :  { %v456_v55 = vpack.c.bf16 %v194_v46, %v193_v45  ;;  %v196_v61 = vmul.f32 0.25, %v180_v51  ;;  %v340_v62 = vunpack.c.h.bf16 %v495_v44  ;;  %v371_v63 = vunpack.c.l.bf16 %v502_v49  ;;  %v498_v44 = vld [vmem:[%s673_s0 + $0x30] sm:$0xff]  }
   0xe   :  { %v181_v0 = vadd.f32 %v431_v52, %v133_v56  ;;  %v182_v1 = vadd.f32 %v432_v53, %v134_v57  ;;  %v372_v2 = vunpack.c.h.bf16 %v502_v49  ;;  %v403_v3 = vunpack.c.l.bf16 %v509_v54  ;;  %v505_v49 = vld [vmem:[%s674_s1 + $0x30] sm:$0xff]  }
   0xf   :  { %457 = vst [vmem:[%s677_s4] sm:$0xff] %v456_v55   ;;  %v461_v6 = vpack.c.bf16 %v196_v61, %v195_v60  ;;  %v87_v7 = vadd.f32 %v371_v63, %v339_v58  ;;  %v404_v8 = vunpack.c.h.bf16 %v509_v54  ;;  %v435_v9 = vunpack.c.l.bf16 %v516_v59  ;;  %v512_v54 = vld [vmem:[%s675_s2 + $0x30] sm:$0xff]  }
  0x10   :  { %v197_v11 = vmul.f32 0.25, %v181_v0  ;;  %v198_v12 = vmul.f32 0.25, %v182_v1  ;;  %v88_v13 = vadd.f32 %v372_v2, %v340_v62  ;;  %v436_v14 = vunpack.c.h.bf16 %v516_v59  ;;  %v519_v55 = vld [vmem:[%s676_s3 + $0x30] sm:$0xff]   ;;  %v499_v0 = vld [vmem:[%s673_s0 + $0x38] sm:$0xff]  }
  0x11   :  { %521 = vst [vmem:[%s677_s4 + $0x8] sm:$0xff] %v461_v6   ;;  %v135_v16 = vadd.f32 %v403_v3, %v87_v7  ;;  %v343_v17 = vunpack.c.l.bf16 %v496_v4  ;;  %v344_v18 = vunpack.c.h.bf16 %v496_v4  ;;  %v375_v19 = vunpack.c.l.bf16 %v503_v5 }
  0x12   :  { %v466_v21 = vpack.c.bf16 %v198_v12, %v197_v11  ;;  %v136_v22 = vadd.f32 %v404_v8, %v88_v13  ;;  %v376_v23 = vunpack.c.h.bf16 %v503_v5  ;;  %v407_v24 = vunpack.c.l.bf16 %v510_v10  ;;  %v506_v5 = vld [vmem:[%s674_s1 + $0x38] sm:$0xff]  }
  0x13   :  { %v183_v26 = vadd.f32 %v435_v9, %v135_v16  ;;  %v89_v27 = vadd.f32 %v375_v19, %v343_v17  ;;  %v408_v28 = vunpack.c.h.bf16 %v510_v10  ;;  %v439_v29 = vunpack.c.l.bf16 %v517_v15  ;;  %v513_v10 = vld [vmem:[%s675_s2 + $0x38] sm:$0xff]  }
  0x14   :  { %522 = vst [vmem:[%s677_s4 + $0x10] sm:$0xff] %v466_v21   ;;  %v184_v31 = vadd.f32 %v436_v14, %v136_v22  ;;  %v90_v32 = vadd.f32 %v376_v23, %v344_v18  ;;  %v440_v33 = vunpack.c.h.bf16 %v517_v15  ;;  %v347_v34 = vunpack.c.l.bf16 %v497_v20  ;;  %v520_v11 = vld [vmem:[%s676_s3 + $0x38] sm:$0xff]  }
  0x15   :  { %v199_v36 = vmul.f32 0.25, %v183_v26  ;;  %v137_v37 = vadd.f32 %v407_v24, %v89_v27  ;;  %v348_v38 = vunpack.c.h.bf16 %v497_v20  ;;  %v379_v39 = vunpack.c.l.bf16 %v504_v25 }
  0x16   :  { %v200_v40 = vmul.f32 0.25, %v184_v31  ;;  %v138_v41 = vadd.f32 %v408_v28, %v90_v32  ;;  %v380_v42 = vunpack.c.h.bf16 %v504_v25  ;;  %v411_v43 = vunpack.c.l.bf16 %v511_v30 }
  0x17   :  { %v185_v45 = vadd.f32 %v439_v29, %v137_v37  ;;  %v91_v46 = vadd.f32 %v379_v39, %v347_v34  ;;  %v412_v47 = vunpack.c.h.bf16 %v511_v30  ;;  %v443_v48 = vunpack.c.l.bf16 %v518_v35 }
  0x18   :  { %v471_v50 = vpack.c.bf16 %v200_v40, %v199_v36  ;;  %v186_v51 = vadd.f32 %v440_v33, %v138_v41  ;;  %v92_v52 = vadd.f32 %v380_v42, %v348_v38  ;;  %v444_v53 = vunpack.c.h.bf16 %v518_v35 }
  0x19   :  { %v201_v56 = vmul.f32 0.25, %v185_v45  ;;  %v139_v57 = vadd.f32 %v411_v43, %v91_v46  ;;  %v351_v58 = vunpack.c.l.bf16 %v498_v44  ;;  %v352_v59 = vunpack.c.h.bf16 %v498_v44 }
  0x1a   :  { %523 = vst [vmem:[%s677_s4 + $0x18] sm:$0xff] %v471_v50   ;;  %v202_v60 = vmul.f32 0.25, %v186_v51  ;;  %v140_v61 = vadd.f32 %v412_v47, %v92_v52  ;;  %v383_v62 = vunpack.c.l.bf16 %v505_v49  ;;  %v384_v63 = vunpack.c.h.bf16 %v505_v49 }
  0x1b   :  { %v187_v1 = vadd.f32 %v443_v48, %v139_v57  ;;  %v415_v2 = vunpack.c.l.bf16 %v512_v54  ;;  %v416_v3 = vunpack.c.h.bf16 %v512_v54  ;;  %v447_v4 = vunpack.c.l.bf16 %v519_v55 }
  0x1c   :  { %v476_v6 = vpack.c.bf16 %v202_v60, %v201_v56  ;;  %v188_v7 = vadd.f32 %v444_v53, %v140_v61  ;;  %v93_v8 = vadd.f32 %v383_v62, %v351_v58  ;;  %v94_v9 = vadd.f32 %v384_v63, %v352_v59 }
  0x1d   :  { %v203_v12 = vmul.f32 0.25, %v187_v1  ;;  %v448_v13 = vunpack.c.h.bf16 %v519_v55  ;;  %v355_v14 = vunpack.c.l.bf16 %v499_v0  ;;  %v356_v15 = vunpack.c.h.bf16 %v499_v0 }
  0x1e   :  { %524 = vst [vmem:[%s677_s4 + $0x20] sm:$0xff] %v476_v6   ;;  %v204_v16 = vmul.f32 0.25, %v188_v7  ;;  %v141_v17 = vadd.f32 %v415_v2, %v93_v8  ;;  %v142_v18 = vadd.f32 %v416_v3, %v94_v9  ;;  %v387_v19 = vunpack.c.l.bf16 %v506_v5 }
  0x1f   :  { %v388_v20 = vunpack.c.h.bf16 %v506_v5  ;;  %v419_v21 = vunpack.c.l.bf16 %v513_v10  ;;  %v420_v22 = vunpack.c.h.bf16 %v513_v10  ;;  %v451_v23 = vunpack.c.l.bf16 %v520_v11 }
  0x20   :  { %v481_v24 = vpack.c.bf16 %v204_v16, %v203_v12  ;;  %v189_v25 = vadd.f32 %v447_v4, %v141_v17  ;;  %v190_v26 = vadd.f32 %v448_v13, %v142_v18  ;;  %v95_v27 = vadd.f32 %v387_v19, %v355_v14 }
  0x21   :  { %v96_v28 = vadd.f32 %v388_v20, %v356_v15  ;;  %v452_v29 = vunpack.c.h.bf16 %v520_v11 }
  0x22   :  { %525 = vst [vmem:[%s677_s4 + $0x28] sm:$0xff] %v481_v24   ;;  %v205_v30 = vmul.f32 0.25, %v189_v25  ;;  %v206_v31 = vmul.f32 0.25, %v190_v26  ;;  %v143_v32 = vadd.f32 %v419_v21, %v95_v27 }
  0x23   :  { %v144_v33 = vadd.f32 %v420_v22, %v96_v28 }
  0x24   :  { %v486_v34 = vpack.c.bf16 %v206_v31, %v205_v30  ;;  %v191_v35 = vadd.f32 %v451_v23, %v143_v32 }
  0x25   :  { %v192_v36 = vadd.f32 %v452_v29, %v144_v33 }
  0x26   :  { %526 = vst [vmem:[%s677_s4 + $0x30] sm:$0xff] %v486_v34   ;;  %v207_v37 = vmul.f32 0.25, %v191_v35 }
  0x27   :  { %v208_v38 = vmul.f32 0.25, %v192_v36 }
  0x29   :  { %v491_v39 = vpack.c.bf16 %v208_v38, %v207_v37 }
  0x2b   :  { %527 = vst [vmem:[%s677_s4 + $0x38] sm:$0xff] %v491_v39  }

// kernel: unet_encoder_forward.13
= control target key start
LH: loop header
LB: loop body
LE: loop exit
PB: predicated region body
PF: predicated region fallthrough
CT: control target
= control target key end

     0   :  { %s199_s0 = inlined_call_operand.vmem [shape: bf16[32,128], index: 0, kind: input, shape index: {}]   ;;  %s200_s1 = inlined_call_operand.vmem [shape: bf16[32,128], index: 1, kind: input, shape index: {}]   ;;  %s201_s2 = inlined_call_operand.vmem [shape: bf16[32,128], index: 2, kind: input, shape index: {}]   ;;  %s202_s3 = inlined_call_operand.vmem [shape: bf16[32,128], index: 3, kind: input, shape index: {}]   ;;  %s203_s4 = inlined_call_operand.vmem [shape: bf16[32,128], index: 4, kind: output, shape index: {}]  }
   0x1   :  { %v98_v0 = vld [vmem:[%s199_s0] sm:$0xff]   ;;  %v139_v8 = vld [vmem:[%s199_s0 + $0x8] sm:$0xff]  }
   0x2   :  { %v106_v1 = vld [vmem:[%s200_s1] sm:$0xff]   ;;  %v99_v3 = vunpack.c.l.bf16 %v98_v0  ;;  %v100_v4 = vunpack.c.h.bf16 %v98_v0  ;;  %v140_v9 = vld [vmem:[%s200_s1 + $0x8] sm:$0xff]   ;;  %v103_v17 = vunpack.c.l.bf16 %v139_v8  ;;  %v104_v18 = vunpack.c.h.bf16 %v139_v8 }
   0x3   :  { %v114_v2 = vld [vmem:[%s201_s2] sm:$0xff]   ;;  %v107_v5 = vunpack.c.l.bf16 %v106_v1  ;;  %v108_v6 = vunpack.c.h.bf16 %v106_v1  ;;  %v141_v14 = vld [vmem:[%s201_s2 + $0x8] sm:$0xff]   ;;  %v111_v20 = vunpack.c.l.bf16 %v140_v9  ;;  %v112_v21 = vunpack.c.h.bf16 %v140_v9 }
   0x4   :  { %v122_v7 = vld [vmem:[%s202_s3] sm:$0xff]   ;;  %v115_v10 = vunpack.c.l.bf16 %v114_v2  ;;  %v116_v11 = vunpack.c.h.bf16 %v114_v2  ;;  %v142_v19 = vld [vmem:[%s202_s3 + $0x8] sm:$0xff]   ;;  %v119_v22 = vunpack.c.l.bf16 %v141_v14  ;;  %v120_v23 = vunpack.c.h.bf16 %v141_v14 }
   0x5   :  { %v123_v12 = vunpack.c.l.bf16 %v122_v7  ;;  %v124_v13 = vunpack.c.h.bf16 %v122_v7  ;;  %v33_v15 = vadd.f32 %v107_v5, %v99_v3  ;;  %v34_v16 = vadd.f32 %v108_v6, %v100_v4 }
   0x6   :  { %v35_v26 = vadd.f32 %v111_v20, %v103_v17  ;;  %v36_v27 = vadd.f32 %v112_v21, %v104_v18  ;;  %v127_v28 = vunpack.c.l.bf16 %v142_v19  ;;  %v128_v29 = vunpack.c.h.bf16 %v142_v19 }
   0x7   :  { %v45_v24 = vadd.f32 %v115_v10, %v33_v15  ;;  %v46_v25 = vadd.f32 %v116_v11, %v34_v16 }
   0x8   :  { %v47_v32 = vadd.f32 %v119_v22, %v35_v26  ;;  %v48_v33 = vadd.f32 %v120_v23, %v36_v27 }
   0x9   :  { %v57_v30 = vadd.f32 %v123_v12, %v45_v24  ;;  %v58_v31 = vadd.f32 %v124_v13, %v46_v25 }
   0xa   :  { %v59_v36 = vadd.f32 %v127_v28, %v47_v32  ;;  %v60_v37 = vadd.f32 %v128_v29, %v48_v33 }
   0xb   :  { %v61_v34 = vmul.f32 0.25, %v57_v30  ;;  %v62_v35 = vmul.f32 0.25, %v58_v31 }
   0xc   :  { %v63_v39 = vmul.f32 0.25, %v59_v36  ;;  %v64_v40 = vmul.f32 0.25, %v60_v37 }
   0xd   :  { %v132_v38 = vpack.c.bf16 %v62_v35, %v61_v34 }
   0xe   :  { %v137_v41 = vpack.c.bf16 %v64_v40, %v63_v39 }
   0xf   :  { %133 = vst [vmem:[%s203_s4] sm:$0xff] %v132_v38  }
  0x10   :  { %143 = vst [vmem:[%s203_s4 + $0x8] sm:$0xff] %v137_v41  }

// kernel: unet_encoder_forward.8
= control target key start
LH: loop header
LB: loop body
LE: loop exit
PB: predicated region body
PF: predicated region fallthrough
CT: control target
= control target key end

     0   :  { %s5612_s12 = smov 0   ;;  %s5614_s13 = smov 0   ;;  %s7116_s0 = inlined_call_operand.vmem [shape: bf16[2,1,326,128], index: 0, kind: input, shape index: {}]   ;;  %s7117_s1 = inlined_call_operand.vmem [shape: bf16[9,128,128], index: 1, kind: input, shape index: {}]   ;;  %s7118_s2 = inlined_call_operand.vmem [shape: f32[1,128], index: 2, kind: input, shape index: {}]   ;;  %s7119_s3 = inlined_call_operand.vmem [shape: bf16[2,1,288,128], index: 3, kind: output, shape index: {}]  }
   0x1   :  { %s5616_s14 = smov 0  }
   0x2 LB: > { %s25_s15 = sadd.s32 1, %s5586_s13  ;;  %p4243_p0 = scmp.ge.s32.totalorder %s5590_s14, 1  ;;  %s5590_s14 = sphi %s5616_s14, %s13_s14   ;;  %s5586_s13 = sphi %s5614_s13, %s7202_s13   ;;  %s5582_s12 = sphi %s5612_s12, %s7201_s12  }
   0x3   : > { %p27_p1 = scmp.ge.s32.totalorder %s25_s15, 2  ;;  %p157_p2 = scmp.lt.s32.totalorder %s5590_s14, 3 }
   0x5   : > { %s7204_s15 = smov (%p27_p1, %s25_s15), 0  ;;  %p158_p3 = pnand %p4243_p0, %p157_p2 }
   0x7   : > { %161 = sbr.rel (%p158_p3) target bundleno = 575 (0x23f), region = 32 }
   0xc   : > { %v5434_v0 = vld [vmem:[%s7117_s1 + $0x78] sm:$0xff]   ;;  %p189_p4 = scmp.lt.s32.totalorder %s5582_s12, 1  ;;  %v5435_v1 = vld [vmem:[%s7117_s1 + $0x70] sm:$0xff]   ;;  %v5436_v2 = vld [vmem:[%s7117_s1 + $0x68] sm:$0xff]   ;;  %vm371_vm0 = vsmask.f32 7424 }
   0xd   : > { %5392 = vmatprep.subr.bf16.mxu1 %v5434_v0  ;;  %4924 = vmatprep.subr.bf16.mxu0 %v5434_v0  ;;  %v5437_v3 = vld [vmem:[%s7117_s1 + $0x60] sm:$0xff]   ;;  %v5438_v6 = vld [vmem:[%s7117_s1 + $0x58] sm:$0xff]   ;;  %v5439_v17 = vld [vmem:[%s7117_s1 + $0x50] sm:$0xff]   ;;  %vm1027_vm1 = vcmask 1046528   ;;  %vm2299_vm2 = vcmask 1045504   ;;  %vm3571_vm4 = vcmask 1044480  }
   0xe   : > { %s7206_s12 = smov (!%p189_p4, %s5582_s12), 1  ;;  %5400 = vmatpush3.bf16.msra.mxu1 %v5434_v0  ;;  %4925 = vmatpush3.bf16.msra.mxu0 %v5434_v0  ;;  %v5440_v26 = vld [vmem:[%s7117_s1 + $0x48] sm:$0xff]   ;;  %v5441_v32 = vld [vmem:[%s7117_s1 + $0x40] sm:$0xff]   ;;  %v5445_v41 = vld [vmem:[%s7117_s1 + $0x38] sm:$0xff]   ;;  %vm1828_vm3 = vsmask.f32 6400 }
   0xf   : > { %5393 = vmatprep.subr.bf16.mxu1 %v5435_v1  ;;  %4926 = vmatprep.subr.bf16.mxu0 %v5435_v1  ;;  %s5408_s22 = smul.u32 164, %s7206_s12  ;;  %v5450_v47 = vld [vmem:[%s7117_s1 + $0xb8] sm:$0xff]   ;;  %v5449_v52 = vld [vmem:[%s7117_s1 + $0x30] sm:$0xff]   ;;  %vm3100_vm5 = vsmask.f32 5376 }
  0x10   : > { %v5453_v62 = vld [vmem:[%s7117_s1 + $0xb0] sm:$0xff]   ;;  %s5409_s6 = smul.u32 144, %s7206_s12 }
  0x11   : > { %s5645_s25 = scalar_lea.vmem %s7116_s0, %s5408_s22 }
  0x12   : > { %5401 = vmatpush3.bf16.msra.mxu1 %v5435_v1  ;;  %4927 = vmatpush3.bf16.msra.mxu0 %v5435_v1  ;;  %v5651_v4 = vld [vmem:[%s5645_s25 + $0x40] sm:$0xff]   ;;  %v5654_v5 = vld [vmem:[%s5645_s25 + $0x48] sm:$0xff]   ;;  %v5683_v22 = vld [vmem:[%s5645_s25 + $0x50] sm:$0xff]   ;;  %s7025_s12 = scalar_lea.vmem %s7119_s3, %s5409_s6 }
  0x13   : > { %5394 = vmatprep.subr.bf16.mxu1 %v5436_v2  ;;  %4928 = vmatprep.subr.bf16.mxu0 %v5436_v2  ;;  %v436_v7 = vshll.u32 %v5651_v4, 16  ;;  %v440_v8 = vshrl.u32 %v5651_v4, 16  ;;  %v444_v9 = vshll.u32 %v5654_v5, 16  ;;  %v208_v10 = vld [vmem:[%s5645_s25] sm:$0xf]  ;;  %v5672_v15 = vld [vmem:[%s5645_s25 + $0x8] sm:$0xff]  }
  0x14   : > { %v5666_v13 = vld [vmem:[%s5645_s25 + $0x4] sm:$0xf]  ;;  %v380_v20 = vshll.u32 %v5672_v15, 16  ;;  %v5686_v25 = vld [vmem:[%s5645_s25 + $0x10] sm:$0xff]   ;;  %v452_v28 = vshll.u32 %v5683_v22, 16  ;;  %v5693_v29 = vld [vmem:[%s5645_s25 + $0x58] sm:$0xff]  }
  0x15   : > { %v5663_v11 = vrot.slane %v436_v7, 1  ;;  %v446_v12 = vrot.slane %v444_v9, 1  ;;  %v5669_v14 = vcombine.low %v208_v10, %v5666_v13  ;;  %v448_v30 = vshrl.u32 %v5654_v5, 16  ;;  %v5703_v35 = vld [vmem:[%s5645_s25 + $0x18] sm:$0xff]   ;;  %v5708_v39 = vld [vmem:[%s5645_s25 + $0x60] sm:$0xff]   ;;  %v5722_v50 = vld [vmem:[%s5645_s25 + $0x68] sm:$0xff]  }
  0x16   : > { %5402 = vmatpush3.bf16.msra.mxu1 %v5436_v2  ;;  %4929 = vmatpush3.bf16.msra.mxu0 %v5436_v2  ;;  %v382_v24 = vrot.slane %v380_v20, 1  ;;  %v384_v33 = vshrl.u32 %v5672_v15, 16  ;;  %v388_v34 = vshll.u32 %v5686_v25, 16  ;;  %v454_v36 = vrot.slane %v452_v28, 1  ;;  %v5716_v46 = vld [vmem:[%s5645_s25 + $0x20] sm:$0xff]   ;;  %v5734_v60 = vld [vmem:[%s5645_s25 + $0x28] sm:$0xff]  }
  0x17   : > { %5395 = vmatprep.subr.bf16.mxu1 %v5437_v3  ;;  %4930 = vmatprep.subr.bf16.mxu0 %v5437_v3  ;;  %v442_v16 = vor.u32 %v440_v8, %v5663_v11  ;;  %v373_v18 = vshrl.u32 %v5669_v14, 16  ;;  %v375_v19 = vshll.u32 %v5669_v14, 16  ;;  %v456_v37 = vshrl.u32 %v5683_v22, 16  ;;  %v5743_v1 = vld [vmem:[%s5645_s25 + $0x70] sm:$0xff]   ;;  %v5454_v2 = vld [vmem:[%s7117_s1 + $0x28] sm:$0xff]  }
  0x18   : > { %v460_v38 = vshll.u32 %v5693_v29, 16  ;;  %v450_v40 = vor.u32 %v448_v30, %v446_v12  ;;  %v392_v42 = vshrl.u32 %v5686_v25, 16  ;;  %v396_v43 = vshll.u32 %v5703_v35, 16 }
  0x19   : > { %v447_v21 = vsel %vm371_vm0, %v442_v16, %v446_v12  ;;  %v377_v23 = vrot.slane %v375_v19, 1  ;;  %v386_v44 = vor.u32 %v384_v33, %v382_v24  ;;  %v390_v45 = vrot.slane %v388_v34, 1  ;;  %v5457_v16 = vld [vmem:[%s7117_s1 + $0xa8] sm:$0xff]   ;;  %v5770_v33 = vld [vmem:[%s5645_s25 + $0x38] sm:$0xff]   ;;  %v5461_v34 = vld [vmem:[%s7117_s1 + $0xa0] sm:$0xff]  }
  0x1a   : > { %5403 = vmatpush3.bf16.msra.mxu1 %v5437_v3  ;;  %4931 = vmatpush3.bf16.msra.mxu0 %v5437_v3  ;;  %v458_v48 = vor.u32 %v456_v37, %v454_v36  ;;  %v462_v49 = vrot.slane %v460_v38, 1  ;;  %v455_v51 = vsel %vm371_vm0, %v450_v40, %v454_v36  ;;  %v464_v53 = vshrl.u32 %v5693_v29, 16  ;;  %v5779_v40 = vld [vmem:[%s5645_s25 + $0x80] sm:$0xff]  }
  0x1b   : > { %5396 = vmatprep.subr.bf16.mxu1 %v5438_v6  ;;  %4932 = vmatprep.subr.bf16.mxu0 %v5438_v6  ;;  %v378_v27 = vor.u32 %v377_v23, %v373_v18  ;;  %v394_v54 = vor.u32 %v392_v42, %v390_v45  ;;  %v398_v55 = vrot.slane %v396_v43, 1  ;;  %v391_v56 = vsel %vm371_vm0, %v386_v44, %v390_v45  ;;  %v5760_v23 = vld [vmem:[%s5645_s25 + $0x78] sm:$0xff]  }
  0x1c   : > { %4956 = vmatprep.mubr.bf16.mxu1 %v447_v21  ;;  %v468_v57 = vshll.u32 %v5708_v39, 16  ;;  %v400_v58 = vshrl.u32 %v5703_v35, 16  ;;  %v404_v59 = vshll.u32 %v5716_v46, 16  ;;  %v463_v61 = vsel %vm371_vm0, %v458_v48, %v462_v49 }
  0x1d   : > { %v383_v31 = vsel %vm371_vm0, %v378_v27, %v382_v24  ;;  %v472_v63 = vshrl.u32 %v5708_v39, 16  ;;  %v476_v0 = vshll.u32 %v5722_v50, 16  ;;  %v399_v3 = vsel %vm371_vm0, %v394_v54, %v398_v55  ;;  %v5459_v24 = vld [vmem:[%s7117_s1 + $0x20] sm:$0xff]  }
  0x1e   : > { %5404 = vmatpush3.bf16.msra.mxu1 %v5438_v6  ;;  %4933 = vmatpush3.bf16.msra.mxu0 %v5438_v6  ;;  %v408_v6 = vshrl.u32 %v5716_v46, 16  ;;  %v412_v7 = vshll.u32 %v5734_v60, 16  ;;  %v466_v8 = vor.u32 %v464_v53, %v462_v49  ;;  %v470_v9 = vrot.slane %v468_v57, 1  ;;  %v5468_v57 = vld [vmem:[%s7117_s1 + $0x10] sm:$0xff]  }
  0x1f   : > { %5397 = vmatprep.subr.bf16.mxu1 %v5439_v17  ;;  %4934 = vmatprep.subr.bf16.mxu0 %v5439_v17  ;;  %v402_v10 = vor.u32 %v400_v58, %v398_v55  ;;  %v406_v12 = vrot.slane %v404_v59, 1  ;;  %v478_v19 = vrot.slane %v476_v0, 1  ;;  %v480_v20 = vshrl.u32 %v5722_v50, 16  ;;  %v1006_v0 = vld [vmem:[%s5645_s25] sm:$0xe] }
  0x20   : > { %4940 = vmatprep.mubr.bf16.mxu0 %v383_v31  ;;  %v474_v18 = vor.u32 %v472_v63, %v470_v9  ;;  %v484_v21 = vshll.u32 %v5743_v1, 16  ;;  %v414_v27 = vrot.slane %v412_v7, 1  ;;  %v416_v28 = vshrl.u32 %v5734_v60, 16  ;;  %v5469_v7 = vld [vmem:[%s7117_s1 + $0x90] sm:$0xff]  }
  0x21   : > { %v471_v30 = vsel %vm371_vm0, %v466_v8, %v470_v9  ;;  %v407_v31 = vsel %vm371_vm0, %v402_v10, %v406_v12  ;;  %v488_v36 = vshrl.u32 %v5743_v1, 16  ;;  %v492_v38 = vshll.u32 %v5760_v23, 16  ;;  %v5474_v8 = vld [vmem:[%s5645_s25 + $0x90] ss:$0 sps:$4 sm:$0x11]  }
  0x22   : > { %5405 = vmatpush3.bf16.msra.mxu1 %v5439_v17  ;;  %4935 = vmatpush3.bf16.msra.mxu0 %v5439_v17  ;;  %v5755_v17 = vld [vmem:[%s5645_s25 + $0x30] sm:$0xff]   ;;  %v479_v37 = vsel %vm371_vm0, %v474_v18, %v478_v19  ;;  %v428_v42 = vshll.u32 %v5770_v33, 16  ;;  %v482_v44 = vor.u32 %v480_v20, %v478_v19  ;;  %v486_v45 = vrot.slane %v484_v21, 1  ;;  %v5471_v19 = vld [vmem:[%s7117_s1 + $0x88] sm:$0xff]  }
  0x23   : > { %5398 = vmatprep.subr.bf16.mxu1 %v5440_v26  ;;  %4936 = vmatprep.subr.bf16.mxu0 %v5440_v26  ;;  %v418_v48 = vor.u32 %v416_v28, %v414_v27  ;;  %v494_v54 = vrot.slane %v492_v38, 1  ;;  %v496_v55 = vshrl.u32 %v5760_v23, 16  ;;  %v5472_v20 = vld [vmem:[%s7117_s1 + $0x8] sm:$0xff]  }
  0x24   : > { %v490_v53 = vor.u32 %v488_v36, %v486_v45  ;;  %v430_v59 = vrot.slane %v428_v42, 1  ;;  %v5476_v36 = vld [vmem:[%s7117_s1] sm:$0xff]   ;;  %v5478_v42 = vld [vmem:[%s7117_s1 + $0xf8] sm:$0xff]  }
  0x26   : > { %5406 = vmatpush3.bf16.msra.mxu1 %v5440_v26  ;;  %4937 = vmatpush3.bf16.msra.mxu0 %v5440_v26  ;;  %v410_v26 = vor.u32 %v408_v6, %v406_v12  ;;  %v495_v6 = vsel %vm371_vm0, %v490_v53, %v494_v54  ;;  %v4313_v12 = vcombine.low %v1006_v0, %v5666_v13  ;;  %v5481_v53 = vld [vmem:[%s7117_s1 + $0x130] sm:$0xff]   ;;  %v1041_v0 = vrot.slane %v5770_v33, 1 }
  0x27   : > { %5399 = vmatprep.subr.bf16.mxu1 %v5441_v32  ;;  %4938 = vmatprep.subr.bf16.mxu0 %v5441_v32 }
  0x28   : > { %v415_v43 = vsel %vm371_vm0, %v410_v26, %v414_v27  ;;  %v1028_v13 = vrot.slane %v4313_v12, 1  ;;  %v1029_v26 = vrot.slane %v5672_v15, 1  ;;  %v5491_v12 = vld [vmem:[%s7117_s1 + $0x108] sm:$0xff]  }
  0x2a   : > { %5407 = vmatpush3.bf16.msra.mxu1 %v5441_v32  ;;  %4939 = vmatpush3.bf16.msra.mxu0 %v5441_v32  ;;  %v420_v32 = vshll.u32 %v5755_v17, 16 }
  0x2b   : > { %4976 = vmatprep.subr.bf16.mxu1 %v5445_v41  ;;  %5028 = vmatprep.subr.bf16.mxu0 %v5450_v47 }
  0x2c   : > { %v422_v49 = vrot.slane %v420_v32, 1 }
  0x2d   : > { %4957 = vmatmul.mubr.bf16.vlgmr.msra.gmra.mxu1 %v455_v51  ;;  %4941 = vmatmul.mubr.bf16.vlgmr.msra.gmra.mxu0 %v391_v56  ;;  %v5465_v51 = vld [vmem:[%s7117_s1 + $0x98] sm:$0xff]   ;;  %v500_v56 = vshll.u32 %v5779_v40, 16 }
  0x2e   : > { %4977 = vmatpush3.bf16.msra.mxu1 %v5445_v41  ;;  %5029 = vmatpush3.bf16.msra.mxu0 %v5450_v47  ;;  %v424_v41 = vshrl.u32 %v5755_v17, 16  ;;  %v5463_v47 = vld [vmem:[%s7117_s1 + $0x18] sm:$0xff]   ;;  %v423_v63 = vsel %vm371_vm0, %v418_v48, %v422_v49 }
  0x2f   : > { %4978 = vmatprep.subr.bf16.mxu1 %v5449_v52  ;;  %4960 = vmatprep.mubr.bf16.mxu1 %v463_v61  ;;  %v432_v61 = vshrl.u32 %v5770_v33, 16  ;;  %v502_v9 = vrot.slane %v500_v56, 1  ;;  %v5483_v56 = vld [vmem:[%s7117_s1 + $0x128] sm:$0xff]  }
  0x30   : > { %5030 = vmatprep.subr.bf16.mxu0 %v5453_v62  ;;  %4944 = vmatprep.mubr.bf16.mxu0 %v399_v3  ;;  %v426_v58 = vor.u32 %v424_v41, %v422_v49  ;;  %v1031_v41 = vrot.slane %v5686_v25, 1 }
  0x31   : > { %v434_v18 = vor.u32 %v432_v61, %v430_v59  ;;  %v5485_v61 = vld [vmem:[%s7117_s1 + $0x120] sm:$0xff]  }
  0x32   : > { %4979 = vmatpush3.bf16.msra.mxu1 %v5449_v52  ;;  %5031 = vmatpush3.bf16.msra.mxu0 %v5453_v62  ;;  %v5791_v52 = vld [vmem:[%s5645_s25 + $0x88] sm:$0xff]   ;;  %v487_v62 = vsel %vm371_vm0, %v482_v44, %v486_v45  ;;  %v431_v10 = vsel %vm371_vm0, %v426_v58, %v430_v59  ;;  %v1033_v45 = vrot.slane %v5703_v35, 1  ;;  %v1032_v49 = vsel %vm1027_vm1, %v1029_v26, %v1031_v41  ;;  %v5480_v59 = vld [vmem:[%s7117_s1 + $0xf0] sm:$0xff]  }
  0x33   : > { %4980 = vmatprep.subr.bf16.mxu1 %v5454_v2  ;;  %5032 = vmatprep.subr.bf16.mxu0 %v5457_v16  ;;  %v508_v3 = vshll.u32 %v5791_v52, 16  ;;  %v439_v28 = vsel %vm371_vm0, %v434_v18, %v5663_v11  ;;  %v1061_v44 = vrot.slane %v5791_v52, 1  ;;  %v1049_v18 = vrot.slane %v5693_v29, 1 }
  0x35   : > { %4961 = vmatmul.mubr.bf16.gmra.mxu1 %v471_v30  ;;  %4945 = vmatmul.mubr.bf16.gmra.mxu0 %v407_v31  ;;  %v512_v30 = vshrl.u32 %v5791_v52, 16  ;;  %v516_v31 = vshll.u32 %v5474_v8, 16 }
  0x36   : > { %4981 = vmatpush3.bf16.msra.mxu1 %v5454_v2  ;;  %5033 = vmatpush3.bf16.msra.mxu0 %v5457_v16  ;;  %v504_v2 = vshrl.u32 %v5779_v40, 16  ;;  %v498_v16 = vor.u32 %v496_v55, %v494_v54  ;;  %v1034_v54 = vsel %vm1027_vm1, %v1031_v41, %v1033_v45  ;;  %v1035_v55 = vrot.slane %v5716_v46, 1 }
  0x37   : > { %4964 = vmatprep.mubr.bf16.mxu1 %v479_v37  ;;  %4982 = vmatprep.subr.bf16.mxu1 %v5459_v24  ;;  %v1030_v37 = vsel %vm1027_vm1, %v1028_v13, %v1029_v26  ;;  %v518_v38 = vrot.slane %v516_v31, 1  ;;  %v1344_v13 = vld [vmem:[%s5645_s25 + $0x8] sm:$0xe]  ;;  %v1345_v26 = vld [vmem:[%s5645_s25 + $0xc] sm:$0xf]  ;;  %v1053_v31 = vrot.slane %v5722_v50, 1 }
  0x38   : > { %5034 = vmatprep.subr.bf16.mxu0 %v5461_v34  ;;  %4948 = vmatprep.mubr.bf16.mxu0 %v415_v43  ;;  %v506_v21 = vor.u32 %v504_v2, %v502_v9  ;;  %v503_v27 = vsel %vm371_vm0, %v498_v16, %v502_v9  ;;  %v5479_v43 = vld [vmem:[%s7117_s1 + $0x138] sm:$0xff]   ;;  %v1036_v58 = vsel %vm1027_vm1, %v1033_v45, %v1035_v55  ;;  %v1047_v16 = vrot.slane %v5683_v22, 1 }
  0x39   : > { %v5486_v9 = vld [vmem:[%s7117_s1 + $0xd8] sm:$0xff]   ;;  %v1057_v45 = vrot.slane %v5760_v23, 1 }
  0x3a   : > { %4983 = vmatpush3.bf16.msra.mxu1 %v5459_v24  ;;  %5035 = vmatpush3.bf16.msra.mxu0 %v5461_v34  ;;  %v510_v24 = vrot.slane %v508_v3, 1  ;;  %v5475_v34 = vld [vmem:[%s7117_s1 + $0x80] sm:$0xff]   ;;  %v5487_v3 = vld [vmem:[%s7117_s1 + $0x118] sm:$0xff]  }
  0x3b   : > { %4984 = vmatprep.subr.bf16.mxu1 %v5463_v47  ;;  %5036 = vmatprep.subr.bf16.mxu0 %v5465_v51 }
  0x3c   : > { %v511_v32 = vsel %vm371_vm0, %v506_v21, %v510_v24  ;;  %v514_v11 = vor.u32 %v512_v30, %v510_v24  ;;  %v5492_v21 = vld [vmem:[%s7117_s1 + $0xc0] sm:$0xff]   ;;  %v5915_v24 = vld [vmem:[%s7117_s1 + $0x1b8] sm:$0xff]  }
  0x3d   : > { %4965 = vmatmul.mubr.bf16.gmra.mxu1 %v487_v62  ;;  %4949 = vmatmul.mubr.bf16.gmra.mxu0 %v423_v63  ;;  %v1039_v62 = vrot.slane %v5755_v17, 1  ;;  %v5482_v63 = vld [vmem:[%s7117_s1 + $0xe8] sm:$0xff]   ;;  %v5926_v30 = vld [vmem:[%s5645_s25 + $0x18] sm:$0xff]  }
  0x3e   : > { %4985 = vmatpush3.bf16.msra.mxu1 %v5463_v47  ;;  %5037 = vmatpush3.bf16.msra.mxu0 %v5465_v51  ;;  %v1063_v47 = vrot.slane %v5474_v8, 1  ;;  %v519_v48 = vsel %vm371_vm0, %v514_v11, %v518_v38  ;;  %v1045_v8 = vrot.slane %v5654_v5, 1  ;;  %v1055_v38 = vrot.slane %v5743_v1, 1 }
  0x3f   : > { %4968 = vmatprep.mubr.bf16.mxu1 %v495_v6  ;;  %4986 = vmatprep.subr.bf16.mxu1 %v5468_v57  ;;  %v1042_v2 = vsel %vm1027_vm1, %v1039_v62, %v1041_v0  ;;  %v1043_v6 = vrot.slane %v5651_v4, 1 }
  0x40   : > { %5038 = vmatprep.subr.bf16.mxu0 %v5469_v7  ;;  %4952 = vmatprep.mubr.bf16.mxu0 %v431_v10  ;;  %v5844_v51 = vsel %vm1027_vm1, %v1061_v44, %v1063_v47  ;;  %v5488_v10 = vld [vmem:[%s7117_s1 + $0xd0] sm:$0xff]   ;;  %v1056_v47 = vsel %vm1027_vm1, %v1053_v31, %v1055_v38 }
  0x42   : > { %4987 = vmatpush3.bf16.msra.mxu1 %v5468_v57  ;;  %5039 = vmatpush3.bf16.msra.mxu0 %v5469_v7  ;;  %v1037_v57 = vrot.slane %v5734_v60, 1  ;;  %v5489_v7 = vld [vmem:[%s7117_s1 + $0x110] sm:$0xff]  }
  0x43   : > { %5040 = vmatprep.subr.bf16.mxu0 %v5471_v19  ;;  %4988 = vmatprep.subr.bf16.mxu1 %v5472_v20 }
  0x45   : > { %4969 = vmatmul.mubr.bf16.gmra.mxu1 %v503_v27  ;;  %4953 = vmatmul.mubr.bf16.gmra.mxu0 %v439_v28  ;;  %v5921_v27 = vld [vmem:[%s5645_s25 + $0x10] sm:$0xff]   ;;  %v1051_v28 = vrot.slane %v5708_v39, 1 }
  0x46   : > { %5041 = vmatpush3.bf16.msra.mxu0 %v5471_v19  ;;  %4972 = vmatprep.mubr.bf16.mxu1 %v511_v32  ;;  %v5490_v19 = vld [vmem:[%s7117_s1 + $0xc8] sm:$0xff]   ;;  %v2301_v32 = vrot.slane %v5921_v27, 2 }
  0x47   : > { %4989 = vmatpush3.bf16.msra.mxu1 %v5472_v20  ;;  %5042 = vmatprep.subr.bf16.mxu0 %v5475_v34  ;;  %v1050_v20 = vsel %vm1027_vm1, %v1047_v16, %v1049_v18 }
  0x48   : > { %4990 = vmatprep.subr.bf16.mxu1 %v5476_v36  ;;  %5044 = vmatprep.mubr.bf16.mxu0 %v1030_v37  ;;  %v1054_v37 = vsel %vm1027_vm1, %v1051_v28, %v1053_v31 }
  0x4a   : > { %5043 = vmatpush3.bf16.msra.mxu0 %v5475_v34  ;;  %v1052_v34 = vsel %vm1027_vm1, %v1049_v18, %v1051_v28 }
  0x4b   : > { %4991 = vmatpush3.bf16.msra.mxu1 %v5476_v36  ;;  %5132 = vmatprep.subr.bf16.mxu0 %v5479_v43  ;;  %v5938_v36 = vcombine.low %v1344_v13, %v1345_v26 }
  0x4c   : > { %5080 = vmatprep.subr.bf16.mxu1 %v5478_v42 }
  0x4d   : > { %4973 = vmatmul.mubr.bf16.gmra.mxu1 %v519_v48  ;;  %5045 = vmatmul.mubr.bf16.vlgmr.msra.gmra.mxu0 %v1032_v49  ;;  %v1830_v41 = vshrl.u32 %v5938_v36, 16  ;;  %v1841_v48 = vshll.u32 %v5921_v27, 16  ;;  %v1850_v49 = vshll.u32 %v5926_v30, 16 }
  0x4e   : > { %4992 = vmatprep.mubr.bf16.mxu1 %v5669_v14  ;;  %5133 = vmatpush3.bf16.msra.mxu0 %v5479_v43  ;;  %v1038_v14 = vsel %vm1027_vm1, %v1035_v55, %v1037_v57  ;;  %v1838_v43 = vshrl.u32 %v5921_v27, 16 }
  0x4f   : > { %5048 = vmatprep.mubr.bf16.mxu0 %v1034_v54  ;;  %5134 = vmatprep.subr.bf16.mxu0 %v5481_v53  ;;  %v1832_v54 = vrot.slane %v1830_v41, 1 }
  0x52   : > { %5135 = vmatpush3.bf16.msra.mxu0 %v5481_v53  ;;  %v1491_v53 = vrot.slane %v5938_v36, 1 }
  0x53   : > { %5136 = vmatprep.subr.bf16.mxu0 %v5483_v56 }
  0x55   : > { %4993 = vmatmul.mubr.bf16.vlgmr.msra.gmra.mxu1 %v5672_v15  ;;  %5049 = vmatmul.mubr.bf16.gmra.mxu0 %v1036_v58  ;;  %v1040_v15 = vsel %vm1027_vm1, %v1037_v57, %v1039_v62  ;;  %v1492_v57 = vrot.slane %v5921_v27, 1  ;;  %v1058_v58 = vsel %vm1027_vm1, %v1055_v38, %v1057_v45  ;;  %v6022_v38 = vld [vmem:[%s5645_s25 + $0x58] sm:$0xff]  }
  0x56   : > { %5081 = vmatpush3.bf16.msra.mxu1 %v5478_v42  ;;  %4996 = vmatprep.mubr.bf16.mxu1 %v5686_v25  ;;  %v5484_v25 = vld [vmem:[%s7117_s1 + $0xe0] sm:$0xff]   ;;  %v1833_v42 = vshll.u32 %v5938_v36, 16  ;;  %v5507_v36 = vld [vmem:[%s7117_s1 + $0x1a8] sm:$0xff]  }
  0x57   : > { %5082 = vmatprep.subr.bf16.mxu1 %v5480_v59  ;;  %5052 = vmatprep.mubr.bf16.mxu0 %v1038_v14  ;;  %v5961_v14 = vld [vmem:[%s5645_s25 + $0x20] sm:$0xff]  }
  0x58   : > { %5137 = vmatpush3.bf16.msra.mxu0 %v5483_v56  ;;  %v1835_v55 = vrot.slane %v1833_v42, 2  ;;  %v1840_v56 = vrot.slane %v1838_v43, 1 }
  0x59   : > { %5138 = vmatprep.subr.bf16.mxu0 %v5485_v61 }
  0x5a   : > { %5083 = vmatpush3.bf16.msra.mxu1 %v5480_v59  ;;  %v1843_v59 = vrot.slane %v1841_v48, 2  ;;  %v1836_v31 = vor.u32 %v1835_v55, %v1832_v54  ;;  %v6036_v54 = vld [vmem:[%s5645_s25 + $0x60] sm:$0xff]  }
  0x5b   : > { %5084 = vmatprep.subr.bf16.mxu1 %v5482_v63 }
  0x5c   : > { %5139 = vmatpush3.bf16.msra.mxu0 %v5485_v61  ;;  %v2278_v61 = vld [vmem:[%s5645_s25 + $0x8] sm:$0xc] }
  0x5d   : > { %4997 = vmatmul.mubr.bf16.gmra.mxu1 %v5703_v35  ;;  %5053 = vmatmul.mubr.bf16.gmra.mxu0 %v1040_v15  ;;  %v1044_v35 = vsel %vm1027_vm1, %v1041_v0, %v1043_v6  ;;  %v4406_v0 = vcombine.low %v2278_v61, %v1345_v26  ;;  %v1852_v15 = vrot.slane %v1850_v49, 2  ;;  %v6047_v61 = vld [vmem:[%s5645_s25 + $0x68] sm:$0xff]  }
  0x5e   : > { %5000 = vmatprep.mubr.bf16.mxu1 %v5716_v46  ;;  %5085 = vmatpush3.bf16.msra.mxu1 %v5482_v63  ;;  %v1046_v46 = vsel %vm1027_vm1, %v1043_v6, %v1045_v8  ;;  %v5966_v63 = vld [vmem:[%s5645_s25 + $0x28] sm:$0xff]   ;;  %v2305_v6 = vrot.slane %v5961_v14, 2 }
  0x5f   : > { %5056 = vmatprep.mubr.bf16.mxu0 %v1042_v2  ;;  %5086 = vmatprep.subr.bf16.mxu1 %v5484_v25  ;;  %v1856_v2 = vshrl.u32 %v5961_v14, 16  ;;  %v1865_v13 = vshrl.u32 %v5966_v63, 16 }
  0x60   : > { %5140 = vmatprep.subr.bf16.mxu0 %v5487_v3 }
  0x61   : > { %5141 = vmatpush3.bf16.msra.mxu0 %v5487_v3  ;;  %v5971_v3 = vld [vmem:[%s5645_s25 + $0x30] sm:$0xff]   ;;  %v1858_v18 = vrot.slane %v1856_v2, 1  ;;  %v1867_v43 = vrot.slane %v1865_v13, 1 }
  0x62   : > { %5087 = vmatpush3.bf16.msra.mxu1 %v5484_v25  ;;  %5142 = vmatprep.subr.bf16.mxu0 %v5489_v7  ;;  %v2300_v25 = vrot.slane %v4406_v0, 2  ;;  %v1877_v48 = vshll.u32 %v5971_v3, 16  ;;  %v2321_v0 = vrot.slane %v6036_v54, 2  ;;  %v6053_v2 = vld [vmem:[%s5645_s25 + $0x70] sm:$0xff]  }
  0x63   : > { %5088 = vmatprep.subr.bf16.mxu1 %v5486_v9 }
  0x65   : > { %5001 = vmatmul.mubr.bf16.gmra.mxu1 %v5734_v60  ;;  %5057 = vmatmul.mubr.bf16.gmra.mxu0 %v1044_v35  ;;  %v5493_v60 = vld [vmem:[%s7117_s1 + $0x100] sm:$0xff]   ;;  %v1859_v35 = vshll.u32 %v5961_v14, 16 }
  0x66   : > { %5004 = vmatprep.mubr.bf16.mxu1 %v5755_v17  ;;  %5060 = vmatprep.mubr.bf16.mxu0 %v1046_v46  ;;  %v1048_v17 = vsel %vm1027_vm1, %v1045_v8, %v1047_v16  ;;  %v5977_v8 = vld [vmem:[%s5645_s25 + $0x38] sm:$0xff]   ;;  %v5985_v46 = vld [vmem:[%s5645_s25 + $0x40] sm:$0xff]  }
  0x67   : > { %5089 = vmatpush3.bf16.msra.mxu1 %v5486_v9  ;;  %5143 = vmatpush3.bf16.msra.mxu0 %v5489_v7  ;;  %v1494_v7 = vrot.slane %v5926_v30, 1  ;;  %v5980_v9 = vsel %vm2299_vm2, %v2300_v25, %v2301_v32  ;;  %v1883_v55 = vshrl.u32 %v5977_v8, 16 }
  0x68   : > { %5090 = vmatprep.subr.bf16.mxu1 %v5488_v10  ;;  %5144 = vmatprep.subr.bf16.mxu0 %v5491_v12 }
  0x6b   : > { %5091 = vmatpush3.bf16.msra.mxu1 %v5488_v10  ;;  %5145 = vmatpush3.bf16.msra.mxu0 %v5491_v12 }
  0x6c   : > { %5092 = vmatprep.subr.bf16.mxu1 %v5490_v19  ;;  %5146 = vmatprep.subr.bf16.mxu0 %v5493_v60 }
  0x6d   : > { %5005 = vmatmul.mubr.bf16.gmra.mxu1 %v5770_v33  ;;  %5061 = vmatmul.mubr.bf16.gmra.mxu0 %v1048_v17  ;;  %v5933_v33 = vld [vmem:[%s7117_s1 + $0x178] sm:$0xff]   ;;  %v2311_v17 = vrot.slane %v5977_v8, 2 }
  0x6e   : > { %5008 = vmatprep.mubr.bf16.mxu1 %v5651_v4  ;;  %5064 = vmatprep.mubr.bf16.mxu0 %v1050_v20  ;;  %v2303_v4 = vrot.slane %v5926_v30, 2  ;;  %v6001_v20 = vld [vmem:[%s5645_s25 + $0x48] sm:$0xff]  }
  0x6f   : > { %5093 = vmatpush3.bf16.msra.mxu1 %v5490_v19  ;;  %5147 = vmatpush3.bf16.msra.mxu0 %v5493_v60  ;;  %v1496_v19 = vrot.slane %v5961_v14, 1  ;;  %v2309_v60 = vrot.slane %v5971_v3, 2 }
  0x70   : > { %5094 = vmatprep.subr.bf16.mxu1 %v5492_v21  ;;  %5236 = vmatprep.subr.bf16.mxu0 %v5915_v24  ;;  %v5942_v11 = vsel %vm2299_vm2, %v2301_v32, %v2303_v4  ;;  %v5988_v10 = vsel %vm2299_vm2, %v2303_v4, %v2305_v6  ;;  %v6013_v32 = vld [vmem:[%s5645_s25 + $0x50] sm:$0xff]  }
  0x71   : > { %v6010_v28 = vsel %vm2299_vm2, %v2309_v60, %v2311_v17  ;;  %v2317_v42 = vrot.slane %v6013_v32, 2 }
  0x73   : > { %5095 = vmatpush3.bf16.msra.mxu1 %v5492_v21  ;;  %v2313_v21 = vrot.slane %v5985_v46, 2 }
  0x74   : > { %5184 = vmatprep.subr.bf16.mxu1 %v5933_v33 }
  0x75   : > { %5009 = vmatmul.mubr.bf16.gmra.mxu1 %v5654_v5  ;;  %5065 = vmatmul.mubr.bf16.gmra.mxu0 %v1052_v34  ;;  %v1059_v5 = vrot.slane %v5779_v40, 1  ;;  %v6016_v4 = vsel %vm2299_vm2, %v2311_v17, %v2313_v21  ;;  %v1868_v34 = vshll.u32 %v5966_v63, 16 }
  0x76   : > { %5012 = vmatprep.mubr.bf16.mxu1 %v5683_v22  ;;  %5068 = vmatprep.mubr.bf16.mxu0 %v1054_v37  ;;  %v1847_v22 = vshrl.u32 %v5926_v30, 16  ;;  %v1498_v37 = vrot.slane %v5966_v63, 1 }
  0x77   : > { %v1062_v16 = vsel %vm1027_vm1, %v1059_v5, %v1061_v44  ;;  %v1861_v44 = vrot.slane %v1859_v35, 2  ;;  %v1870_v49 = vrot.slane %v1868_v34, 2  ;;  %v6064_v35 = vld [vmem:[%s5645_s25 + $0x78] sm:$0xff]   ;;  %v1901_v34 = vshrl.u32 %v6001_v20, 16 }
  0x78   : > { %v1849_v62 = vrot.slane %v1847_v22, 1  ;;  %v2319_v22 = vrot.slane %v6022_v38, 2 }
  0x79   : > { %v1862_v25 = vor.u32 %v1861_v44, %v1858_v18  ;;  %v2325_v18 = vrot.slane %v6053_v2, 2 }
  0x7d   : > { %5013 = vmatmul.mubr.bf16.gmra.mxu1 %v5693_v29  ;;  %5069 = vmatmul.mubr.bf16.gmra.mxu0 %v1056_v47  ;;  %v2307_v29 = vrot.slane %v5966_v63, 2 }
  0x7e   : > { %5016 = vmatprep.mubr.bf16.mxu1 %v5708_v39  ;;  %5072 = vmatprep.mubr.bf16.mxu0 %v1058_v58  ;;  %v1060_v39 = vsel %vm1027_vm1, %v1057_v45, %v1059_v5  ;;  %v1874_v45 = vshrl.u32 %v5971_v3, 16  ;;  %v6043_v58 = vsel %vm2299_vm2, %v2317_v42, %v2319_v22 }
  0x7f   : > { %v5991_v12 = vsel %vm2299_vm2, %v2305_v6, %v2307_v29  ;;  %v6007_v26 = vsel %vm2299_vm2, %v2307_v29, %v2309_v60  ;;  %v6056_v6 = vsel %vm2299_vm2, %v2319_v22, %v2321_v0  ;;  %v2323_v29 = vrot.slane %v6047_v61, 2  ;;  %v5501_v22 = vld [vmem:[%s7117_s1 + $0x170] sm:$0xff]  }
  0x80   : > { %v1493_v60 = vsel %vm1027_vm1, %v1491_v53, %v1492_v57  ;;  %v1871_v53 = vor.u32 %v1870_v49, %v1867_v43  ;;  %v1495_v49 = vsel %vm1027_vm1, %v1492_v57, %v1494_v7 }
  0x85   : > { %5017 = vmatmul.mubr.bf16.gmra.mxu1 %v5722_v50  ;;  %5073 = vmatmul.mubr.bf16.gmra.mxu0 %v1060_v39  ;;  %v1844_v50 = vor.u32 %v1843_v59, %v1840_v56  ;;  %v1886_v56 = vshll.u32 %v5977_v8, 16  ;;  %v1853_v59 = vor.u32 %v1852_v15, %v1849_v62  ;;  %v1876_v62 = vrot.slane %v1874_v45, 1 }
  0x86   : > { %5020 = vmatprep.mubr.bf16.mxu1 %v5743_v1  ;;  %5076 = vmatprep.mubr.bf16.mxu0 %v1062_v16  ;;  %v2315_v1 = vrot.slane %v6001_v20, 2  ;;  %v1879_v15 = vrot.slane %v1877_v48, 2  ;;  %v6067_v16 = vsel %vm2299_vm2, %v2321_v0, %v2323_v29  ;;  %v6094_v48 = vld [vmem:[%s5645_s25 + $0x88] sm:$0xff]   ;;  %v1497_v0 = vsel %vm1027_vm1, %v1494_v7, %v1496_v19 }
  0x87   : > { %v1845_v47 = vsel %vm1828_vm3, %v1836_v31, %v1844_v50  ;;  %v1854_v39 = vsel %vm1828_vm3, %v1844_v50, %v1853_v59  ;;  %v1863_v17 = vsel %vm1828_vm3, %v1853_v59, %v1862_v25  ;;  %v1888_v44 = vrot.slane %v1886_v56, 2 }
  0x88   : > { %v6025_v41 = vsel %vm2299_vm2, %v2313_v21, %v2315_v1  ;;  %v6032_v5 = vsel %vm2299_vm2, %v2315_v1, %v2317_v42  ;;  %v1885_v21 = vrot.slane %v1883_v55, 1  ;;  %v6077_v50 = vsel %vm2299_vm2, %v2323_v29, %v2325_v18  ;;  %v6087_v42 = vld [vmem:[%s5645_s25 + $0x80] sm:$0xff]  }
  0x89   : > { %v2327_v1 = vrot.slane %v6064_v35, 2  ;;  %v2329_v43 = vrot.slane %v6087_v42, 2  ;;  %v1872_v55 = vsel %vm1828_vm3, %v1862_v25, %v1871_v53  ;;  %v1913_v56 = vshll.u32 %v6013_v32, 16 }
  0x8a   : > { %v2331_v59 = vrot.slane %v6094_v48, 2  ;;  %v1889_v25 = vor.u32 %v1888_v44, %v1885_v21  ;;  %v7120_v29 = vrot.slane %v5985_v46, 1  ;;  %v6144_v21 = vld [vmem:[%s5645_s25 + $0x98] ss:$0 sps:$4 sm:$0x33]  }
  0x8b   : > { %v6090_v45 = vsel %vm2299_vm2, %v2325_v18, %v2327_v1  ;;  %v6117_v27 = vsel %vm2299_vm2, %v2327_v1, %v2329_v43  ;;  %v1922_v18 = vshll.u32 %v6022_v38, 16  ;;  %v2617_v1 = vld [vmem:[%s5645_s25 + $0x14] sm:$0xf] }
  0x8d   : > { %5021 = vmatmul.mubr.bf16.gmra.mxu1 %v5760_v23  ;;  %5077 = vmatmul.mubr.bf16.gmra.mxu0 %v5844_v51  ;;  %v1892_v23 = vshrl.u32 %v5985_v46, 16  ;;  %v1895_v51 = vshll.u32 %v5985_v46, 16 }
  0x8e   : > { %5024 = vmatprep.mubr.bf16.mxu1 %v5779_v40  ;;  %5148 = vmatprep.mubr.bf16.mxu0 %v1845_v47  ;;  %v5502_v40 = vld [vmem:[%s7117_s1 + $0x1b0] sm:$0xff]   ;;  %v1880_v47 = vor.u32 %v1879_v15, %v1876_v62  ;;  %v1915_v15 = vrot.slane %v1913_v56, 2 }
  0x8f   : > { %v1894_v13 = vrot.slane %v1892_v23, 1  ;;  %v1897_v31 = vrot.slane %v1895_v51, 2  ;;  %v1500_v23 = vrot.slane %v5971_v3, 1  ;;  %v1502_v51 = vrot.slane %v5977_v8, 1  ;;  %v5512_v8 = vld [vmem:[%s7117_s1 + $0x1a0] sm:$0xff]  }
  0x90   : > { %v1881_v57 = vsel %vm1828_vm3, %v1871_v53, %v1880_v47  ;;  %v1903_v3 = vrot.slane %v1901_v34, 1  ;;  %v1890_v44 = vsel %vm1828_vm3, %v1880_v47, %v1889_v25 }
  0x91   : > { %v6124_v30 = vor.u32 %v1897_v31, %v1894_v13  ;;  %v1501_v13 = vsel %vm1027_vm1, %v1498_v37, %v1500_v23  ;;  %v6151_v14 = vsel %vm1027_vm1, %v1500_v23, %v1502_v51  ;;  %v2616_v31 = vld [vmem:[%s5645_s25 + $0x10] sm:$0xc] }
  0x92   : > { %v6172_v56 = vcombine.low %v2616_v31, %v2617_v1 }
  0x93   : > { %v1899_v53 = vsel %vm1828_vm3, %v1889_v25, %v6124_v30  ;;  %v1940_v25 = vshll.u32 %v6047_v61, 16 }
  0x95   : > { %5025 = vmatmul.mubr.bf16.gmra.mxu1 %v5791_v52  ;;  %5149 = vmatmul.mubr.bf16.vlgmr.msra.gmra.mxu0 %v1854_v39  ;;  %v1904_v52 = vshll.u32 %v6001_v20, 16  ;;  %v1919_v39 = vshrl.u32 %v6022_v38, 16 }
  0x96   : > { %5096 = vmatprep.mubr.bf16.mxu1 %v1493_v60  ;;  %5237 = vmatpush3.bf16.msra.mxu0 %v5915_v24  ;;  %v1910_v24 = vshrl.u32 %v6013_v32, 16  ;;  %v1499_v60 = vsel %vm1027_vm1, %v1496_v19, %v1498_v37  ;;  %v6156_v19 = vsel %vm1027_vm1, %v1502_v51, %v7120_v29  ;;  %v1931_v51 = vshll.u32 %v6036_v54, 16 }
  0x97   : > { %5152 = vmatprep.mubr.bf16.mxu0 %v1863_v17  ;;  %5238 = vmatprep.subr.bf16.mxu0 %v5502_v40  ;;  %v1906_v7 = vrot.slane %v1904_v52, 2  ;;  %v6141_v17 = vld [vmem:[%s5645_s25 + $0x90] sm:$0xff]   ;;  %v1924_v52 = vrot.slane %v1922_v18, 2 }
  0x98   : > { %v1912_v62 = vrot.slane %v1910_v24, 1  ;;  %v2333_v37 = vrot.slane %v6141_v17, 2  ;;  %v2335_v24 = vrot.slane %v6144_v21, 2  ;;  %v5520_v18 = vld [vmem:[%s7117_s1 + $0x190] sm:$0xff]  }
  0x99   : > { %v1907_v34 = vor.u32 %v1906_v7, %v1903_v3  ;;  %v5516_v3 = vld [vmem:[%s7117_s1 + $0x198] sm:$0xff]   ;;  %v6187_v7 = vld [vmem:[%s5645_s25 + $0x20] sm:$0xff]  }
  0x9a   : > { %5239 = vmatpush3.bf16.msra.mxu0 %v5502_v40  ;;  %v6122_v40 = vsel %vm2299_vm2, %v2329_v43, %v2331_v59  ;;  %v6164_v47 = vor.u32 %v1915_v15, %v1912_v62  ;;  %v3550_v43 = vld [vmem:[%s5645_s25 + $0x10] sm:$0x8]  ;;  %v6190_v62 = vsel %vm2299_vm2, %v2333_v37, %v2335_v24  ;;  %v3102_v15 = vshrl.u32 %v6172_v56, 16 }
  0x9b   : > { %5240 = vmatprep.subr.bf16.mxu0 %v5507_v36  ;;  %v4499_v23 = vcombine.low %v3550_v43, %v2617_v1  ;;  %7130 = vst [vmem:[#allocation3_spill] sm:$0xff] %v6190_v62  ;;  %v3575_v31 = vrot.slane %v6187_v7, 3  ;;  %v3119_v24 = vshrl.u32 %v6187_v7, 16  ;;  %v1908_v63 = vsel %vm1828_vm3, %v6124_v30, %v1907_v34 }
  0x9c   : > { %v1942_v62 = vrot.slane %v1940_v25, 2 }
  0x9d   : > { %5097 = vmatmul.mubr.bf16.vlgmr.msra.gmra.mxu1 %v1495_v49  ;;  %5153 = vmatmul.mubr.bf16.gmra.mxu0 %v1872_v55  ;;  %v5509_v49 = vld [vmem:[%s7117_s1 + $0x160] sm:$0xff]   ;;  %v1928_v55 = vshrl.u32 %v6036_v54, 16 }
  0x9e   : > { %5185 = vmatpush3.bf16.msra.mxu1 %v5933_v33  ;;  %5100 = vmatprep.mubr.bf16.mxu1 %v1497_v0  ;;  %v5505_v33 = vld [vmem:[%s7117_s1 + $0x168] sm:$0xff]   ;;  %v6175_v0 = vld [vmem:[%s5645_s25 + $0x18] sm:$0xff]  }
  0x9f   : > { %5186 = vmatprep.subr.bf16.mxu1 %v5501_v22  ;;  %5156 = vmatprep.mubr.bf16.mxu0 %v1881_v57  ;;  %v1937_v57 = vshrl.u32 %v6047_v61, 16  ;;  %v3110_v1 = vshrl.u32 %v6175_v0, 16 }
  0xa0   : > { %5241 = vmatpush3.bf16.msra.mxu0 %v5507_v36  ;;  %v1921_v36 = vrot.slane %v1919_v39, 1  ;;  %v3105_v39 = vshll.u32 %v6172_v56, 16 }
  0xa1   : > { %5242 = vmatprep.subr.bf16.mxu0 %v5512_v8  ;;  %v1939_v30 = vrot.slane %v1937_v57, 1 }
  0xa2   : > { %5187 = vmatpush3.bf16.msra.mxu1 %v5501_v22  ;;  %v6178_v22 = vsel %vm2299_vm2, %v2331_v59, %v2333_v37  ;;  %v3572_v59 = vrot.slane %v4499_v23, 3  ;;  %v3107_v37 = vrot.slane %v3105_v39, 3  ;;  %v3112_v23 = vrot.slane %v3110_v1, 2 }
  0xa3   : > { %5188 = vmatprep.subr.bf16.mxu1 %v5505_v33  ;;  %7129 = vst [vmem:[#allocation2_spill] sm:$0xff] %v6178_v22  ;;  %v1925_v39 = vor.u32 %v1924_v52, %v1921_v36  ;;  %v1917_v1 = vsel %vm1828_vm3, %v1907_v34, %v6164_v47  ;;  %v6218_v22 = vld [vmem:[%s5645_s25 + $0x28] sm:$0xff]   ;;  %v5519_v36 = vld [vmem:[%s7117_s1 + $0x150] sm:$0xff]  }
  0xa4   : > { %5243 = vmatpush3.bf16.msra.mxu0 %v5512_v8  ;;  %v3573_v8 = vrot.slane %v6175_v0, 3  ;;  %v6228_v52 = vld [vmem:[%s5645_s25 + $0x30] sm:$0xff]   ;;  %v3128_v57 = vshrl.u32 %v6218_v22, 16  ;;  %v3131_v25 = vshll.u32 %v6218_v22, 16 }
  0xa5   : > { %5101 = vmatmul.mubr.bf16.gmra.mxu1 %v1499_v60  ;;  %5157 = vmatmul.mubr.bf16.gmra.mxu0 %v1890_v44  ;;  %v3113_v60 = vshll.u32 %v6175_v0, 16  ;;  %v5514_v44 = vld [vmem:[%s7117_s1 + $0x158] sm:$0xff]  }
  0xa6   : > { %5104 = vmatprep.mubr.bf16.mxu1 %v1501_v13  ;;  %5189 = vmatpush3.bf16.msra.mxu1 %v5505_v33  ;;  %v6205_v13 = vsel %vm3571_vm4, %v3572_v59, %v3573_v8  ;;  %v3104_v33 = vrot.slane %v3102_v15, 2  ;;  %v6209_v43 = vsel %vm3571_vm4, %v3573_v8, %v3575_v31  ;;  %v3121_v15 = vrot.slane %v3119_v24, 2 }
  0xa7   : > { %5160 = vmatprep.mubr.bf16.mxu0 %v1899_v53  ;;  %5190 = vmatprep.subr.bf16.mxu1 %v5509_v49  ;;  %7131 = vst [vmem:[#allocation4_spill] sm:$0xff] %v6205_v13  ;;  %7132 = vst [vmem:[#allocation5_spill] sm:$0xff] %v6209_v43  ;;  %v3115_v29 = vrot.slane %v3113_v60, 3  ;;  %v3122_v53 = vshll.u32 %v6187_v7, 16  ;;  %v1930_v60 = vrot.slane %v1928_v55, 1  ;;  %v1933_v13 = vrot.slane %v1931_v51, 2 }
  0xa8   : > { %5244 = vmatprep.subr.bf16.mxu0 %v5516_v3  ;;  %v3108_v59 = vor.u32 %v3107_v37, %v3104_v33  ;;  %v1949_v55 = vshll.u32 %v6053_v2, 16  ;;  %v3577_v51 = vrot.slane %v6218_v22, 3  ;;  %v3579_v37 = vrot.slane %v6228_v52, 3 }
  0xa9   : > { %5245 = vmatpush3.bf16.msra.mxu0 %v5516_v3  ;;  %v3116_v8 = vor.u32 %v3115_v29, %v3112_v23  ;;  %v3124_v43 = vrot.slane %v3122_v53, 3  ;;  %v1946_v3 = vshrl.u32 %v6053_v2, 16  ;;  %v5524_v29 = vld [vmem:[%s7117_s1 + $0x188] sm:$0xff]   ;;  %v3137_v24 = vshrl.u32 %v6228_v52, 16 }
  0xaa   : > { %5191 = vmatpush3.bf16.msra.mxu1 %v5509_v49  ;;  %5246 = vmatprep.subr.bf16.mxu0 %v5520_v18  ;;  %v3130_v23 = vrot.slane %v3128_v57, 2  ;;  %v3133_v53 = vrot.slane %v3131_v25, 3 }
  0xab   : > { %5192 = vmatprep.subr.bf16.mxu1 %v5514_v44  ;;  %v6231_v34 = vsel %vm3100_vm5, %v3108_v59, %v3116_v8  ;;  %v3125_v49 = vor.u32 %v3124_v43, %v3121_v15  ;;  %v6248_v43 = vsel %vm3571_vm4, %v3575_v31, %v3577_v51  ;;  %v5523_v59 = vld [vmem:[%s7117_s1 + $0x148] sm:$0xff]   ;;  %v7136_v15 = vrot.slane %v6001_v20, 1  ;;  %v6278_v20 = vld [vmem:[%s5645_s25 + $0x38] sm:$0xff]  }
  0xac   : > { %7134 = vst [vmem:[#allocation7_spill] sm:$0xff] %v6248_v43  ;;  %v3134_v43 = vor.u32 %v3133_v53, %v3130_v23  ;;  %v1943_v23 = vor.u32 %v1942_v62, %v1939_v30  ;;  %v1967_v62 = vshll.u32 %v6087_v42, 16  ;;  %v3581_v30 = vrot.slane %v6278_v20, 3 }
  0xad   : > { %5105 = vmatmul.mubr.bf16.gmra.mxu1 %v6151_v14  ;;  %5161 = vmatmul.mubr.bf16.gmra.mxu0 %v1908_v63  ;;  %v6240_v33 = vsel %vm3100_vm5, %v3116_v8, %v3125_v49  ;;  %v3140_v14 = vshll.u32 %v6228_v52, 16  ;;  %v6245_v63 = vor.u32 %v1933_v13, %v1930_v60  ;;  %v5529_v13 = vld [vmem:[%s7117_s1 + $0x180] sm:$0xff]   ;;  %v7137_v8 = vrot.slane %v5985_v46, 1 }
  0xae   : > { %5108 = vmatprep.mubr.bf16.mxu1 %v6156_v19  ;;  %5164 = vmatprep.mubr.bf16.mxu0 %v1917_v1  ;;  %7133 = vst [vmem:[#allocation6_spill] sm:$0xff] %v6240_v33  ;;  %v1955_v19 = vshrl.u32 %v6064_v35, 16  ;;  %v7138_v60 = vrot.slane %v6013_v32, 1  ;;  %v7139_v57 = vmov %v7136_v15  ;;  %v1510_v33 = vrot.slane %v6022_v38, 1 }
  0xaf   : > { %5193 = vmatpush3.bf16.msra.mxu1 %v5514_v44  ;;  %5247 = vmatpush3.bf16.msra.mxu0 %v5520_v18  ;;  %v6258_v44 = vsel %vm3571_vm4, %v3577_v51, %v3579_v37  ;;  %v3139_v18 = vrot.slane %v3137_v24, 2  ;;  %v3142_v31 = vrot.slane %v3140_v14, 3  ;;  %v1507_v1 = vsel %vm1027_vm1, %v7137_v8, %v7136_v15 }
  0xb0   : > { %5194 = vmatprep.subr.bf16.mxu1 %v5519_v36  ;;  %5248 = vmatprep.subr.bf16.mxu0 %v5524_v29  ;;  %7135 = vst [vmem:[#allocation8_spill] sm:$0xff] %v6258_v44  ;;  %v1509_v25 = vsel %vm1027_vm1, %v7139_v57, %v7138_v60  ;;  %v1926_v51 = vsel %vm1828_vm3, %v6164_v47, %v1925_v39  ;;  %v1948_v24 = vrot.slane %v1946_v3, 1  ;;  %v1951_v14 = vrot.slane %v1949_v55, 2 }
  0xb1   : > { %v3143_v44 = vor.u32 %v3142_v31, %v3139_v18  ;;  %v1935_v46 = vsel %vm1828_vm3, %v1925_v39, %v6245_v63  ;;  %v1958_v8 = vshll.u32 %v6064_v35, 16  ;;  %v6281_v38 = vsel %vm3100_vm5, %v3125_v49, %v3134_v43  ;;  %v5527_v39 = vld [vmem:[%s7117_s1 + $0x140] sm:$0xff]  }
  0xb2   : > { %7140 = vst [vmem:[#allocation9_spill] sm:$0xff] %v6281_v38  ;;  %v1957_v47 = vrot.slane %v1955_v19, 1  ;;  %v1964_v3 = vshrl.u32 %v6087_v42, 16  ;;  %v3146_v55 = vshrl.u32 %v6278_v20, 16  ;;  %v3149_v53 = vshll.u32 %v6278_v20, 16 }
  0xb3   : > { %5195 = vmatpush3.bf16.msra.mxu1 %v5519_v36  ;;  %5249 = vmatpush3.bf16.msra.mxu0 %v5524_v29  ;;  %v6290_v36 = vld [vmem:[%s7117_s1 + $0x238] sm:$0xff]   ;;  %v6293_v29 = vld [vmem:[%s5645_s25 + $0x40] sm:$0xff]   ;;  %v6296_v49 = vsel %vm3100_vm5, %v3134_v43, %v3143_v44  ;;  %v1952_v19 = vor.u32 %v1951_v14, %v1948_v24  ;;  %v1960_v60 = vrot.slane %v1958_v8, 2  ;;  %v1973_v15 = vshrl.u32 %v6094_v48, 16 }
  0xb4   : > { %5196 = vmatprep.subr.bf16.mxu1 %v5523_v59  ;;  %5250 = vmatprep.subr.bf16.mxu0 %v5529_v13  ;;  %7141 = vst [vmem:[#allocation10_spill] sm:$0xff] %v6296_v49  ;;  %v3583_v18 = vrot.slane %v6293_v29, 3  ;;  %v3155_v31 = vshrl.u32 %v6293_v29, 16  ;;  %v3158_v43 = vshll.u32 %v6293_v29, 16  ;;  %v3148_v57 = vrot.slane %v3146_v55, 2 }
  0xb5   : > { %5109 = vmatmul.mubr.bf16.gmra.mxu1 %v1507_v1  ;;  %5165 = vmatmul.mubr.bf16.gmra.mxu0 %v1926_v51  ;;  %v6306_v1 = vsel %vm3571_vm4, %v3579_v37, %v3581_v30  ;;  %v3151_v51 = vrot.slane %v3149_v53, 3  ;;  %v1966_v37 = vrot.slane %v1964_v3, 1  ;;  %v1969_v14 = vrot.slane %v1967_v62, 2  ;;  %v6330_v62 = vld [vmem:[%s5645_s25 + $0x48] sm:$0xff]  }
  0xb6   : > { %5112 = vmatprep.mubr.bf16.mxu1 %v1509_v25  ;;  %5168 = vmatprep.mubr.bf16.mxu0 %v1935_v46  ;;  %7142 = vst [vmem:[#allocation11_spill] sm:$0xff] %v6306_v1  ;;  %v6312_v25 = vld [vmem:[%s7117_s1 + $0x1f8] sm:$0xff]   ;;  %v6316_v24 = vsel %vm3571_vm4, %v3581_v30, %v3583_v18  ;;  %v7143_v8 = vrot.slane %v6013_v32, 1  ;;  %v1944_v53 = vsel %vm1828_vm3, %v6245_v63, %v1943_v23  ;;  %v1514_v49 = vrot.slane %v6047_v61, 1  ;;  %v6338_v61 = vld [vmem:[%s5645_s25 + $0x50] sm:$0xff]  }
  0xb7   : > { %5197 = vmatpush3.bf16.msra.mxu1 %v5523_v59  ;;  %5251 = vmatpush3.bf16.msra.mxu0 %v5529_v13  ;;  %v3157_v59 = vrot.slane %v3155_v31, 2  ;;  %v3160_v13 = vrot.slane %v3158_v43, 3  ;;  %v3152_v46 = vor.u32 %v3151_v51, %v3148_v57  ;;  %v7144_v38 = vrot.slane %v6036_v54, 1 }
  0xb8   : > { %5198 = vmatprep.subr.bf16.mxu1 %v5527_v39  ;;  %5340 = vmatprep.subr.bf16.mxu0 %v6290_v36  ;;  %v1511_v55 = vsel %vm1027_vm1, %v7143_v8, %v1510_v33  ;;  %v1953_v31 = vsel %vm1828_vm3, %v1943_v23, %v1952_v19  ;;  %v1961_v43 = vor.u32 %v1960_v60, %v1957_v47  ;;  %v1975_v57 = vrot.slane %v1973_v15, 1 }
  0xb9   : > { %v3161_v1 = vor.u32 %v3160_v13, %v3157_v59  ;;  %v1513_v30 = vsel %vm1027_vm1, %v1510_v33, %v7144_v38  ;;  %v6333_v32 = vsel %vm3100_vm5, %v3143_v44, %v3152_v46  ;;  %v1976_v63 = vshll.u32 %v6094_v48, 16 }
  0xba   : > { %7145 = vst [vmem:[#allocation12_spill] sm:$0xff] %v6333_v32  ;;  %v1970_v38 = vor.u32 %v1969_v14, %v1966_v37  ;;  %v3585_v23 = vrot.slane %v6330_v62, 3  ;;  %v3167_v44 = vshll.u32 %v6330_v62, 16  ;;  %v1982_v15 = vshrl.u32 %v6141_v17, 16 }
  0xbb   : > { %5199 = vmatpush3.bf16.msra.mxu1 %v5527_v39  ;;  %v6341_v33 = vsel %vm3100_vm5, %v3152_v46, %v3161_v1  ;;  %v3164_v39 = vshrl.u32 %v6330_v62, 16  ;;  %v3587_v47 = vrot.slane %v6338_v61, 3  ;;  %v3173_v60 = vshrl.u32 %v6338_v61, 16 }
  0xbc   : > { %5288 = vmatprep.subr.bf16.mxu1 %v6312_v25  ;;  %7146 = vst [vmem:[#allocation13_spill] sm:$0xff] %v6341_v33  ;;  %v3176_v51 = vshll.u32 %v6338_v61, 16  ;;  %v1985_v59 = vshll.u32 %v6141_v17, 16  ;;  %v6352_v13 = vsel %vm3571_vm4, %v3583_v18, %v3585_v23  ;;  %v3169_v14 = vrot.slane %v3167_v44, 3 }
  0xbd   : > { %5113 = vmatmul.mubr.bf16.gmra.mxu1 %v1511_v55  ;;  %5169 = vmatmul.mubr.bf16.gmra.mxu0 %v1944_v53  ;;  %v3166_v37 = vrot.slane %v3164_v39, 2  ;;  %v1978_v46 = vrot.slane %v1976_v63, 2  ;;  %v6355_v8 = vsel %vm3571_vm4, %v3585_v23, %v3587_v47  ;;  %v3175_v55 = vrot.slane %v3173_v60, 2 }
  0xbe   : > { %5116 = vmatprep.mubr.bf16.mxu1 %v1513_v30  ;;  %5172 = vmatprep.mubr.bf16.mxu0 %v1953_v31  ;;  %7147 = vst [vmem:[#allocation14_spill] sm:$0xff] %v6355_v8  ;;  %v3178_v53 = vrot.slane %v3176_v51, 3  ;;  %v7148_v31 = vrot.slane %v6036_v54, 1  ;;  %v1962_v33 = vsel %vm1828_vm3, %v1952_v19, %v1961_v43  ;;  %v7149_v32 = vrot.slane %v6053_v2, 1  ;;  %v6366_v8 = vld [vmem:[%s5645_s25 + $0x58] sm:$0xff]   ;;  %v6374_v19 = vld [vmem:[%s5645_s25 + $0x60] sm:$0xff]  }
  0xbf   : > { %v3170_v30 = vor.u32 %v3169_v14, %v3166_v37  ;;  %v1971_v63 = vsel %vm1828_vm3, %v1961_v43, %v1970_v38  ;;  %v1984_v44 = vrot.slane %v1982_v15, 1  ;;  %v1987_v23 = vrot.slane %v1985_v59, 2 }
  0xc0   : > { %v1515_v3 = vsel %vm1027_vm1, %v7148_v31, %v1514_v49  ;;  %v1517_v18 = vsel %vm1027_vm1, %v1514_v49, %v7149_v32  ;;  %v3179_v39 = vor.u32 %v3178_v53, %v3175_v55  ;;  %v1518_v54 = vrot.slane %v6064_v35, 1 }
  0xc1   : > { %v6369_v60 = vsel %vm3100_vm5, %v3161_v1, %v3170_v30  ;;  %v1979_v51 = vor.u32 %v1978_v46, %v1975_v57  ;;  %v1520_v37 = vrot.slane %v6087_v42, 1  ;;  %v1991_v49 = vshrl.u32 %v6144_v21, 16 }
  0xc2   : > { %v6377_v14 = vsel %vm3100_vm5, %v3170_v30, %v3179_v39  ;;  %v3589_v32 = vrot.slane %v6366_v8, 3  ;;  %v3182_v43 = vshrl.u32 %v6366_v8, 16  ;;  %v3185_v1 = vshll.u32 %v6366_v8, 16 }
  0xc3   : > { %7150 = vst [vmem:[#allocation15_spill] sm:$0xff] %v6377_v14  ;;  %v1994_v35 = vshll.u32 %v6144_v21, 16  ;;  %v3591_v42 = vrot.slane %v6374_v19, 3  ;;  %v3191_v57 = vshrl.u32 %v6374_v19, 16  ;;  %v3194_v15 = vshll.u32 %v6374_v19, 16 }
  0xc4   : > { %v3184_v59 = vrot.slane %v3182_v43, 2  ;;  %v3187_v46 = vrot.slane %v3185_v1, 3  ;;  %v7151_v21 = vrot.slane %v6053_v2, 1  ;;  %v1993_v14 = vrot.slane %v1991_v49, 1  ;;  %v6400_v1 = vld [vmem:[%s5645_s25 + $0x68] sm:$0xff]  }
  0xc5   : > { %5117 = vmatmul.mubr.bf16.gmra.mxu1 %v1515_v3  ;;  %5173 = vmatmul.mubr.bf16.gmra.mxu0 %v1962_v33  ;;  %v1988_v3 = vor.u32 %v1987_v23, %v1984_v44  ;;  %v6388_v33 = vsel %vm3571_vm4, %v3587_v47, %v3589_v32  ;;  %v6391_v55 = vsel %vm3571_vm4, %v3589_v32, %v3591_v42  ;;  %v3193_v53 = vrot.slane %v3191_v57, 2 }
  0xc6   : > { %5120 = vmatprep.mubr.bf16.mxu1 %v1517_v18  ;;  %5176 = vmatprep.mubr.bf16.mxu0 %v1971_v63  ;;  %v3196_v30 = vrot.slane %v3194_v15, 3  ;;  %v1519_v31 = vsel %vm1027_vm1, %v7151_v21, %v1518_v54  ;;  %v3188_v18 = vor.u32 %v3187_v46, %v3184_v59  ;;  %v1980_v63 = vsel %vm1828_vm3, %v1970_v38, %v1979_v51  ;;  %v6408_v15 = vld [vmem:[%s5645_s25 + $0x70] sm:$0xff]  }
  0xc7   : > { %v1996_v44 = vrot.slane %v1994_v35, 2  ;;  %v1521_v47 = vsel %vm1027_vm1, %v1518_v54, %v1520_v37  ;;  %v1989_v43 = vsel %vm1828_vm3, %v1979_v51, %v1988_v3  ;;  %v1522_v57 = vrot.slane %v6094_v48, 1 }
  0xc8   : > { %v3197_v23 = vor.u32 %v3196_v30, %v3193_v53  ;;  %v6403_v32 = vsel %vm3100_vm5, %v3179_v39, %v3188_v18  ;;  %v1524_v2 = vrot.slane %v6141_v17, 1  ;;  %v2764_v54 = vrot.slane %v6175_v0, 2 }
  0xc9   : > { %v3593_v51 = vrot.slane %v6400_v1, 3  ;;  %v3200_v49 = vshrl.u32 %v6400_v1, 16  ;;  %v3203_v39 = vshll.u32 %v6400_v1, 16  ;;  %v1997_v48 = vor.u32 %v1996_v44, %v1993_v14 }
  0xca   : > { %v6411_v38 = vsel %vm3100_vm5, %v3188_v18, %v3197_v23  ;;  %v7121_v17 = vrot.slane %v6408_v15, 3  ;;  %v3209_v35 = vshrl.u32 %v6408_v15, 16  ;;  %v3212_v59 = vshll.u32 %v6408_v15, 16 }
  0xcb   : > { %v2763_v46 = vrot.slane %v6172_v56, 2  ;;  %v6422_v0 = vsel %vm3571_vm4, %v3591_v42, %v3593_v51  ;;  %v3202_v53 = vrot.slane %v3200_v49, 2  ;;  %v3205_v30 = vrot.slane %v3203_v39, 3 }
  0xcc   : > { %v6427_v21 = vsel %vm3571_vm4, %v3593_v51, %v7121_v17  ;;  %v3214_v14 = vrot.slane %v3212_v59, 3  ;;  %v1998_v44 = vsel %vm1828_vm3, %v1988_v3, %v1997_v48  ;;  %v1525_v56 = vsel %vm1027_vm1, %v1522_v57, %v1524_v2  ;;  %v5538_v59 = vld [vmem:[%s7117_s1 + $0x1f0] sm:$0xff]  }
  0xcd   : > { %5121 = vmatmul.mubr.bf16.gmra.mxu1 %v1519_v31  ;;  %5177 = vmatmul.mubr.bf16.gmra.mxu0 %v1980_v63  ;;  %v3211_v31 = vrot.slane %v3209_v35, 2  ;;  %v3206_v18 = vor.u32 %v3205_v30, %v3202_v53  ;;  %v1523_v63 = vsel %vm1027_vm1, %v1520_v37, %v1522_v57  ;;  %v2765_v42 = vsel %vm2299_vm2, %v2763_v46, %v2764_v54 }
  0xce   : > { %5124 = vmatprep.mubr.bf16.mxu1 %v1521_v47  ;;  %5180 = vmatprep.mubr.bf16.mxu0 %v1989_v43  ;;  %v5528_v47 = vld [vmem:[%s5645_s25 + $0x98] ss:$0 sps:$4 sm:$0x11]   ;;  %v2766_v3 = vrot.slane %v6187_v7, 2  ;;  %v2768_v39 = vrot.slane %v6218_v22, 2  ;;  %v2770_v7 = vrot.slane %v6228_v52, 2 }
  0xcf   : > { %v6432_v43 = vor.u32 %v3214_v14, %v3211_v31  ;;  %v6437_v49 = vsel %vm3100_vm5, %v3197_v23, %v3206_v18  ;;  %v1526_v37 = vrot.slane %v5528_v47, 1  ;;  %v5539_v23 = vld [vmem:[%s7117_s1 + $0x230] sm:$0xff]   ;;  %v5544_v22 = vld [vmem:[%s7117_s1 + $0x228] sm:$0xff]   ;;  %v5549_v52 = vld [vmem:[%s7117_s1 + $0x220] sm:$0xff]   ;;  %v2776_v46 = vrot.slane %v6330_v62, 2 }
  0xd0   : > { %7153 = vst [vmem:[#allocation17_spill] sm:$0xff] %v6437_v49  ;;  %v2767_v48 = vsel %vm2299_vm2, %v2764_v54, %v2766_v3  ;;  %v2769_v35 = vsel %vm2299_vm2, %v2766_v3, %v2768_v39  ;;  %v2771_v54 = vsel %vm2299_vm2, %v2768_v39, %v2770_v7  ;;  %v2778_v30 = vrot.slane %v6338_v61, 2  ;;  %v5557_v31 = vld [vmem:[%s7117_s1 + $0x210] sm:$0xff]  }
  0xd1   : > { %7152 = vst [vmem:[#allocation16_spill] sm:$0xff] %v6432_v43  ;;  %v6441_v51 = vsel %vm3100_vm5, %v3206_v18, %v6432_v43  ;;  %v1527_v57 = vsel %vm1027_vm1, %v1524_v2, %v1526_v37  ;;  %v2772_v2 = vrot.slane %v6278_v20, 2  ;;  %v2774_v20 = vrot.slane %v6293_v29, 2  ;;  %v5561_v37 = vld [vmem:[%s7117_s1 + $0x208] sm:$0xff]  }
  0xd2   : > { %7154 = vst [vmem:[#allocation18_spill] sm:$0xff] %v6441_v51 }
  0xd3   : > { %v2777_v29 = vsel %vm2299_vm2, %v2774_v20, %v2776_v46 }
  0xd5   : > { %5125 = vmatmul.mubr.bf16.gmra.mxu1 %v1523_v63  ;;  %5181 = vmatmul.mubr.bf16.gmra.mxu0 %v1998_v44  ;;  %v5551_v63 = vld [vmem:[%s7117_s1 + $0x1d8] sm:$0xff]   ;;  %v2779_v44 = vsel %vm2299_vm2, %v2776_v46, %v2778_v30 }
  0xd6   : > { %5128 = vmatprep.mubr.bf16.mxu1 %v1525_v56  ;;  %5252 = vmatprep.mubr.bf16.mxu0 %v2765_v42  ;;  %v5556_v42 = vld [vmem:[%s7117_s1 + $0x1d0] sm:$0xff]  }
  0xdd   : > { %5129 = vmatmul.mubr.bf16.gmra.mxu1 %v1527_v57  ;;  %5253 = vmatmul.mubr.bf16.vlgmr.msra.gmra.mxu0 %v2767_v48  ;;  %v2782_v57 = vrot.slane %v6374_v19, 2 }
  0xde   : > { %5200 = vmatprep.mubr.bf16.mxu1 %v5980_v9  ;;  %5341 = vmatpush3.bf16.msra.mxu0 %v6290_v36  ;;  %v2773_v9 = vsel %vm2299_vm2, %v2770_v7, %v2772_v2  ;;  %v5542_v36 = vld [vmem:[%s7117_s1 + $0x1e8] sm:$0xff]  }
  0xdf   : > { %5256 = vmatprep.mubr.bf16.mxu0 %v2769_v35  ;;  %5342 = vmatprep.subr.bf16.mxu0 %v5539_v23  ;;  %v2784_v35 = vrot.slane %v6400_v1, 2 }
  0xe2   : > { %5343 = vmatpush3.bf16.msra.mxu0 %v5539_v23 }
  0xe3   : > { %5344 = vmatprep.subr.bf16.mxu0 %v5544_v22 }
  0xe5   : > { %5201 = vmatmul.mubr.bf16.vlgmr.msra.gmra.mxu1 %v5942_v11  ;;  %5257 = vmatmul.mubr.bf16.gmra.mxu0 %v2771_v54  ;;  %v2775_v11 = vsel %vm2299_vm2, %v2772_v2, %v2774_v20  ;;  %v2785_v54 = vsel %vm2299_vm2, %v2782_v57, %v2784_v35 }
  0xe6   : > { %5289 = vmatpush3.bf16.msra.mxu1 %v6312_v25  ;;  %5204 = vmatprep.mubr.bf16.mxu1 %v5988_v10  ;;  %v5546_v10 = vld [vmem:[%s7117_s1 + $0x1e0] sm:$0xff]   ;;  %v5553_v25 = vld [vmem:[%s7117_s1 + $0x218] sm:$0xff]  }
  0xe7   : > { %5290 = vmatprep.subr.bf16.mxu1 %v5538_v59  ;;  %5260 = vmatprep.mubr.bf16.mxu0 %v2773_v9  ;;  %v5564_v9 = vld [vmem:[%s7117_s1 + $0x1c0] sm:$0xff]  }
  0xe8   : > { %5345 = vmatpush3.bf16.msra.mxu0 %v5544_v22 }
  0xe9   : > { %5346 = vmatprep.subr.bf16.mxu0 %v5549_v52 }
  0xea   : > { %5291 = vmatpush3.bf16.msra.mxu1 %v5538_v59  ;;  %v6545_v59 = vld [vmem:[%s5645_s25 + $0x78] sm:$0xff]  }
  0xeb   : > { %5292 = vmatprep.subr.bf16.mxu1 %v5542_v36 }
  0xec   : > { %5347 = vmatpush3.bf16.msra.mxu0 %v5549_v52 }
  0xed   : > { %v6482_v53 = vpop.f32.mrf.mxu1  ;;  %5205 = vmatmul.mubr.bf16.gmra.mxu1 %v5991_v12  ;;  %v6485_v62 = vpop.f32.mrf.mxu0  ;;  %5261 = vmatmul.mubr.bf16.gmra.mxu0 %v2775_v11  ;;  %v2780_v12 = vrot.slane %v6366_v8, 2 }
  0xee   : > { %5208 = vmatprep.mubr.bf16.mxu1 %v6007_v26  ;;  %5293 = vmatpush3.bf16.msra.mxu1 %v5542_v36  ;;  %v2786_v36 = vrot.slane %v6408_v15, 2 }
  0xef   : > { %v6492_v14 = vpop.f32.mrf.mxu1  ;;  %v6494_v18 = vpop.f32.mrf.mxu0  ;;  %5264 = vmatprep.mubr.bf16.mxu0 %v2777_v29  ;;  %5294 = vmatprep.subr.bf16.mxu1 %v5546_v10  ;;  %v2781_v8 = vsel %vm2299_vm2, %v2778_v30, %v2780_v12  ;;  %v2783_v22 = vsel %vm2299_vm2, %v2780_v12, %v2782_v57 }
  0xf0   : > { %5348 = vmatprep.subr.bf16.mxu0 %v5553_v25 }
  0xf1   : > { %v6500_v26 = vpop.f32.mrf.mxu1  ;;  %v6502_v61 = vpop.f32.mrf.mxu0  ;;  %5349 = vmatpush3.bf16.msra.mxu0 %v5553_v25  ;;  %v2787_v25 = vsel %vm2299_vm2, %v2784_v35, %v2786_v36 }
  0xf2   : > { %5295 = vmatpush3.bf16.msra.mxu1 %v5546_v10  ;;  %5350 = vmatprep.subr.bf16.mxu0 %v5557_v31  ;;  %v2788_v10 = vrot.slane %v6545_v59, 2 }
  0xf3   : > { %v6505_v47 = vpop.f32.mrf.mxu1  ;;  %v6507_v56 = vpop.f32.mrf.mxu0  ;;  %5296 = vmatprep.subr.bf16.mxu1 %v5551_v63 }
  0xf4   : > { %v2789_v12 = vsel %vm2299_vm2, %v2786_v36, %v2788_v10  ;;  %v6604_v36 = vld [vmem:[%s5645_s25 + $0x98] sm:$0xff]  }
  0xf5   : > { %v6516_v3 = vpop.f32.mrf.mxu1  ;;  %5209 = vmatmul.mubr.bf16.gmra.mxu1 %v6010_v28  ;;  %v6519_v39 = vpop.f32.mrf.mxu0  ;;  %5265 = vmatmul.mubr.bf16.gmra.mxu0 %v2779_v44  ;;  %v5560_v28 = vld [vmem:[%s7117_s1 + $0x1c8] sm:$0xff]   ;;  %7161 = vst [vmem:[#allocation25_spill] sm:$0xff] %v6604_v36 }
  0xf6   : > { %5212 = vmatprep.mubr.bf16.mxu1 %v6016_v4  ;;  %5268 = vmatprep.mubr.bf16.mxu0 %v2781_v8  ;;  %v5565_v4 = vld [vmem:[%s7117_s1 + $0x200] sm:$0xff]  }
  0xf7   : > { %v6523_v48 = vpop.f32.mrf.mxu1  ;;  %v6525_v23 = vpop.f32.mrf.mxu0  ;;  %5297 = vmatpush3.bf16.msra.mxu1 %v5551_v63  ;;  %5351 = vmatpush3.bf16.msra.mxu0 %v5557_v31  ;;  %v6576_v63 = vld [vmem:[%s5645_s25 + $0x88] sm:$0xff]  }
  0xf8   : > { %5298 = vmatprep.subr.bf16.mxu1 %v5556_v42  ;;  %5352 = vmatprep.subr.bf16.mxu0 %v5561_v37  ;;  %7155 = vst [vmem:[#allocation19_spill] sm:$0xff] %v6576_v63  ;;  %v2792_v35 = vrot.slane %v6576_v63, 2 }
  0xf9   : > { %v6534_v19 = vpop.f32.mrf.mxu1  ;;  %v6536_v7 = vpop.f32.mrf.mxu0 }
  0xfb   : > { %v6539_v2 = vpop.f32.mrf.mxu1  ;;  %v6541_v1 = vpop.f32.mrf.mxu0  ;;  %5299 = vmatpush3.bf16.msra.mxu1 %v5556_v42  ;;  %5353 = vmatpush3.bf16.msra.mxu0 %v5561_v37 }
  0xfc   : > { %5300 = vmatprep.subr.bf16.mxu1 %v5560_v28  ;;  %5354 = vmatprep.subr.bf16.mxu0 %v5565_v4 }
  0xfd   : > { %v6550_v52 = vpop.f32.mrf.mxu1  ;;  %5213 = vmatmul.mubr.bf16.gmra.mxu1 %v6025_v41  ;;  %v6553_v20 = vpop.f32.mrf.mxu0  ;;  %5269 = vmatmul.mubr.bf16.gmra.mxu0 %v2783_v22  ;;  %v6596_v22 = vld [vmem:[%s5645_s25 + $0x90] sm:$0xff]  }
  0xfe   : > { %5216 = vmatprep.mubr.bf16.mxu1 %v6032_v5  ;;  %5272 = vmatprep.mubr.bf16.mxu0 %v2785_v54  ;;  %v6568_v5 = vld [vmem:[%s5645_s25 + $0x80] sm:$0xff]   ;;  %7159 = vst [vmem:[#allocation23_spill] sm:$0xff] %v6596_v22 }
  0xff   : > { %v6557_v46 = vpop.f32.mrf.mxu1  ;;  %v6559_v11 = vpop.f32.mrf.mxu0  ;;  %5301 = vmatpush3.bf16.msra.mxu1 %v5560_v28  ;;  %5355 = vmatpush3.bf16.msra.mxu0 %v5565_v4  ;;  %v2790_v42 = vrot.slane %v6568_v5, 2 }
 0x100   : > { %5302 = vmatprep.subr.bf16.mxu1 %v5564_v9 }
 0x101   : > { %v6562_v29 = vpop.f32.mrf.mxu1  ;;  %v6564_v41 = vpop.f32.mrf.mxu0 }
 0x103   : > { %v6570_v30 = vpop.f32.mrf.mxu1  ;;  %v6572_v31 = vpop.f32.mrf.mxu0  ;;  %5303 = vmatpush3.bf16.msra.mxu1 %v5564_v9  ;;  %v2793_v9 = vsel %vm2299_vm2, %v2790_v42, %v2792_v35 }
 0x105   : > { %v6578_v44 = vpop.f32.mrf.mxu1  ;;  %5217 = vmatmul.mubr.bf16.gmra.mxu1 %v6043_v58  ;;  %v6581_v8 = vpop.f32.mrf.mxu0  ;;  %5273 = vmatmul.mubr.bf16.gmra.mxu0 %v2787_v25  ;;  %v2791_v58 = vsel %vm2299_vm2, %v2788_v10, %v2790_v42  ;;  %v2794_v10 = vrot.slane %v6596_v22, 2 }
 0x106   : > { %7156 = vst [vmem:[#allocation20_spill] sm:$0xff] %v6578_v44  ;;  %5220 = vmatprep.mubr.bf16.mxu1 %v6056_v6  ;;  %5276 = vmatprep.mubr.bf16.mxu0 %v2789_v12 }
 0x107   : > { %v6585_v37 = vpop.f32.mrf.mxu1  ;;  %v6587_v57 = vpop.f32.mrf.mxu0 }
 0x108   : > { %7157 = vst [vmem:[#allocation21_spill] sm:$0xff] %v6585_v37 }
 0x109   : > { %v6590_v28 = vpop.f32.mrf.mxu1  ;;  %v6592_v4 = vpop.f32.mrf.mxu0 }
 0x10a   : > { %7158 = vst [vmem:[#allocation22_spill] sm:$0xff] %v6590_v28  ;;  %v2795_v28 = vsel %vm2299_vm2, %v2792_v35, %v2794_v10 }
 0x10b   : > { %v6598_v54 = vpop.f32.mrf.mxu1  ;;  %v6600_v6 = vpop.f32.mrf.mxu0 }
 0x10c   : > { %7160 = vst [vmem:[#allocation24_spill] sm:$0xff] %v6598_v54  ;;  %v2796_v54 = vrot.slane %v6604_v36, 2 }
 0x10d   : > { %v6606_v25 = vpop.f32.mrf.mxu1  ;;  %5221 = vmatmul.mubr.bf16.gmra.mxu1 %v6067_v16  ;;  %v5046_v12 = vpop.f32.mrf.mxu0  ;;  %5277 = vmatmul.mubr.bf16.gmra.mxu0 %v2791_v58 }
 0x10e   : > { %7162 = vst [vmem:[#allocation26_spill] sm:$0xff] %v6606_v25  ;;  %5224 = vmatprep.mubr.bf16.mxu1 %v6077_v50  ;;  %5280 = vmatprep.mubr.bf16.mxu0 %v2793_v9  ;;  %v5563_v25 = vld [vmem:[%s5645_s25 + $0xa0] ss:$0 sps:$4 sm:$0x33]   ;;  %v2797_v58 = vsel %vm2299_vm2, %v2794_v10, %v2796_v54 }
 0x10f   : > { %v6611_v17 = vpop.f32.mrf.mxu1  ;;  %v1165_v51 = vpop.f32.mrf.mxu0 }
 0x110   : > { %7163 = vst [vmem:[#allocation27_spill] sm:$0xff] %v6611_v17 }
 0x111   : > { %v6614_v43 = vpop.f32.mrf.mxu1  ;;  %v5047_v42 = vpop.f32.mrf.mxu0 }
 0x112   : > { %7164 = vst [vmem:[#allocation28_spill] sm:$0xff] %v6614_v43  ;;  %v2798_v43 = vrot.slane %v5563_v25, 2 }
 0x113   : > { %v6618_v37 = vpop.f32.mrf.mxu1  ;;  %v1168_v16 = vpop.f32.mrf.mxu0 }
 0x114   : > { %7165 = vst [vmem:[#allocation29_spill] sm:$0xff] %v6618_v37 }
 0x115   : > { %v4994_v50 = vpop.f32.mrf.mxu1  ;;  %5225 = vmatmul.mubr.bf16.gmra.mxu1 %v6090_v45  ;;  %v5050_v9 = vpop.f32.mrf.mxu0  ;;  %5281 = vmatmul.mubr.bf16.gmra.mxu0 %v2795_v28  ;;  %v2799_v45 = vsel %vm2299_vm2, %v2796_v54, %v2798_v43 }
 0x116   : > { %v872_v17 = vadd.f32 %v4994_v50, %v6485_v62  ;;  %5228 = vmatprep.mubr.bf16.mxu1 %v6117_v27  ;;  %5284 = vmatprep.mubr.bf16.mxu0 %v2797_v58 }
 0x117   : > { %v863_v36 = vpop.f32.mrf.mxu1  ;;  %v1181_v22 = vpop.f32.mrf.mxu0 }
 0x118   : > { %v864_v35 = vadd.f32 %v863_v36, %v6494_v18  ;;  %v6625_v63 = vadd.f32 %v5046_v12, %v872_v17  ;;  %v7166_v36 = vld [vmem:[#allocation2_spill] sm:$0xff] }
 0x119   : > { %v4995_v37 = vpop.f32.mrf.mxu1  ;;  %v5051_v49 = vpop.f32.mrf.mxu0 }
 0x11a   : > { %v875_v10 = vadd.f32 %v4995_v37, %v6502_v61  ;;  %v6629_v44 = vadd.f32 %v1165_v51, %v864_v35  ;;  %v7167_v61 = vld [vmem:[#allocation4_spill] sm:$0xff] }
 0x11b   : > { %v866_v28 = vpop.f32.mrf.mxu1  ;;  %v1184_v62 = vpop.f32.mrf.mxu0 }
 0x11c   : > { %v867_v27 = vadd.f32 %v866_v28, %v6507_v56  ;;  %v6632_v58 = vadd.f32 %v5047_v42, %v875_v10  ;;  %v7168_v28 = vld [vmem:[#allocation3_spill] sm:$0xff] }
 0x11d   : > { %v4998_v25 = vpop.f32.mrf.mxu1  ;;  %5229 = vmatmul.mubr.bf16.gmra.mxu1 %v6122_v40  ;;  %v5054_v18 = vpop.f32.mrf.mxu0  ;;  %5285 = vmatmul.mubr.bf16.gmra.mxu0 %v2799_v45 }
 0x11e   : > { %v888_v17 = vadd.f32 %v4998_v25, %v6519_v39  ;;  %5232 = vmatprep.mubr.bf16.mxu1 %v7166_v36  ;;  %5356 = vmatprep.mubr.bf16.mxu0 %v7167_v61  ;;  %v6638_v43 = vadd.f32 %v1168_v16, %v867_v27  ;;  %v7169_v25 = vld [vmem:[#allocation5_spill] sm:$0xff] }
 0x11f   : > { %v879_v51 = vpop.f32.mrf.mxu1  ;;  %v1197_v37 = vpop.f32.mrf.mxu0 }
 0x120   : > { %v880_v54 = vadd.f32 %v879_v51, %v6525_v23  ;;  %v6641_v56 = vadd.f32 %v5050_v9, %v888_v17  ;;  %v7170_v9 = vld [vmem:[#allocation7_spill] sm:$0xff] }
 0x121   : > { %v4999_v12 = vpop.f32.mrf.mxu1  ;;  %v5055_v42 = vpop.f32.mrf.mxu0 }
 0x122   : > { %v891_v40 = vadd.f32 %v4999_v12, %v6536_v7  ;;  %v6644_v50 = vadd.f32 %v1181_v22, %v880_v54 }
 0x123   : > { %v882_v35 = vpop.f32.mrf.mxu1  ;;  %v1200_v39 = vpop.f32.mrf.mxu0 }
 0x124   : > { %v883_v10 = vadd.f32 %v882_v35, %v6541_v1  ;;  %v6647_v45 = vadd.f32 %v5051_v49, %v891_v40  ;;  %v7171_v35 = vld [vmem:[#allocation6_spill] sm:$0xff] }
 0x125   : > { %v5002_v16 = vpop.f32.mrf.mxu1  ;;  %5233 = vmatmul.mubr.bf16.gmra.mxu1 %v7168_v28  ;;  %v5058_v27 = vpop.f32.mrf.mxu0  ;;  %5357 = vmatmul.mubr.bf16.vlgmr.msra.gmra.mxu0 %v7169_v25  ;;  %v7174_v28 = vld [vmem:[#allocation11_spill] sm:$0xff] }
 0x126   : > { %v904_v23 = vadd.f32 %v5002_v16, %v6553_v20  ;;  %5304 = vmatprep.mubr.bf16.mxu1 %v6231_v34  ;;  %5360 = vmatprep.mubr.bf16.mxu0 %v7170_v9  ;;  %v6654_v7 = vadd.f32 %v1184_v62, %v883_v10  ;;  %v7172_v16 = vld [vmem:[#allocation8_spill] sm:$0xff] }
 0x127   : > { %v895_v22 = vpop.f32.mrf.mxu1  ;;  %v1213_v17 = vpop.f32.mrf.mxu0 }
 0x128   : > { %v896_v1 = vadd.f32 %v895_v22, %v6559_v11  ;;  %v6657_v49 = vadd.f32 %v5054_v18, %v904_v23  ;;  %v7173_v18 = vld [vmem:[#allocation9_spill] sm:$0xff] }
 0x129   : > { %v5003_v36 = vpop.f32.mrf.mxu1  ;;  %v5059_v61 = vpop.f32.mrf.mxu0 }
 0x12a   : > { %v907_v51 = vadd.f32 %v5003_v36, %v6564_v41  ;;  %v6660_v54 = vadd.f32 %v1197_v37, %v896_v1 }
 0x12b   : > { %v898_v12 = vpop.f32.mrf.mxu1  ;;  %v1216_v20 = vpop.f32.mrf.mxu0 }
 0x12c   : > { %v899_v34 = vadd.f32 %v898_v12, %v6572_v31  ;;  %v6663_v40 = vadd.f32 %v5055_v42, %v907_v51 }
 0x12d   : > { %v5006_v62 = vpop.f32.mrf.mxu1  ;;  %5305 = vmatmul.mubr.bf16.vlgmr.msra.gmra.mxu1 %v7171_v35  ;;  %v5062_v10 = vpop.f32.mrf.mxu0  ;;  %5361 = vmatmul.mubr.bf16.gmra.mxu0 %v7172_v16 }
 0x12e   : > { %v920_v11 = vadd.f32 %v5006_v62, %v6581_v8  ;;  %5308 = vmatprep.mubr.bf16.mxu1 %v7173_v18  ;;  %5364 = vmatprep.mubr.bf16.mxu0 %v7174_v28  ;;  %v6670_v41 = vadd.f32 %v1200_v39, %v899_v34  ;;  %v7175_v34 = vld [vmem:[#allocation10_spill] sm:$0xff] }
 0x12f   : > { %v911_v37 = vpop.f32.mrf.mxu1  ;;  %v1229_v25 = vpop.f32.mrf.mxu0 }
 0x130   : > { %v912_v31 = vadd.f32 %v911_v37, %v6587_v57  ;;  %v6673_v42 = vadd.f32 %v5058_v27, %v920_v11  ;;  %v7176_v27 = vld [vmem:[#allocation12_spill] sm:$0xff] }
 0x131   : > { %v5007_v23 = vpop.f32.mrf.mxu1  ;;  %v5063_v9 = vpop.f32.mrf.mxu0 }
 0x132   : > { %v923_v22 = vadd.f32 %v5007_v23, %v6592_v4  ;;  %v6676_v1 = vadd.f32 %v1213_v17, %v912_v31 }
 0x133   : > { %v914_v36 = vpop.f32.mrf.mxu1  ;;  %v1232_v8 = vpop.f32.mrf.mxu0 }
 0x134   : > { %v915_v51 = vadd.f32 %v914_v36, %v6600_v6  ;;  %v6679_v12 = vadd.f32 %v5059_v61, %v923_v22  ;;  %v7178_v22 = vld [vmem:[#allocation14_spill] sm:$0xff] }
 0x135   : > { %v5010_v39 = vpop.f32.mrf.mxu1  ;;  %5309 = vmatmul.mubr.bf16.gmra.mxu1 %v7175_v34  ;;  %v5066_v62 = vpop.f32.mrf.mxu0  ;;  %5365 = vmatmul.mubr.bf16.gmra.mxu0 %v6316_v24 }
 0x136   : > { %v936_v57 = vadd.f32 %v5010_v39, %v6482_v53  ;;  %5312 = vmatprep.mubr.bf16.mxu1 %v7176_v27  ;;  %5368 = vmatprep.mubr.bf16.mxu0 %v6352_v13  ;;  %v6686_v4 = vadd.f32 %v1216_v20, %v915_v51  ;;  %v7177_v20 = vld [vmem:[#allocation13_spill] sm:$0xff] }
 0x137   : > { %v927_v17 = vpop.f32.mrf.mxu1  ;;  %v1245_v35 = vpop.f32.mrf.mxu0 }
 0x138   : > { %v928_v6 = vadd.f32 %v927_v17, %v6492_v14  ;;  %v6689_v61 = vadd.f32 %v5062_v10, %v936_v57 }
 0x139   : > { %v5011_v16 = vpop.f32.mrf.mxu1  ;;  %v5067_v11 = vpop.f32.mrf.mxu0 }
 0x13a   : > { %v939_v18 = vadd.f32 %v5011_v16, %v6500_v26  ;;  %v6692_v28 = vadd.f32 %v1229_v25, %v928_v6  ;;  %v3218_v6 = vshrl.u32 %v6545_v59, 16  ;;  %v3221_v16 = vshll.u32 %v6545_v59, 16 }
 0x13b   : > { %v930_v24 = vpop.f32.mrf.mxu1  ;;  %v1248_v53 = vpop.f32.mrf.mxu0 }
 0x13c   : > { %v931_v37 = vadd.f32 %v930_v24, %v6505_v47  ;;  %v6695_v31 = vadd.f32 %v5063_v9, %v939_v18 }
 0x13d   : > { %v5014_v13 = vpop.f32.mrf.mxu1  ;;  %5313 = vmatmul.mubr.bf16.gmra.mxu1 %v7177_v20  ;;  %v5070_v23 = vpop.f32.mrf.mxu0  ;;  %5369 = vmatmul.mubr.bf16.gmra.mxu0 %v7178_v22  ;;  %v3220_v20 = vrot.slane %v3218_v6, 2  ;;  %v3223_v22 = vrot.slane %v3221_v16, 3 }
 0x13e   : > { %v952_v14 = vadd.f32 %v5014_v13, %v6516_v3  ;;  %5316 = vmatprep.mubr.bf16.mxu1 %v6369_v60  ;;  %5372 = vmatprep.mubr.bf16.mxu0 %v6388_v33  ;;  %v6702_v26 = vadd.f32 %v1232_v8, %v931_v37  ;;  %v7179_v8 = vld [vmem:[#allocation15_spill] sm:$0xff]  ;;  %v7180_v37 = vrot.slane %v6408_v15, 3  ;;  %v3227_v15 = vshrl.u32 %v6568_v5, 16 }
 0x13f   : > { %v943_v10 = vpop.f32.mrf.mxu1  ;;  %v1261_v25 = vpop.f32.mrf.mxu0 }
 0x140   : > { %v944_v47 = vadd.f32 %v943_v10, %v6523_v48  ;;  %v6705_v9 = vadd.f32 %v5066_v62, %v952_v14  ;;  %v7181_v10 = vld [vmem:[#allocation20_spill] sm:$0xff] }
 0x141   : > { %v5015_v36 = vpop.f32.mrf.mxu1  ;;  %v5071_v51 = vpop.f32.mrf.mxu0 }
 0x142   : > { %v955_v39 = vadd.f32 %v5015_v36, %v6534_v19  ;;  %v6708_v34 = vadd.f32 %v1245_v35, %v944_v47  ;;  %v7182_v47 = vld [vmem:[#allocation17_spill] sm:$0xff]  ;;  %v3230_v36 = vshll.u32 %v6568_v5, 16 }
 0x143   : > { %v946_v57 = vpop.f32.mrf.mxu1  ;;  %v1264_v3 = vpop.f32.mrf.mxu0 }
 0x144   : > { %v947_v60 = vadd.f32 %v946_v57, %v6539_v2  ;;  %v6711_v27 = vadd.f32 %v5067_v11, %v955_v39  ;;  %v3597_v2 = vrot.slane %v6545_v59, 3  ;;  %v3224_v57 = vor.u32 %v3223_v22, %v3220_v20  ;;  %v7186_v20 = vld [vmem:[#allocation16_spill] sm:$0xff] }
 0x145   : > { %v5018_v33 = vpop.f32.mrf.mxu1  ;;  %5317 = vmatmul.mubr.bf16.gmra.mxu1 %v7179_v8  ;;  %v5074_v17 = vpop.f32.mrf.mxu0  ;;  %5373 = vmatmul.mubr.bf16.gmra.mxu0 %v6391_v55  ;;  %v7184_v8 = vld [vmem:[#allocation21_spill] sm:$0xff] }
 0x146   : > { %v968_v48 = vadd.f32 %v5018_v33, %v6550_v52  ;;  %5320 = vmatprep.mubr.bf16.mxu1 %v6403_v32  ;;  %5376 = vmatprep.mubr.bf16.mxu0 %v6422_v0  ;;  %v6718_v19 = vadd.f32 %v1248_v53, %v947_v60  ;;  %v3598_v13 = vsel %vm3571_vm4, %v7180_v37, %v3597_v2 }
 0x147   : > { %v959_v62 = vpop.f32.mrf.mxu1  ;;  %v1277_v35 = vpop.f32.mrf.mxu0  ;;  %v3225_v22 = vsel %vm3100_vm5, %v7186_v20, %v3224_v57 }
 0x148   : > { %v960_v11 = vadd.f32 %v959_v62, %v6557_v46  ;;  %v6724_v18 = vadd.f32 %v5070_v23, %v968_v48 }
 0x149   : > { %v5019_v55 = vpop.f32.mrf.mxu1  ;;  %v5075_v52 = vpop.f32.mrf.mxu0 }
 0x14a   : > { %v971_v32 = vadd.f32 %v5019_v55, %v6562_v29  ;;  %v6727_v24 = vadd.f32 %v1261_v25, %v960_v11  ;;  %v3599_v29 = vrot.slane %v6568_v5, 3  ;;  %v7185_v5 = vld [vmem:[#allocation22_spill] sm:$0xff]  ;;  %v3229_v55 = vrot.slane %v3227_v15, 2 }
 0x14b   : > { %v962_v0 = vpop.f32.mrf.mxu1  ;;  %v1280_v53 = vpop.f32.mrf.mxu0 }
 0x14c   : > { %v963_v59 = vadd.f32 %v962_v0, %v6570_v30  ;;  %v6733_v14 = vadd.f32 %v5071_v51, %v971_v32  ;;  %v3600_v11 = vsel %vm3571_vm4, %v3597_v2, %v3599_v29  ;;  %v3232_v32 = vrot.slane %v3230_v36, 3 }
 0x14d   : > { %v5022_v46 = vpop.f32.mrf.mxu1  ;;  %5321 = vmatmul.mubr.bf16.gmra.mxu1 %v6411_v38  ;;  %v5078_v23 = vpop.f32.mrf.mxu0  ;;  %5377 = vmatmul.mubr.bf16.gmra.mxu0 %v6427_v21  ;;  %v7183_v38 = vld [vmem:[#allocation19_spill] sm:$0xff] }
 0x14e   : > { %v984_v25 = vadd.f32 %v5022_v46, %v7181_v10  ;;  %5324 = vmatprep.mubr.bf16.mxu1 %v7182_v47  ;;  %5380 = vmatprep.mubr.bf16.mxu0 %v3598_v13  ;;  %v6742_v30 = vadd.f32 %v1264_v3, %v963_v59  ;;  %v3601_v60 = vrot.slane %v7183_v38, 3  ;;  %v3236_v21 = vshrl.u32 %v7183_v38, 16  ;;  %v7187_v10 = vld [vmem:[#allocation24_spill] sm:$0xff] }
 0x14f   : > { %v975_v51 = vpop.f32.mrf.mxu1  ;;  %v1293_v39 = vpop.f32.mrf.mxu0  ;;  %v3239_v33 = vshll.u32 %v7183_v38, 16 }
 0x150   : > { %v976_v48 = vadd.f32 %v975_v51, %v7184_v8  ;;  %v6748_v62 = vadd.f32 %v5074_v17, %v984_v25  ;;  %v3602_v59 = vsel %vm3571_vm4, %v3599_v29, %v3601_v60  ;;  %v3238_v46 = vrot.slane %v3236_v21, 2  ;;  %v7189_v51 = vld [vmem:[#allocation18_spill] sm:$0xff] }
 0x151   : > { %v5023_v6 = vpop.f32.mrf.mxu1  ;;  %v5079_v16 = vpop.f32.mrf.mxu0  ;;  %v3241_v17 = vrot.slane %v3239_v33, 3  ;;  %v7191_v8 = vld [vmem:[#allocation26_spill] sm:$0xff] }
 0x152   : > { %v987_v3 = vadd.f32 %v5023_v6, %v7185_v5  ;;  %v6752_v0 = vadd.f32 %v1277_v35, %v976_v48  ;;  %v7190_v35 = vld [vmem:[#allocation23_spill] sm:$0xff]  ;;  %v3233_v6 = vor.u32 %v3232_v32, %v3229_v55 }
 0x153   : > { %v978_v37 = vpop.f32.mrf.mxu1  ;;  %v1296_v13 = vpop.f32.mrf.mxu0  ;;  %v3245_v36 = vshrl.u32 %v7190_v35, 16  ;;  %v3248_v38 = vshll.u32 %v7190_v35, 16  ;;  %v3603_v29 = vrot.slane %v7190_v35, 3  ;;  %v3242_v5 = vor.u32 %v3241_v17, %v3238_v46  ;;  %v5567_v35 = vld [vmem:[%s5645_s25 + $0xa0] ss:$0 sps:$4 sm:$0x77]  }
 0x154   : > { %v979_v25 = vadd.f32 %v978_v37, %v7187_v10  ;;  %v6758_v47 = vadd.f32 %v5075_v52, %v987_v3  ;;  %v7193_v3 = vld [vmem:[#allocation25_spill] sm:$0xff]  ;;  %v7194_v10 = vld [vmem:[#allocation27_spill] sm:$0xff] }
 0x155   : > { %v5026_v2 = vpop.f32.mrf.mxu1  ;;  %5325 = vmatmul.mubr.bf16.gmra.mxu1 %v7189_v51  ;;  %v5150_v15 = vpop.f32.mrf.mxu0  ;;  %5381 = vmatmul.mubr.bf16.gmra.mxu0 %v3600_v11  ;;  %v3605_v37 = vrot.slane %v7193_v3, 3  ;;  %v3254_v11 = vshrl.u32 %v7193_v3, 16  ;;  %v3257_v20 = vshll.u32 %v7193_v3, 16  ;;  %v3604_v46 = vsel %vm3571_vm4, %v3601_v60, %v3603_v29 }
 0x156   : > { %7188 = vst [vmem:[#allocation2_spill] sm:$0xff] %v6758_v47  ;;  %v1000_v48 = vadd.f32 %v5026_v2, %v7191_v8  ;;  %5328 = vmatprep.mubr.bf16.mxu1 %v3225_v22  ;;  %5384 = vmatprep.mubr.bf16.mxu0 %v3602_v59  ;;  %v6765_v21 = vadd.f32 %v1280_v53, %v979_v25  ;;  %v3247_v22 = vrot.slane %v3245_v36, 2  ;;  %v3250_v59 = vrot.slane %v3248_v38, 3  ;;  %v7196_v53 = vld [vmem:[#allocation28_spill] sm:$0xff] }
 0x157   : > { %v991_v52 = vpop.f32.mrf.mxu1  ;;  %v2099_v33 = vpop.f32.mrf.mxu0  ;;  %v3234_v8 = vsel %vm3100_vm5, %v3224_v57, %v3233_v6  ;;  %v3243_v3 = vsel %vm3100_vm5, %v3233_v6, %v3242_v5  ;;  %v3607_v60 = vrot.slane %v5567_v35, 3  ;;  %v3266_v6 = vshll.u32 %v5567_v35, 16 }
 0x158   : > { %7192 = vst [vmem:[#allocation4_spill] sm:$0xff] %v6765_v21  ;;  %v992_v51 = vadd.f32 %v991_v52, %v7194_v10  ;;  %v6771_v2 = vadd.f32 %v5078_v23, %v1000_v48  ;;  %v3606_v23 = vsel %vm3571_vm4, %v3603_v29, %v3605_v37  ;;  %v3256_v48 = vrot.slane %v3254_v11, 2  ;;  %v7197_v10 = vld [vmem:[#allocation29_spill] sm:$0xff] }
 0x159   : > { %v5027_v55 = vpop.f32.mrf.mxu1  ;;  %v5151_v32 = vpop.f32.mrf.mxu0  ;;  %v3259_v52 = vrot.slane %v3257_v20, 3  ;;  %v3251_v57 = vor.u32 %v3250_v59, %v3247_v22  ;;  %v3608_v59 = vsel %vm3571_vm4, %v3605_v37, %v3607_v60 }
 0x15a   : > { %7195 = vst [vmem:[#allocation3_spill] sm:$0xff] %v6771_v2  ;;  %v1003_v25 = vadd.f32 %v5027_v55, %v7196_v53  ;;  %v6777_v17 = vadd.f32 %v1293_v39, %v992_v51  ;;  %v3263_v51 = vshrl.u32 %v5567_v35, 16 }
 0x15b   : > { %v994_v21 = vpop.f32.mrf.mxu1  ;;  %v2102_v47 = vpop.f32.mrf.mxu0  ;;  %v3260_v20 = vor.u32 %v3259_v52, %v3256_v48 }
 0x15c   : > { %v995_v36 = vadd.f32 %v994_v21, %v7197_v10  ;;  %v6782_v38 = vadd.f32 %v5079_v16, %v1003_v25 }
 0x15d   : > { %v5098_v2 = vpop.f32.mrf.mxu1  ;;  %5329 = vmatmul.mubr.bf16.gmra.mxu1 %v3234_v8  ;;  %v5154_v55 = vpop.f32.mrf.mxu0  ;;  %5385 = vmatmul.mubr.bf16.gmra.mxu0 %v3604_v46  ;;  %v3252_v8 = vsel %vm3100_vm5, %v3242_v5, %v3251_v57  ;;  %v3268_v46 = vrot.slane %v3266_v6, 3 }
 0x15e   : > { %v1773_v39 = vadd.f32 %v5098_v2, %v6625_v63  ;;  %5332 = vmatprep.mubr.bf16.mxu1 %v3243_v3  ;;  %5388 = vmatprep.mubr.bf16.mxu0 %v3606_v23  ;;  %v6785_v53 = vadd.f32 %v1296_v13, %v995_v36  ;;  %v3265_v2 = vrot.slane %v3263_v51, 2  ;;  %v3261_v23 = vsel %vm3100_vm5, %v3251_v57, %v3260_v20 }
 0x15f   : > { %v1628_v29 = vpop.f32.mrf.mxu1  ;;  %v2115_v11 = vpop.f32.mrf.mxu0 }
 0x160   : > { %v1771_v16 = vadd.f32 %v1628_v29, %v6629_v44  ;;  %v6788_v21 = vadd.f32 %v5150_v15, %v1773_v39 }
 0x161   : > { %v5099_v25 = vpop.f32.mrf.mxu1  ;;  %v5155_v22 = vpop.f32.mrf.mxu0 }
 0x162   : > { %v1774_v63 = vadd.f32 %v5099_v25, %v6632_v58  ;;  %v6793_v35 = vadd.f32 %v2099_v33, %v1771_v16  ;;  %v3269_v58 = vor.u32 %v3268_v46, %v3265_v2 }
 0x163   : > { %v1631_v13 = vpop.f32.mrf.mxu1  ;;  %v2118_v3 = vpop.f32.mrf.mxu0 }
 0x164   : > { %v1772_v44 = vadd.f32 %v1631_v13, %v6638_v43  ;;  %v6797_v15 = vadd.f32 %v5151_v32, %v1774_v63  ;;  %v3270_v39 = vsel %vm3100_vm5, %v3260_v20, %v3269_v58 }
 0x165   : > { %v5102_v48 = vpop.f32.mrf.mxu1  ;;  %5333 = vmatmul.mubr.bf16.gmra.mxu1 %v3252_v8  ;;  %v5158_v5 = vpop.f32.mrf.mxu0  ;;  %5389 = vmatmul.mubr.bf16.gmra.mxu0 %v3608_v59 }
 0x166   : > { %v1777_v37 = vadd.f32 %v5102_v48, %v6641_v56  ;;  %5336 = vmatprep.mubr.bf16.mxu1 %v3261_v23  ;;  %v6800_v52 = vadd.f32 %v2102_v47, %v1772_v44 }
 0x167   : > { %v1644_v33 = vpop.f32.mrf.mxu1  ;;  %v2131_v10 = vpop.f32.mrf.mxu0 }
 0x168   : > { %v1775_v36 = vadd.f32 %v1644_v33, %v6644_v50  ;;  %v6803_v60 = vadd.f32 %v5154_v55, %v1777_v37 }
 0x169   : > { %v5103_v57 = vpop.f32.mrf.mxu1  ;;  %v5159_v43 = vpop.f32.mrf.mxu0 }
 0x16a   : > { %v1778_v32 = vadd.f32 %v5103_v57, %v6647_v45  ;;  %v6807_v51 = vadd.f32 %v2115_v11, %v1775_v36 }
 0x16b   : > { %v1647_v6 = vpop.f32.mrf.mxu1  ;;  %v2134_v56 = vpop.f32.mrf.mxu0 }
 0x16c   : > { %v1776_v29 = vadd.f32 %v1647_v6, %v6654_v7  ;;  %v6810_v47 = vadd.f32 %v5155_v22, %v1778_v32 }
 0x16d   : > { %v5106_v16 = vpop.f32.mrf.mxu1  ;;  %5337 = vmatmul.mubr.bf16.gmra.mxu1 %v3270_v39  ;;  %v5162_v25 = vpop.f32.mrf.mxu0 }
 0x16e   : > { %v1781_v50 = vadd.f32 %v5106_v16, %v6657_v49  ;;  %v6813_v55 = vadd.f32 %v2118_v3, %v1776_v29 }
 0x16f   : > { %v1660_v8 = vpop.f32.mrf.mxu1  ;;  %v2147_v59 = vpop.f32.mrf.mxu0 }
 0x170   : > { %v1779_v45 = vadd.f32 %v1660_v8, %v6660_v54  ;;  %v6816_v20 = vadd.f32 %v5158_v5, %v1781_v50 }
 0x171   : > { %v5107_v11 = vpop.f32.mrf.mxu1  ;;  %v5163_v63 = vpop.f32.mrf.mxu0 }
 0x172   : > { %v1782_v2 = vadd.f32 %v5107_v11, %v6663_v40  ;;  %v6819_v7 = vadd.f32 %v2131_v10, %v1779_v45 }
 0x173   : > { %v1663_v22 = vpop.f32.mrf.mxu1  ;;  %v2150_v46 = vpop.f32.mrf.mxu0 }
 0x174   : > { %v1780_v13 = vadd.f32 %v1663_v22, %v6670_v41  ;;  %v6822_v23 = vadd.f32 %v5159_v43, %v1782_v2 }
 0x175   : > { %v5110_v49 = vpop.f32.mrf.mxu1  ;;  %v5166_v3 = vpop.f32.mrf.mxu0 }
 0x176   : > { %v1785_v44 = vadd.f32 %v5110_v49, %v6673_v42  ;;  %v6825_v48 = vadd.f32 %v2134_v56, %v1780_v13 }
 0x177   : > { %v1676_v54 = vpop.f32.mrf.mxu1  ;;  %v2163_v5 = vpop.f32.mrf.mxu0 }
 0x178   : > { %v1783_v37 = vadd.f32 %v1676_v54, %v6676_v1  ;;  %v6828_v58 = vadd.f32 %v5162_v25, %v1785_v44 }
 0x179   : > { %v5111_v40 = vpop.f32.mrf.mxu1  ;;  %v5167_v33 = vpop.f32.mrf.mxu0 }
 0x17a   : > { %v1786_v10 = vadd.f32 %v5111_v40, %v6679_v12  ;;  %v6831_v36 = vadd.f32 %v2147_v59, %v1783_v37 }
 0x17b   : > { %v1679_v41 = vpop.f32.mrf.mxu1  ;;  %v2166_v57 = vpop.f32.mrf.mxu0 }
 0x17c   : > { %v1784_v43 = vadd.f32 %v1679_v41, %v6686_v4  ;;  %v6834_v32 = vadd.f32 %v5163_v63, %v1786_v10 }
 0x17d   : > { %v5114_v42 = vpop.f32.mrf.mxu1  ;;  %v5170_v39 = vpop.f32.mrf.mxu0 }
 0x17e   : > { %v1789_v6 = vadd.f32 %v5114_v42, %v6689_v61  ;;  %v6837_v56 = vadd.f32 %v2150_v46, %v1784_v43 }
 0x17f   : > { %v1692_v1 = vpop.f32.mrf.mxu1  ;;  %v2179_v29 = vpop.f32.mrf.mxu0 }
 0x180   : > { %v1787_v16 = vadd.f32 %v1692_v1, %v6692_v28  ;;  %v6840_v25 = vadd.f32 %v5166_v3, %v1789_v6 }
 0x181   : > { %v5115_v12 = vpop.f32.mrf.mxu1  ;;  %v5171_v50 = vpop.f32.mrf.mxu0 }
 0x182   : > { %v1790_v8 = vadd.f32 %v5115_v12, %v6695_v31  ;;  %v6843_v59 = vadd.f32 %v2163_v5, %v1787_v16 }
 0x183   : > { %v1695_v4 = vpop.f32.mrf.mxu1  ;;  %v2182_v45 = vpop.f32.mrf.mxu0 }
 0x184   : > { %v1788_v11 = vadd.f32 %v1695_v4, %v6702_v26  ;;  %v6846_v63 = vadd.f32 %v5167_v33, %v1790_v8 }
 0x185   : > { %v5118_v61 = vpop.f32.mrf.mxu1  ;;  %v5174_v2 = vpop.f32.mrf.mxu0 }
 0x186   : > { %v1793_v22 = vadd.f32 %v5118_v61, %v6705_v9  ;;  %v6849_v46 = vadd.f32 %v2166_v57, %v1788_v11 }
 0x187   : > { %v1708_v28 = vpop.f32.mrf.mxu1  ;;  %v2195_v13 = vpop.f32.mrf.mxu0 }
 0x188   : > { %v1791_v49 = vadd.f32 %v1708_v28, %v6708_v34  ;;  %v6852_v3 = vadd.f32 %v5170_v39, %v1793_v22  ;;  %v7198_v28 = vld [vmem:[#allocation2_spill] sm:$0xff] }
 0x189   : > { %v5119_v31 = vpop.f32.mrf.mxu1  ;;  %v5175_v44 = vpop.f32.mrf.mxu0 }
 0x18a   : > { %v1794_v54 = vadd.f32 %v5119_v31, %v6711_v27  ;;  %v6855_v5 = vadd.f32 %v2179_v29, %v1791_v49 }
 0x18b   : > { %v1711_v26 = vpop.f32.mrf.mxu1  ;;  %v2198_v37 = vpop.f32.mrf.mxu0 }
 0x18c   : > { %v1792_v40 = vadd.f32 %v1711_v26, %v6718_v19  ;;  %v6858_v33 = vadd.f32 %v5171_v50, %v1794_v54 }
 0x18d   : > { %v5122_v9 = vpop.f32.mrf.mxu1  ;;  %v5178_v10 = vpop.f32.mrf.mxu0 }
 0x18e   : > { %v1797_v41 = vadd.f32 %v5122_v9, %v6724_v18  ;;  %v6861_v57 = vadd.f32 %v2182_v45, %v1792_v40  ;;  %v7200_v40 = vld [vmem:[#allocation3_spill] sm:$0xff] }
 0x18f   : > { %v1724_v34 = vpop.f32.mrf.mxu1  ;;  %v2211_v43 = vpop.f32.mrf.mxu0 }
 0x190   : > { %v1795_v42 = vadd.f32 %v1724_v34, %v6727_v24  ;;  %v6864_v39 = vadd.f32 %v5174_v2, %v1797_v41 }
 0x191   : > { %v5123_v27 = vpop.f32.mrf.mxu1  ;;  %v5179_v6 = vpop.f32.mrf.mxu0 }
 0x192   : > { %v1798_v1 = vadd.f32 %v5123_v27, %v6733_v14  ;;  %v6867_v29 = vadd.f32 %v2195_v13, %v1795_v42 }
 0x193   : > { %v1727_v19 = vpop.f32.mrf.mxu1  ;;  %v2214_v16 = vpop.f32.mrf.mxu0 }
 0x194   : > { %v1796_v12 = vadd.f32 %v1727_v19, %v6742_v30  ;;  %v6870_v50 = vadd.f32 %v5175_v44, %v1798_v1  ;;  %v7199_v44 = vld [vmem:[#allocation4_spill] sm:$0xff] }
 0x195   : > { %v5126_v18 = vpop.f32.mrf.mxu1  ;;  %v5182_v8 = vpop.f32.mrf.mxu0 }
 0x196   : > { %v1801_v4 = vadd.f32 %v5126_v18, %v6748_v62  ;;  %v6873_v45 = vadd.f32 %v2198_v37, %v1796_v12 }
 0x197   : > { %v1740_v24 = vpop.f32.mrf.mxu1  ;;  %v2227_v11 = vpop.f32.mrf.mxu0 }
 0x198   : > { %v1799_v61 = vadd.f32 %v1740_v24, %v6752_v0  ;;  %v6876_v2 = vadd.f32 %v5178_v10, %v1801_v4 }
 0x199   : > { %v5127_v14 = vpop.f32.mrf.mxu1  ;;  %v5183_v22 = vpop.f32.mrf.mxu0 }
 0x19a   : > { %v1802_v13 = vadd.f32 %v5127_v14, %v7198_v28  ;;  %v6879_v49 = vadd.f32 %v2211_v43, %v1799_v61 }
 0x19b   : > { %v1743_v30 = vpop.f32.mrf.mxu1  ;;  %v2230_v31 = vpop.f32.mrf.mxu0 }
 0x19c   : > { %v1800_v54 = vadd.f32 %v1743_v30, %v7199_v44  ;;  %v6882_v26 = vadd.f32 %v5179_v6, %v1802_v13 }
 0x19d   : > { %v5130_v62 = vpop.f32.mrf.mxu1  ;;  %v5254_v37 = vpop.f32.mrf.mxu0 }
 0x19e   : > { %v1805_v9 = vadd.f32 %v5130_v62, %v7200_v40  ;;  %v6885_v41 = vadd.f32 %v2214_v16, %v1800_v54 }
 0x19f   : > { %v1756_v0 = vpop.f32.mrf.mxu1  ;;  %v2900_v10 = vpop.f32.mrf.mxu0 }
 0x1a0   : > { %v1803_v34 = vadd.f32 %v1756_v0, %v6777_v17  ;;  %v6888_v42 = vadd.f32 %v5182_v8, %v1805_v9 }
 0x1a1   : > { %v5131_v43 = vpop.f32.mrf.mxu1  ;;  %v5255_v27 = vpop.f32.mrf.mxu0 }
 0x1a2   : > { %v1806_v1 = vadd.f32 %v5131_v43, %v6782_v38  ;;  %v6891_v19 = vadd.f32 %v2227_v11, %v1803_v34 }
 0x1a3   : > { %v1759_v6 = vpop.f32.mrf.mxu1  ;;  %v2903_v12 = vpop.f32.mrf.mxu0 }
 0x1a4   : > { %v1804_v18 = vadd.f32 %v1759_v6, %v6785_v53  ;;  %v6894_v4 = vadd.f32 %v5183_v22, %v1806_v1 }
 0x1a5   : > { %v5202_v16 = vpop.f32.mrf.mxu1  ;;  %v5258_v24 = vpop.f32.mrf.mxu0 }
 0x1a6   : > { %v2582_v61 = vadd.f32 %v5202_v16, %v6788_v21  ;;  %v6897_v14 = vadd.f32 %v2230_v31, %v1804_v18 }
 0x1a7   : > { %v2437_v17 = vpop.f32.mrf.mxu1  ;;  %v2916_v8 = vpop.f32.mrf.mxu0 }
 0x1a8   : > { %v2580_v28 = vadd.f32 %v2437_v17, %v6793_v35  ;;  %v6900_v13 = vadd.f32 %v5254_v37, %v2582_v61 }
 0x1a9   : > { %v5203_v38 = vpop.f32.mrf.mxu1  ;;  %v5259_v11 = vpop.f32.mrf.mxu0 }
 0x1aa   : > { %v2583_v30 = vadd.f32 %v5203_v38, %v6797_v15  ;;  %v6903_v44 = vadd.f32 %v2900_v10, %v2580_v28 }
 0x1ab   : > { %v2440_v53 = vpop.f32.mrf.mxu1  ;;  %v2919_v22 = vpop.f32.mrf.mxu0 }
 0x1ac   : > { %v2581_v54 = vadd.f32 %v2440_v53, %v6800_v52  ;;  %v6906_v62 = vadd.f32 %v5255_v27, %v2583_v30 }
 0x1ad   : > { %v5206_v21 = vpop.f32.mrf.mxu1  ;;  %v5262_v31 = vpop.f32.mrf.mxu0 }
 0x1ae   : > { %v2586_v40 = vadd.f32 %v5206_v21, %v6803_v60  ;;  %v6909_v9 = vadd.f32 %v2903_v12, %v2581_v54 }
 0x1af   : > { %v2453_v35 = vpop.f32.mrf.mxu1  ;;  %v2932_v37 = vpop.f32.mrf.mxu0 }
 0x1b0   : > { %v2584_v0 = vadd.f32 %v2453_v35, %v6807_v51  ;;  %v6912_v34 = vadd.f32 %v5258_v24, %v2586_v40 }
 0x1b1   : > { %v5207_v15 = vpop.f32.mrf.mxu1  ;;  %v5263_v10 = vpop.f32.mrf.mxu0 }
 0x1b2   : > { %v2587_v43 = vadd.f32 %v5207_v15, %v6810_v47  ;;  %v6915_v1 = vadd.f32 %v2916_v8, %v2584_v0 }
 0x1b3   : > { %v2456_v52 = vpop.f32.mrf.mxu1  ;;  %v2935_v27 = vpop.f32.mrf.mxu0 }
 0x1b4   : > { %v2585_v6 = vadd.f32 %v2456_v52, %v6813_v55  ;;  %v6918_v18 = vadd.f32 %v5259_v11, %v2587_v43 }
 0x1b5   : > { %v5210_v60 = vpop.f32.mrf.mxu1  ;;  %v5266_v12 = vpop.f32.mrf.mxu0 }
 0x1b6   : > { %v2590_v16 = vadd.f32 %v5210_v60, %v6816_v20  ;;  %v6921_v61 = vadd.f32 %v2919_v22, %v2585_v6 }
 0x1b7   : > { %v2469_v51 = vpop.f32.mrf.mxu1  ;;  %v2948_v24 = vpop.f32.mrf.mxu0 }
 0x1b8   : > { %v2588_v17 = vadd.f32 %v2469_v51, %v6819_v7  ;;  %v6924_v28 = vadd.f32 %v5262_v31, %v2590_v16 }
 0x1b9   : > { %v5211_v47 = vpop.f32.mrf.mxu1  ;;  %v5267_v8 = vpop.f32.mrf.mxu0 }
 0x1ba   : > { %v2591_v38 = vadd.f32 %v5211_v47, %v6822_v23  ;;  %v6927_v30 = vadd.f32 %v2932_v37, %v2588_v17 }
 0x1bb   : > { %v2472_v55 = vpop.f32.mrf.mxu1  ;;  %v2951_v11 = vpop.f32.mrf.mxu0 }
 0x1bc   : > { %v2589_v53 = vadd.f32 %v2472_v55, %v6825_v48  ;;  %v6930_v54 = vadd.f32 %v5263_v10, %v2591_v38 }
 0x1bd   : > { %v5214_v20 = vpop.f32.mrf.mxu1  ;;  %v5270_v22 = vpop.f32.mrf.mxu0 }
 0x1be   : > { %v2594_v21 = vadd.f32 %v5214_v20, %v6828_v58  ;;  %v6933_v40 = vadd.f32 %v2935_v27, %v2589_v53 }
 0x1bf   : > { %v2485_v7 = vpop.f32.mrf.mxu1  ;;  %v2964_v31 = vpop.f32.mrf.mxu0 }
 0x1c0   : > { %v2592_v35 = vadd.f32 %v2485_v7, %v6831_v36  ;;  %v6936_v0 = vadd.f32 %v5266_v12, %v2594_v21 }
 0x1c1   : > { %v5215_v23 = vpop.f32.mrf.mxu1  ;;  %v5271_v37 = vpop.f32.mrf.mxu0 }
 0x1c2   : > { %v2595_v15 = vadd.f32 %v5215_v23, %v6834_v32  ;;  %v6939_v43 = vadd.f32 %v2948_v24, %v2592_v35 }
 0x1c3   : > { %v2488_v48 = vpop.f32.mrf.mxu1  ;;  %v2967_v10 = vpop.f32.mrf.mxu0 }
 0x1c4   : > { %v2593_v52 = vadd.f32 %v2488_v48, %v6837_v56  ;;  %v6942_v6 = vadd.f32 %v5267_v8, %v2595_v15 }
 0x1c5   : > { %v5218_v58 = vpop.f32.mrf.mxu1  ;;  %v5274_v27 = vpop.f32.mrf.mxu0 }
 0x1c6   : > { %v2598_v60 = vadd.f32 %v5218_v58, %v6840_v25  ;;  %v6945_v16 = vadd.f32 %v2951_v11, %v2593_v52 }
 0x1c7   : > { %v2501_v36 = vpop.f32.mrf.mxu1  ;;  %v2980_v12 = vpop.f32.mrf.mxu0 }
 0x1c8   : > { %v2596_v51 = vadd.f32 %v2501_v36, %v6843_v59  ;;  %v6948_v17 = vadd.f32 %v5270_v22, %v2598_v60 }
 0x1c9   : > { %v5219_v32 = vpop.f32.mrf.mxu1  ;;  %v5275_v24 = vpop.f32.mrf.mxu0 }
 0x1ca   : > { %v2599_v47 = vadd.f32 %v5219_v32, %v6846_v63  ;;  %v6951_v38 = vadd.f32 %v2964_v31, %v2596_v51 }
 0x1cb   : > { %v2504_v56 = vpop.f32.mrf.mxu1  ;;  %v2983_v8 = vpop.f32.mrf.mxu0 }
 0x1cc   : > { %v2597_v55 = vadd.f32 %v2504_v56, %v6849_v46  ;;  %v6954_v53 = vadd.f32 %v5271_v37, %v2599_v47 }
 0x1cd   : > { %v5222_v25 = vpop.f32.mrf.mxu1  ;;  %v5278_v11 = vpop.f32.mrf.mxu0 }
 0x1ce   : > { %v2602_v20 = vadd.f32 %v5222_v25, %v6852_v3  ;;  %v6957_v21 = vadd.f32 %v2967_v10, %v2597_v55 }
 0x1cf   : > { %v2517_v59 = vpop.f32.mrf.mxu1  ;;  %v2996_v22 = vpop.f32.mrf.mxu0 }
 0x1d0   : > { %v2600_v7 = vadd.f32 %v2517_v59, %v6855_v5  ;;  %v6960_v35 = vadd.f32 %v5274_v27, %v2602_v20 }
 0x1d1   : > { %v5223_v63 = vpop.f32.mrf.mxu1  ;;  %v5279_v31 = vpop.f32.mrf.mxu0 }
 0x1d2   : > { %v2603_v23 = vadd.f32 %v5223_v63, %v6858_v33  ;;  %v6963_v15 = vadd.f32 %v2980_v12, %v2600_v7 }
 0x1d3   : > { %v2520_v46 = vpop.f32.mrf.mxu1  ;;  %v2999_v37 = vpop.f32.mrf.mxu0 }
 0x1d4   : > { %v2601_v48 = vadd.f32 %v2520_v46, %v6861_v57  ;;  %v6966_v52 = vadd.f32 %v5275_v24, %v2603_v23 }
 0x1d5   : > { %v5226_v3 = vpop.f32.mrf.mxu1  ;;  %v5282_v10 = vpop.f32.mrf.mxu0 }
 0x1d6   : > { %v2606_v58 = vadd.f32 %v5226_v3, %v6864_v39  ;;  %v6969_v60 = vadd.f32 %v2983_v8, %v2601_v48 }
 0x1d7   : > { %v2533_v5 = vpop.f32.mrf.mxu1  ;;  %v3012_v27 = vpop.f32.mrf.mxu0 }
 0x1d8   : > { %v2604_v36 = vadd.f32 %v2533_v5, %v6867_v29  ;;  %v6972_v51 = vadd.f32 %v5278_v11, %v2606_v58 }
 0x1d9   : > { %v5227_v33 = vpop.f32.mrf.mxu1  ;;  %v5283_v12 = vpop.f32.mrf.mxu0 }
 0x1da   : > { %v2607_v32 = vadd.f32 %v5227_v33, %v6870_v50  ;;  %v6975_v47 = vadd.f32 %v2996_v22, %v2604_v36 }
 0x1db   : > { %v2536_v57 = vpop.f32.mrf.mxu1  ;;  %v3015_v24 = vpop.f32.mrf.mxu0 }
 0x1dc   : > { %v2605_v56 = vadd.f32 %v2536_v57, %v6873_v45  ;;  %v6978_v55 = vadd.f32 %v5279_v31, %v2607_v32 }
 0x1dd   : > { %v5230_v39 = vpop.f32.mrf.mxu1  ;;  %v5286_v8 = vpop.f32.mrf.mxu0 }
 0x1de   : > { %v2610_v25 = vadd.f32 %v5230_v39, %v6876_v2  ;;  %v6981_v20 = vadd.f32 %v2999_v37, %v2605_v56 }
 0x1df   : > { %v2549_v29 = vpop.f32.mrf.mxu1  ;;  %v3028_v11 = vpop.f32.mrf.mxu0 }
 0x1e0   : > { %v2608_v59 = vadd.f32 %v2549_v29, %v6879_v49  ;;  %v6984_v7 = vadd.f32 %v5282_v10, %v2610_v25 }
 0x1e1   : > { %v5231_v50 = vpop.f32.mrf.mxu1  ;;  %v5287_v22 = vpop.f32.mrf.mxu0 }
 0x1e2   : > { %v2611_v63 = vadd.f32 %v5231_v50, %v6882_v26  ;;  %v6987_v23 = vadd.f32 %v3012_v27, %v2608_v59 }
 0x1e3   : > { %v2552_v45 = vpop.f32.mrf.mxu1  ;;  %v3031_v31 = vpop.f32.mrf.mxu0 }
 0x1e4   : > { %v2609_v46 = vadd.f32 %v2552_v45, %v6885_v41  ;;  %v6990_v48 = vadd.f32 %v5283_v12, %v2611_v63 }
 0x1e5   : > { %v5234_v2 = vpop.f32.mrf.mxu1  ;;  %v5358_v37 = vpop.f32.mrf.mxu0 }
 0x1e6   : > { %v2614_v3 = vadd.f32 %v5234_v2, %v6888_v42  ;;  %v6993_v58 = vadd.f32 %v3015_v24, %v2609_v46 }
 0x1e7   : > { %v2565_v49 = vpop.f32.mrf.mxu1  ;;  %v3709_v10 = vpop.f32.mrf.mxu0 }
 0x1e8   : > { %v2612_v5 = vadd.f32 %v2565_v49, %v6891_v19  ;;  %v6996_v36 = vadd.f32 %v5286_v8, %v2614_v3 }
 0x1e9   : > { %v5235_v26 = vpop.f32.mrf.mxu1  ;;  %v5359_v27 = vpop.f32.mrf.mxu0 }
 0x1ea   : > { %v2615_v33 = vadd.f32 %v5235_v26, %v6894_v4  ;;  %v6999_v32 = vadd.f32 %v3028_v11, %v2612_v5  ;;  %v7011_v11 = vld [vmem:[%s7118_s2] ss:$0 sm:$0xff] }
 0x1eb   : > { %v2568_v41 = vpop.f32.mrf.mxu1  ;;  %v3712_v12 = vpop.f32.mrf.mxu0 }
 0x1ec   : > { %v2613_v57 = vadd.f32 %v2568_v41, %v6897_v14  ;;  %v7002_v56 = vadd.f32 %v5287_v22, %v2615_v33 }
 0x1ed   : > { %v5306_v42 = vpop.f32.mrf.mxu1  ;;  %v5362_v24 = vpop.f32.mrf.mxu0 }
 0x1ee   : > { %v3516_v39 = vadd.f32 %v5306_v42, %v6900_v13  ;;  %v7005_v19 = vadd.f32 %v3031_v31, %v2613_v57 }
 0x1ef   : > { %v3371_v8 = vpop.f32.mrf.mxu1  ;;  %v3725_v25 = vpop.f32.mrf.mxu0 }
 0x1f0   : > { %v3854_v29 = vadd.f32 %v5358_v37, %v3516_v39  ;;  %v3514_v4 = vadd.f32 %v3371_v8, %v6903_v44 }
 0x1f1   : > { %v5307_v14 = vpop.f32.mrf.mxu1  ;;  %v5363_v59 = vpop.f32.mrf.mxu0 }
 0x1f2   : > { %v3852_v50 = vadd.f32 %v3709_v10, %v3514_v4  ;;  %v3517_v22 = vadd.f32 %v5307_v14, %v6906_v62  ;;  %v3897_v45 = vadd.f32 %v7011_v11, %v3854_v29 }
 0x1f3   : > { %v3374_v63 = vpop.f32.mrf.mxu1  ;;  %v3728_v13 = vpop.f32.mrf.mxu0 }
 0x1f4   : > { %v3855_v31 = vadd.f32 %v5359_v27, %v3517_v22  ;;  %v3515_v46 = vadd.f32 %v3374_v63, %v6909_v9  ;;  %v3895_v37 = vadd.f32 %v7011_v11, %v3852_v50  ;;  %v3933_v62 = vmax.f32 %v3897_v45, 0.0 }
 0x1f5   : > { %v5310_v2 = vpop.f32.mrf.mxu1  ;;  %v5366_v44 = vpop.f32.mrf.mxu0 }
 0x1f6   : > { %v3898_v3 = vadd.f32 %v7011_v11, %v3855_v31  ;;  %v3853_v49 = vadd.f32 %v3712_v12, %v3515_v46  ;;  %v3520_v5 = vadd.f32 %v5310_v2, %v6912_v34  ;;  %v3931_v42 = vmax.f32 %v3895_v37, 0.0 }
 0x1f7   : > { %v3387_v10 = vpop.f32.mrf.mxu1  ;;  %v3741_v26 = vpop.f32.mrf.mxu0 }
 0x1f8   : > { %v3934_v33 = vmax.f32 %v3898_v3, 0.0  ;;  %v3896_v41 = vadd.f32 %v7011_v11, %v3853_v49  ;;  %v3518_v27 = vadd.f32 %v3387_v10, %v6915_v1  ;;  %v3858_v9 = vadd.f32 %v5362_v24, %v3520_v5 }
 0x1f9   : > { %v5311_v57 = vpop.f32.mrf.mxu1  ;;  %v5367_v12 = vpop.f32.mrf.mxu0 }
 0x1fa   : > { %v4591_v34 = vpack.c.bf16 %v3934_v33, %v3933_v62  ;;  %v3932_v39 = vmax.f32 %v3896_v41, 0.0  ;;  %v3856_v8 = vadd.f32 %v3725_v25, %v3518_v27  ;;  %v3521_v29 = vadd.f32 %v5311_v57, %v6918_v18 }
 0x1fb   : > { %v3390_v4 = vpop.f32.mrf.mxu1  ;;  %v3744_v14 = vpop.f32.mrf.mxu0  ;;  %v3901_v22 = vadd.f32 %v7011_v11, %v3858_v9 }
 0x1fc   : > { %4673 = vst [vmem:[%s7025_s12 + $0x8] sm:$0xff] %v4591_v34   ;;  %v4586_v1 = vpack.c.bf16 %v3932_v39, %v3931_v42  ;;  %v3519_v50 = vadd.f32 %v3390_v4, %v6921_v61  ;;  %v3859_v63 = vadd.f32 %v5363_v59, %v3521_v29  ;;  %v3899_v31 = vadd.f32 %v7011_v11, %v3856_v8 }
 0x1fd   : > { %v5314_v45 = vpop.f32.mrf.mxu1  ;;  %v5370_v24 = vpop.f32.mrf.mxu0  ;;  %v3937_v5 = vmax.f32 %v3901_v22, 0.0 }
 0x1fe   : > { %4587 = vst [vmem:[%s7025_s12] sm:$0xff] %v4586_v1   ;;  %v3857_v46 = vadd.f32 %v3728_v13, %v3519_v50  ;;  %v3524_v2 = vadd.f32 %v5314_v45, %v6924_v28  ;;  %v3902_v25 = vadd.f32 %v7011_v11, %v3859_v63  ;;  %v3935_v33 = vmax.f32 %v3899_v31, 0.0 }
 0x1ff   : > { %v3403_v18 = vpop.f32.mrf.mxu1  ;;  %v3757_v37 = vpop.f32.mrf.mxu0 }
 0x200   : > { %v3900_v3 = vadd.f32 %v7011_v11, %v3857_v46  ;;  %v3862_v49 = vadd.f32 %v5366_v44, %v3524_v2  ;;  %v3522_v61 = vadd.f32 %v3403_v18, %v6927_v30  ;;  %v3938_v59 = vmax.f32 %v3902_v25, 0.0 }
 0x201   : > { %v5315_v10 = vpop.f32.mrf.mxu1  ;;  %v5371_v62 = vpop.f32.mrf.mxu0 }
 0x202   : > { %v3936_v41 = vmax.f32 %v3900_v3, 0.0  ;;  %v3525_v13 = vadd.f32 %v5315_v10, %v6930_v54  ;;  %v4601_v28 = vpack.c.bf16 %v3938_v59, %v3937_v5  ;;  %v3860_v27 = vadd.f32 %v3741_v26, %v3522_v61 }
 0x203   : > { %v3406_v9 = vpop.f32.mrf.mxu1  ;;  %v3760_v57 = vpop.f32.mrf.mxu0  ;;  %v3905_v34 = vadd.f32 %v7011_v11, %v3862_v49 }
 0x204   : > { %v4596_v42 = vpack.c.bf16 %v3936_v41, %v3935_v33  ;;  %v3863_v44 = vadd.f32 %v5367_v12, %v3525_v13  ;;  %4675 = vst [vmem:[%s7025_s12 + $0x18] sm:$0xff] %v4601_v28   ;;  %v3523_v30 = vadd.f32 %v3406_v9, %v6933_v40  ;;  %v3903_v54 = vadd.f32 %v7011_v11, %v3860_v27 }
 0x205   : > { %v5318_v39 = vpop.f32.mrf.mxu1  ;;  %v5374_v8 = vpop.f32.mrf.mxu0  ;;  %v3941_v22 = vmax.f32 %v3905_v34, 0.0 }
 0x206   : > { %4674 = vst [vmem:[%s7025_s12 + $0x10] sm:$0xff] %v4596_v42   ;;  %v3906_v29 = vadd.f32 %v7011_v11, %v3863_v44  ;;  %v3528_v4 = vadd.f32 %v5318_v39, %v6936_v0  ;;  %v3861_v1 = vadd.f32 %v3744_v14, %v3523_v30  ;;  %v3939_v0 = vmax.f32 %v3903_v54, 0.0 }
 0x207   : > { %v3419_v26 = vpop.f32.mrf.mxu1  ;;  %v3773_v50 = vpop.f32.mrf.mxu0 }
 0x208   : > { %v3942_v63 = vmax.f32 %v3906_v29, 0.0  ;;  %v3866_v45 = vadd.f32 %v5370_v24, %v3528_v4  ;;  %v3526_v12 = vadd.f32 %v3419_v26, %v6939_v43  ;;  %v3904_v40 = vadd.f32 %v7011_v11, %v3861_v1 }
 0x209   : > { %v5319_v31 = vpop.f32.mrf.mxu1  ;;  %v5375_v46 = vpop.f32.mrf.mxu0 }
 0x20a   : > { %v4611_v2 = vpack.c.bf16 %v3942_v63, %v3941_v22  ;;  %v3864_v25 = vadd.f32 %v3757_v37, %v3526_v12  ;;  %v3529_v18 = vadd.f32 %v5319_v31, %v6942_v6  ;;  %v3940_v3 = vmax.f32 %v3904_v40, 0.0 }
 0x20b   : > { %v3422_v14 = vpop.f32.mrf.mxu1  ;;  %v3776_v49 = vpop.f32.mrf.mxu0  ;;  %v3909_v61 = vadd.f32 %v7011_v11, %v3866_v45 }
 0x20c   : > { %4677 = vst [vmem:[%s7025_s12 + $0x28] sm:$0xff] %v4611_v2   ;;  %v3867_v5 = vadd.f32 %v5371_v62, %v3529_v18  ;;  %v3527_v24 = vadd.f32 %v3422_v14, %v6945_v16  ;;  %v4606_v43 = vpack.c.bf16 %v3940_v3, %v3939_v0  ;;  %v3907_v33 = vadd.f32 %v7011_v11, %v3864_v25 }
 0x20d   : > { %v5322_v59 = vpop.f32.mrf.mxu1  ;;  %v5378_v10 = vpop.f32.mrf.mxu0  ;;  %v3945_v27 = vmax.f32 %v3909_v61, 0.0 }
 0x20e   : > { %v3910_v37 = vadd.f32 %v7011_v11, %v3867_v5  ;;  %v3865_v41 = vadd.f32 %v3760_v57, %v3527_v24  ;;  %v3532_v6 = vadd.f32 %v5322_v59, %v6948_v17  ;;  %4676 = vst [vmem:[%s7025_s12 + $0x20] sm:$0xff] %v4606_v43   ;;  %v3943_v30 = vmax.f32 %v3907_v33, 0.0 }
 0x20f   : > { %v3435_v13 = vpop.f32.mrf.mxu1  ;;  %v3789_v28 = vpop.f32.mrf.mxu0 }
 0x210   : > { %v3946_v9 = vmax.f32 %v3910_v37, 0.0  ;;  %v3908_v62 = vadd.f32 %v7011_v11, %v3865_v41  ;;  %v3530_v16 = vadd.f32 %v3435_v13, %v6951_v38  ;;  %v3870_v42 = vadd.f32 %v5374_v8, %v3532_v6 }
 0x211   : > { %v5323_v34 = vpop.f32.mrf.mxu1  ;;  %v5379_v44 = vpop.f32.mrf.mxu0 }
 0x212   : > { %v4621_v39 = vpack.c.bf16 %v3946_v9, %v3945_v27  ;;  %v3944_v29 = vmax.f32 %v3908_v62, 0.0  ;;  %v3868_v57 = vadd.f32 %v3773_v50, %v3530_v16  ;;  %v3533_v17 = vadd.f32 %v5323_v34, %v6954_v53 }
 0x213   : > { %v3438_v4 = vpop.f32.mrf.mxu1  ;;  %v3792_v54 = vpop.f32.mrf.mxu0  ;;  %v3913_v22 = vadd.f32 %v7011_v11, %v3870_v42 }
 0x214   : > { %4679 = vst [vmem:[%s7025_s12 + $0x38] sm:$0xff] %v4621_v39   ;;  %v4616_v1 = vpack.c.bf16 %v3944_v29, %v3943_v30  ;;  %v3531_v26 = vadd.f32 %v3438_v4, %v6957_v21  ;;  %v3871_v63 = vadd.f32 %v5375_v46, %v3533_v17  ;;  %v3911_v45 = vadd.f32 %v7011_v11, %v3868_v57 }
 0x215   : > { %v5326_v38 = vpop.f32.mrf.mxu1  ;;  %v5382_v8 = vpop.f32.mrf.mxu0  ;;  %v3949_v18 = vmax.f32 %v3913_v22, 0.0 }
 0x216   : > { %4678 = vst [vmem:[%s7025_s12 + $0x30] sm:$0xff] %v4616_v1   ;;  %v3869_v12 = vadd.f32 %v3776_v49, %v3531_v26  ;;  %v3536_v40 = vadd.f32 %v5326_v38, %v6960_v35  ;;  %v3914_v50 = vadd.f32 %v7011_v11, %v3871_v63  ;;  %v3947_v14 = vmax.f32 %v3911_v45, 0.0 }
 0x217   : > { %v3451_v53 = vpop.f32.mrf.mxu1  ;;  %v3805_v31 = vpop.f32.mrf.mxu0 }
 0x218   : > { %v3912_v2 = vadd.f32 %v7011_v11, %v3869_v12  ;;  %v3874_v25 = vadd.f32 %v5378_v10, %v3536_v40  ;;  %v3534_v21 = vadd.f32 %v3451_v53, %v6963_v15  ;;  %v3950_v46 = vmax.f32 %v3914_v50, 0.0 }
 0x219   : > { %v5327_v0 = vpop.f32.mrf.mxu1  ;;  %v5383_v3 = vpop.f32.mrf.mxu0 }
 0x21a   : > { %v3948_v61 = vmax.f32 %v3912_v2, 0.0  ;;  %v3537_v49 = vadd.f32 %v5327_v0, %v6966_v52  ;;  %v4631_v35 = vpack.c.bf16 %v3950_v46, %v3949_v18  ;;  %v3872_v5 = vadd.f32 %v3789_v28, %v3534_v21 }
 0x21b   : > { %v3454_v24 = vpop.f32.mrf.mxu1  ;;  %v3808_v43 = vpop.f32.mrf.mxu0  ;;  %v3917_v33 = vadd.f32 %v7011_v11, %v3874_v25 }
 0x21c   : > { %v4626_v59 = vpack.c.bf16 %v3948_v61, %v3947_v14  ;;  %v3875_v10 = vadd.f32 %v5379_v44, %v3537_v49  ;;  %4681 = vst [vmem:[%s7025_s12 + $0x48] sm:$0xff] %v4631_v35   ;;  %v3535_v15 = vadd.f32 %v3454_v24, %v6969_v60  ;;  %v3915_v52 = vadd.f32 %v7011_v11, %v3872_v5 }
 0x21d   : > { %v5330_v37 = vpop.f32.mrf.mxu1  ;;  %v5386_v41 = vpop.f32.mrf.mxu0  ;;  %v3953_v62 = vmax.f32 %v3917_v33, 0.0 }
 0x21e   : > { %4680 = vst [vmem:[%s7025_s12 + $0x40] sm:$0xff] %v4626_v59   ;;  %v3918_v6 = vadd.f32 %v7011_v11, %v3875_v10  ;;  %v3540_v13 = vadd.f32 %v5330_v37, %v6972_v51  ;;  %v3873_v27 = vadd.f32 %v3792_v54, %v3535_v15  ;;  %v3951_v57 = vmax.f32 %v3915_v52, 0.0 }
 0x21f   : > { %v3467_v28 = vpop.f32.mrf.mxu1  ;;  %v3821_v9 = vpop.f32.mrf.mxu0 }
 0x220   : > { %v3954_v16 = vmax.f32 %v3918_v6, 0.0  ;;  %v3878_v42 = vadd.f32 %v5382_v8, %v3540_v13  ;;  %v3538_v34 = vadd.f32 %v3467_v28, %v6975_v47  ;;  %v3916_v60 = vadd.f32 %v7011_v11, %v3873_v27 }
 0x221   : > { %v5331_v44 = vpop.f32.mrf.mxu1  ;;  %v5387_v51 = vpop.f32.mrf.mxu0 }
 0x222   : > { %v4641_v30 = vpack.c.bf16 %v3954_v16, %v3953_v62  ;;  %v3876_v39 = vadd.f32 %v3805_v31, %v3538_v34  ;;  %v3541_v29 = vadd.f32 %v5331_v44, %v6978_v55  ;;  %v3952_v17 = vmax.f32 %v3916_v60, 0.0 }
 0x223   : > { %v3470_v4 = vpop.f32.mrf.mxu1  ;;  %v3921_v54 = vadd.f32 %v7011_v11, %v3878_v42  ;;  %v3824_v45 = vpop.f32.mrf.mxu0 }
 0x224   : > { %4683 = vst [vmem:[%s7025_s12 + $0x58] sm:$0xff] %v4641_v30   ;;  %v3879_v1 = vadd.f32 %v5383_v3, %v3541_v29  ;;  %v3539_v26 = vadd.f32 %v3470_v4, %v6981_v20  ;;  %v4636_v22 = vpack.c.bf16 %v3952_v17, %v3951_v57  ;;  %v3919_v63 = vadd.f32 %v7011_v11, %v3876_v39 }
 0x225   : > { %v5334_v47 = vpop.f32.mrf.mxu1  ;;  %v3957_v40 = vmax.f32 %v3921_v54, 0.0  ;;  %v5390_v0 = vpop.f32.mrf.mxu0 }
 0x226   : > { %v3922_v38 = vadd.f32 %v7011_v11, %v3879_v1  ;;  %v3877_v8 = vadd.f32 %v3808_v43, %v3539_v26  ;;  %v3544_v55 = vadd.f32 %v5334_v47, %v6984_v7  ;;  %4682 = vst [vmem:[%s7025_s12 + $0x50] sm:$0xff] %v4636_v22   ;;  %v3955_v25 = vmax.f32 %v3919_v63, 0.0 }
 0x227   : > { %v3483_v12 = vpop.f32.mrf.mxu1  ;;  %v3837_v43 = vpop.f32.mrf.mxu0 }
 0x228   : > { %v3958_v50 = vmax.f32 %v3922_v38, 0.0  ;;  %v3920_v53 = vadd.f32 %v7011_v11, %v3877_v8  ;;  %v3542_v31 = vadd.f32 %v3483_v12, %v6987_v23  ;;  %v3882_v20 = vadd.f32 %v5386_v41, %v3544_v55 }
 0x229   : > { %v5335_v2 = vpop.f32.mrf.mxu1  ;;  %v5391_v27 = vpop.f32.mrf.mxu0 }
 0x22a   : > { %v4651_v21 = vpack.c.bf16 %v3958_v50, %v3957_v40  ;;  %v3956_v18 = vmax.f32 %v3920_v53, 0.0  ;;  %v3880_v46 = vadd.f32 %v3821_v9, %v3542_v31  ;;  %v3545_v7 = vadd.f32 %v5335_v2, %v6990_v48 }
 0x22b   : > { %v3486_v3 = vpop.f32.mrf.mxu1  ;;  %v3925_v49 = vadd.f32 %v7011_v11, %v3882_v20  ;;  %v3840_v60 = vpop.f32.mrf.mxu0 }
 0x22c   : > { %4685 = vst [vmem:[%s7025_s12 + $0x68] sm:$0xff] %v4651_v21   ;;  %v4646_v14 = vpack.c.bf16 %v3956_v18, %v3955_v25  ;;  %v3543_v61 = vadd.f32 %v3486_v3, %v6993_v58  ;;  %v3883_v35 = vadd.f32 %v5387_v51, %v3545_v7  ;;  %v3923_v23 = vadd.f32 %v7011_v11, %v3880_v46 }
 0x22d   : > { %v5338_v5 = vpop.f32.mrf.mxu1  ;;  %v3961_v37 = vmax.f32 %v3925_v49, 0.0 }
 0x22e   : > { %4684 = vst [vmem:[%s7025_s12 + $0x60] sm:$0xff] %v4646_v14   ;;  %v3881_v24 = vadd.f32 %v3824_v45, %v3543_v61  ;;  %v3548_v59 = vadd.f32 %v5338_v5, %v6996_v36  ;;  %v3926_v33 = vadd.f32 %v7011_v11, %v3883_v35  ;;  %v3959_v13 = vmax.f32 %v3923_v23, 0.0 }
 0x22f   : > { %v3499_v10 = vpop.f32.mrf.mxu1 }
 0x230   : > { %v3924_v48 = vadd.f32 %v7011_v11, %v3881_v24  ;;  %v3886_v15 = vadd.f32 %v5390_v0, %v3548_v59  ;;  %v3546_v58 = vadd.f32 %v3499_v10, %v6999_v32  ;;  %v3962_v41 = vmax.f32 %v3926_v33, 0.0 }
 0x231   : > { %v5339_v6 = vpop.f32.mrf.mxu1 }
 0x232   : > { %v3960_v52 = vmax.f32 %v3924_v48, 0.0  ;;  %v3549_v28 = vadd.f32 %v5339_v6, %v7002_v56  ;;  %v4661_v9 = vpack.c.bf16 %v3962_v41, %v3961_v37  ;;  %v3884_v36 = vadd.f32 %v3837_v43, %v3546_v58 }
 0x233   : > { %v3502_v62 = vpop.f32.mrf.mxu1  ;;  %v3929_v42 = vadd.f32 %v7011_v11, %v3886_v15 }
 0x234   : > { %v4656_v16 = vpack.c.bf16 %v3960_v52, %v3959_v13  ;;  %v3887_v34 = vadd.f32 %v5391_v27, %v3549_v28  ;;  %4687 = vst [vmem:[%s7025_s12 + $0x78] sm:$0xff] %v4661_v9   ;;  %v3547_v32 = vadd.f32 %v3502_v62, %v7005_v19  ;;  %v3927_v30 = vadd.f32 %v7011_v11, %v3884_v36 }
 0x235   : > { %v3965_v56 = vmax.f32 %v3929_v42, 0.0 }
 0x236   : > { %4686 = vst [vmem:[%s7025_s12 + $0x70] sm:$0xff] %v4656_v16   ;;  %v3930_v44 = vadd.f32 %v7011_v11, %v3887_v34  ;;  %v3885_v39 = vadd.f32 %v3840_v60, %v3547_v32  ;;  %v3963_v17 = vmax.f32 %v3927_v30, 0.0 }
 0x238   : > { %v3966_v29 = vmax.f32 %v3930_v44, 0.0  ;;  %v3928_v51 = vadd.f32 %v7011_v11, %v3885_v39 }
 0x23a   : > { %v4671_v57 = vpack.c.bf16 %v3966_v29, %v3965_v56  ;;  %v3964_v4 = vmax.f32 %v3928_v51, 0.0 }
 0x23c   : > { %4689 = vst [vmem:[%s7025_s12 + $0x88] sm:$0xff] %v4671_v57   ;;  %v4666_v54 = vpack.c.bf16 %v3964_v4, %v3963_v17 }
 0x23e   : > { %4688 = vst [vmem:[%s7025_s12 + $0x80] sm:$0xff] %v4666_v54  }
 0x23f PF: > { %s13_s14 = sadd.s32 1, %s5590_s14   ;;  %s7201_s12 = smov %s5586_s13 }
 0x240   : > { %p10_p5 = scmp.ge.s32.totalorder %s13_s14, 4   ;;  %s7202_s13 = smov %s7204_s15 }
 0x242   :  { %12 = sbr.rel (!%p10_p5) target bundleno = 2 (0x2), region = 70 }

// kernel: unet_encoder_forward.11
= control target key start
LH: loop header
LB: loop body
LE: loop exit
PB: predicated region body
PF: predicated region fallthrough
CT: control target
= control target key end

     0   :  { %s2989_s12 = smov 0   ;;  %s2991_s13 = smov 0   ;;  %s3651_s0 = inlined_call_operand.vmem [shape: bf16[2,1,102,128], index: 0, kind: input, shape index: {}]   ;;  %s3652_s1 = inlined_call_operand.vmem [shape: bf16[9,128,128], index: 1, kind: input, shape index: {}]   ;;  %s3653_s2 = inlined_call_operand.vmem [shape: f32[1,128], index: 2, kind: input, shape index: {}]   ;;  %s3654_s3 = inlined_call_operand.vmem [shape: bf16[2,1,80,128], index: 3, kind: output, shape index: {}]  }
   0x1   :  { %s2993_s14 = smov 0  }
   0x2 LB: > { %s25_s15 = sadd.s32 1, %s2961_s13  ;;  %p2085_p0 = scmp.ge.s32.totalorder %s2965_s14, 1  ;;  %s2965_s14 = sphi %s2993_s14, %s13_s14   ;;  %s2961_s13 = sphi %s2991_s13, %s3656_s13   ;;  %s2957_s12 = sphi %s2989_s12, %s3655_s12  }
   0x3   : > { %p27_p1 = scmp.ge.s32.totalorder %s25_s15, 2  ;;  %p157_p2 = scmp.lt.s32.totalorder %s2965_s14, 3 }
   0x5   : > { %s3658_s15 = smov (%p27_p1, %s25_s15), 0  ;;  %p158_p3 = pnand %p2085_p0, %p157_p2 }
   0x6   : > { %p189_p4 = scmp.lt.s32.totalorder (!%p158_p3), %s2957_s12, 1 }
   0x7   : > { %161 = sbr.rel (%p158_p3) target bundleno = 427 (0x1ab), region = 32 }
   0xc   : > { %v2848_v0 = vld [vmem:[%s3652_s1 + $0x78] sm:$0xff]   ;;  %v2967_v1 = vmov 0.0   ;;  %v2850_v3 = vld [vmem:[%s3652_s1 + $0x70] sm:$0xff]   ;;  %vm2968_vm0 = vmmov 0   ;;  %s3660_s12 = smov (!%p189_p4, %s2957_s12), 1  ;;  %v2852_v5 = vld [vmem:[%s3652_s1 + $0x68] sm:$0xff]  }
   0xd   : > { %2480 = vmatprep.subr.bf16.mxu0 %v2967_v1  ;;  %2516 = vmatprep.subr.bf16.mxu1 %v2967_v1  ;;  %v2849_v2 = vld [vmem:[%s3652_s1 + $0x38] sm:$0xff]   ;;  %v2851_v4 = vld [vmem:[%s3652_s1 + $0x30] sm:$0xff]   ;;  %v2853_v6 = vld [vmem:[%s3652_s1 + $0x28] sm:$0xff]   ;;  %s2820_s28 = smul.u32 52, %s3660_s12  ;;  %vm280_vm1 = vsmask.f32 7424 }
   0xe   : > { %2481 = vmatpush3.bf16.msra.mxu0 %v2848_v0  ;;  %2496 = vmatprep.mubr.msk.bf16.mxu0 %vm2968_vm0, %v2967_v1  ;;  %v2854_v7 = vld [vmem:[%s3652_s1 + $0x60] sm:$0xff]   ;;  %v2856_v9 = vld [vmem:[%s3652_s1 + $0x58] sm:$0xff]   ;;  %v2858_v13 = vld [vmem:[%s3652_s1 + $0x50] sm:$0xff]   ;;  %vm598_vm2 = vcmask 1046528   ;;  %vm970_vm3 = vsmask.f32 6400 }
   0xf   : > { %2517 = vmatpush3.bf16.msra.mxu1 %v2849_v2  ;;  %2482 = vmatprep.subr.bf16.mxu0 %v2967_v1  ;;  %v2855_v8 = vld [vmem:[%s3652_s1 + $0x20] sm:$0xff]   ;;  %s3049_s8 = scalar_lea.vmem %s3651_s0, %s2820_s28  ;;  %v2857_v10 = vld [vmem:[%s3652_s1 + $0x18] sm:$0xff]   ;;  %v2859_v16 = vld [vmem:[%s3652_s1 + $0x10] sm:$0xff]   ;;  %vm1181_vm4 = vcmask 1045504   ;;  %vm1553_vm5 = vsmask.f32 5376 }
  0x10   : > { %2518 = vmatprep.subr.bf16.mxu1 %v2967_v1  ;;  %2532 = vmatprep.mubr.msk.bf16.mxu1 %vm2968_vm0, %v2967_v1  ;;  %v208_v11 = vld [vmem:[%s3049_s8] sm:$0xf]  ;;  %v3061_v12 = vld [vmem:[%s3049_s8 + $0x4] sm:$0xf]  ;;  %v3068_v15 = vld [vmem:[%s3049_s8 + $0x8] sm:$0xff]   ;;  %vm1764_vm6 = vcmask 1044480  }
  0x11   : > { %v2104_v14 = vcombine.low %v208_v11, %v3061_v12  ;;  %v2860_v18 = vld [vmem:[%s3652_s1 + $0x48] sm:$0xff]   ;;  %v289_v21 = vshll.u32 %v3068_v15, 16  ;;  %v2862_v23 = vld [vmem:[%s3652_s1 + $0x40] sm:$0xff]   ;;  %v3091_v27 = vld [vmem:[%s3049_s8 + $0x10] sm:$0xff]   ;;  %v293_v30 = vshrl.u32 %v3068_v15, 16  ;;  %s2821_s5 = smul.u32 40, %s3660_s12 }
  0x12   : > { %2483 = vmatpush3.bf16.msra.mxu0 %v2850_v3  ;;  %v2861_v22 = vld [vmem:[%s3652_s1 + $0x8] sm:$0xff]   ;;  %v2863_v24 = vld [vmem:[%s3652_s1] sm:$0xff]   ;;  %v2866_v28 = vld [vmem:[%s3652_s1 + $0xb8] sm:$0xff]   ;;  %v297_v31 = vshll.u32 %v3091_v27, 16  ;;  %v301_v41 = vshrl.u32 %v3091_v27, 16 }
  0x13   : > { %2519 = vmatpush3.bf16.msra.mxu1 %v2851_v4  ;;  %2484 = vmatprep.subr.bf16.mxu0 %v2967_v1  ;;  %v284_v17 = vshll.u32 %v2104_v14, 16  ;;  %v282_v19 = vshrl.u32 %v2104_v14, 16  ;;  %v291_v26 = vrot.slane %v289_v21, 1  ;;  %v2869_v32 = vld [vmem:[%s3652_s1 + $0xf8] sm:$0xff]   ;;  %v2867_v34 = vld [vmem:[%s3652_s1 + $0xb0] sm:$0xff]   ;;  %v2870_v40 = vld [vmem:[%s3652_s1 + $0xa8] sm:$0xff]   ;;  %s3622_s7 = scalar_lea.vmem %s3654_s3, %s2821_s5 }
  0x14   : > { %2520 = vmatprep.subr.bf16.mxu1 %v2967_v1  ;;  %v3107_v33 = vld [vmem:[%s3049_s8 + $0x18] sm:$0xff]   ;;  %v299_v36 = vrot.slane %v297_v31, 1  ;;  %v2871_v37 = vld [vmem:[%s3652_s1 + $0xf0] sm:$0xff]   ;;  %v2874_v42 = vld [vmem:[%s3652_s1 + $0xe8] sm:$0xff]   ;;  %v602_v21 = vrot.slane %v3091_v27, 1 }
  0x15   : > { %v286_v20 = vrot.slane %v284_v17, 1  ;;  %v295_v35 = vor.u32 %v293_v30, %v291_v26  ;;  %v305_v38 = vshll.u32 %v3107_v33, 16  ;;  %v2873_v44 = vld [vmem:[%s3652_s1 + $0xa0] sm:$0xff]   ;;  %v2875_v48 = vld [vmem:[%s3652_s1 + $0x98] sm:$0xff]   ;;  %v309_v50 = vshrl.u32 %v3107_v33, 16  ;;  %v2879_v56 = vld [vmem:[%s3652_s1 + $0x90] sm:$0xff]  }
  0x16   : > { %2485 = vmatpush3.bf16.msra.mxu0 %v2852_v5  ;;  %v3136_v45 = vld [vmem:[%s3049_s8 + $0x20] sm:$0xff]   ;;  %v303_v46 = vor.u32 %v301_v41, %v299_v36  ;;  %v2878_v52 = vld [vmem:[%s3652_s1 + $0xd8] sm:$0xff]   ;;  %v3159_v53 = vld [vmem:[%s3049_s8 + $0x28] ss:$0 sps:$4 sm:$0x11]  }
  0x17   : > { %2521 = vmatpush3.bf16.msra.mxu1 %v2853_v6  ;;  %2486 = vmatprep.subr.bf16.mxu0 %v2967_v1  ;;  %v287_v25 = vor.u32 %v286_v20, %v282_v19  ;;  %v300_v39 = vsel %vm280_vm1, %v295_v35, %v299_v36  ;;  %v307_v43 = vrot.slane %v305_v38, 1  ;;  %v2876_v47 = vld [vmem:[%s3652_s1 + $0xe0] sm:$0xff]   ;;  %v313_v51 = vshll.u32 %v3136_v45, 16  ;;  %v2880_v57 = vld [vmem:[%s3652_s1 + $0xd0] sm:$0xff]   ;;  %v2881_v61 = vld [vmem:[%s3652_s1 + $0x88] sm:$0xff]  }
  0x18   : > { %2522 = vmatprep.subr.bf16.mxu1 %v2967_v1  ;;  %v317_v59 = vshrl.u32 %v3136_v45, 16  ;;  %v321_v60 = vshll.u32 %v3159_v53, 16  ;;  %v2883_v62 = vld [vmem:[%s3652_s1 + $0xc8] sm:$0xff]   ;;  %v2884_v63 = vld [vmem:[%s3652_s1 + $0x80] sm:$0xff]   ;;  %v2889_v17 = vld [vmem:[%s3652_s1 + $0x138] sm:$0xff]   ;;  %v606_v38 = vrot.slane %v3136_v45, 1 }
  0x19   : > { %v292_v29 = vsel %vm280_vm1, %v287_v25, %v291_v26  ;;  %v308_v49 = vsel %vm280_vm1, %v303_v46, %v307_v43  ;;  %v311_v54 = vor.u32 %v309_v50, %v307_v43  ;;  %v315_v55 = vrot.slane %v313_v51, 1  ;;  %v2885_v3 = vld [vmem:[%s3652_s1 + $0xc0] sm:$0xff]   ;;  %v3201_v6 = vld [vmem:[%s3049_s8 + $0x8] sm:$0xf]  ;;  %v3228_v19 = vld [vmem:[%s3049_s8 + $0x14] sm:$0xff]  }
  0x1a   : > { %2487 = vmatpush3.bf16.msra.mxu0 %v2854_v7  ;;  %v323_v2 = vrot.slane %v321_v60, 1  ;;  %v577_v4 = vld [vmem:[%s3049_s8] sm:$0xe]  ;;  %v746_v5 = vld [vmem:[%s3049_s8 + $0x4] sm:$0xe]  ;;  %v2890_v20 = vld [vmem:[%s3652_s1 + $0x130] sm:$0xff]  }
  0x1b   : > { %2523 = vmatpush3.bf16.msra.mxu1 %v2855_v8  ;;  %2488 = vmatprep.subr.bf16.mxu0 %v2967_v1  ;;  %v316_v58 = vsel %vm280_vm1, %v311_v54, %v315_v55  ;;  %v319_v0 = vor.u32 %v317_v59, %v315_v55  ;;  %v2142_v8 = vcombine.low %v577_v4, %v3061_v12  ;;  %v600_v12 = vrot.slane %v3068_v15, 1  ;;  %v2893_v25 = vld [vmem:[%s3652_s1 + $0x128] sm:$0xff]   ;;  %v2896_v30 = vld [vmem:[%s3652_s1 + $0x120] sm:$0xff]   ;;  %v2903_v41 = vld [vmem:[%s3652_s1 + $0x150] sm:$0xff]  }
  0x1c   : > { %2524 = vmatprep.subr.bf16.mxu1 %v2967_v1  ;;  %v3281_v36 = vld [vmem:[%s3049_s8 + $0x24] sm:$0xff]   ;;  %v2905_v43 = vld [vmem:[%s3049_s8 + $0x2c] ss:$0 sps:$4 sm:$0x11]  }
  0x1d   : > { %v324_v7 = vsel %vm280_vm1, %v319_v0, %v323_v2  ;;  %v599_v11 = vrot.slane %v2142_v8, 1  ;;  %v2906_v46 = vld [vmem:[%s3652_s1 + $0x148] sm:$0xff]   ;;  %v2908_v54 = vld [vmem:[%s3652_s1 + $0x140] sm:$0xff]   ;;  %v989_v2 = vshrl.u32 %v3228_v19, 16 }
  0x1e   : > { %2489 = vmatpush3.bf16.msra.mxu0 %v2856_v9  ;;  %v3207_v9 = vcombine.low %v746_v5, %v3201_v6  ;;  %v1160_v55 = vld [vmem:[%s3049_s8 + $0x4] sm:$0xc] }
  0x1f   : > { %2525 = vmatpush3.bf16.msra.mxu1 %v2857_v10  ;;  %2490 = vmatprep.subr.bf16.mxu0 %v2967_v1  ;;  %v3210_v10 = vld [vmem:[%s3049_s8 + $0xc] sm:$0xff]   ;;  %v991_v8 = vrot.slane %v989_v2, 1 }
  0x20   : > { %2526 = vmatprep.subr.bf16.mxu1 %v2967_v1  ;;  %v980_v50 = vshrl.u32 %v3210_v10, 16  ;;  %v983_v51 = vshll.u32 %v3210_v10, 16  ;;  %v1183_v5 = vrot.slane %v3210_v10, 2 }
  0x22   : > { %2491 = vmatpush3.bf16.msra.mxu0 %v2858_v13  ;;  %v802_v13 = vrot.slane %v3207_v9, 1  ;;  %v982_v59 = vrot.slane %v980_v50, 1  ;;  %v985_v60 = vrot.slane %v983_v51, 2  ;;  %v3426_v51 = vld [vmem:[%s3049_s8 + $0x10] sm:$0xff]  }
  0x23   : > { %2527 = vmatpush3.bf16.msra.mxu1 %v2859_v16  ;;  %2492 = vmatprep.subr.bf16.mxu0 %v2967_v1  ;;  %v601_v16 = vsel %vm598_vm2, %v599_v11, %v600_v12 }
  0x24   : > { %2528 = vmatprep.subr.bf16.mxu1 %v2967_v1  ;;  %v986_v0 = vor.u32 %v985_v60, %v982_v59  ;;  %v1566_v59 = vshll.u32 %v3426_v51, 16  ;;  %v2926_v60 = vld [vmem:[%s3652_s1 + $0x1c0] sm:$0xff]  }
  0x26   : > { %2493 = vmatpush3.bf16.msra.mxu0 %v2860_v18 }
  0x27   : > { %2529 = vmatpush3.bf16.msra.mxu1 %v2861_v22  ;;  %2494 = vmatprep.subr.bf16.mxu0 %v2967_v1  ;;  %v805_v22 = vrot.slane %v3228_v19, 1 }
  0x28   : > { %2530 = vmatprep.subr.bf16.mxu1 %v2967_v1 }
  0x2a   : > { %2495 = vmatpush3.bf16.msra.mxu0 %v2862_v23  ;;  %v2894_v23 = vld [vmem:[%s3652_s1 + $0x170] sm:$0xff]  }
  0x2b   : > { %2531 = vmatpush3.bf16.msra.mxu1 %v2863_v24  ;;  %2552 = vmatprep.subr.bf16.mxu0 %v2967_v1  ;;  %v603_v24 = vsel %vm598_vm2, %v600_v12, %v602_v21  ;;  %v2912_v12 = vld [vmem:[%s3652_s1 + $0x1f8] sm:$0xff]  }
  0x2c   : > { %2588 = vmatprep.subr.bf16.mxu1 %v2967_v1 }
  0x2d   : > { %2497 = vmatmul.mubr.bf16.vlgmr.msra.gmra.mxu0 %v292_v29  ;;  %v604_v29 = vrot.slane %v3107_v33, 1 }
  0x2e   : > { %2533 = vmatmul.mubr.bf16.vlgmr.msra.gmra.mxu1 %v2104_v14  ;;  %2553 = vmatpush3.bf16.msra.mxu0 %v2866_v28  ;;  %v803_v14 = vrot.slane %v3210_v10, 1  ;;  %v2897_v28 = vld [vmem:[%s3652_s1 + $0x168] sm:$0xff]   ;;  %v2911_v10 = vld [vmem:[%s3652_s1 + $0x1b0] sm:$0xff]  }
  0x2f   : > { %2554 = vmatprep.subr.bf16.mxu0 %v2967_v1  ;;  %2500 = vmatprep.mubr.msk.bf16.mxu0 %vm2968_vm0, %v2967_v1 }
  0x30   : > { %2536 = vmatprep.mubr.msk.bf16.mxu1 %vm2968_vm0, %v2967_v1  ;;  %2589 = vmatpush3.bf16.msra.mxu1 %v2869_v32  ;;  %v804_v18 = vsel %vm598_vm2, %v802_v13, %v803_v14  ;;  %v806_v26 = vsel %vm598_vm2, %v803_v14, %v805_v22  ;;  %v2899_v32 = vld [vmem:[%s3652_s1 + $0x160] sm:$0xff]  }
  0x31   : > { %2590 = vmatprep.subr.bf16.mxu1 %v2967_v1 }
  0x32   : > { %2555 = vmatpush3.bf16.msra.mxu0 %v2867_v34  ;;  %v2898_v34 = vld [vmem:[%s3652_s1 + $0x118] sm:$0xff]  }
  0x33   : > { %2556 = vmatprep.subr.bf16.mxu0 %v2967_v1 }
  0x34   : > { %2591 = vmatpush3.bf16.msra.mxu1 %v2871_v37  ;;  %v2901_v37 = vld [vmem:[%s3652_s1 + $0x158] sm:$0xff]  }
  0x35   : > { %2501 = vmatmul.mubr.bf16.gmra.mxu0 %v300_v39  ;;  %2592 = vmatprep.subr.bf16.mxu1 %v2967_v1  ;;  %v2902_v39 = vld [vmem:[%s3652_s1 + $0x110] sm:$0xff]  }
  0x36   : > { %2537 = vmatmul.mubr.bf16.gmra.mxu1 %v3068_v15  ;;  %2557 = vmatpush3.bf16.msra.mxu0 %v2870_v40  ;;  %v2892_v15 = vld [vmem:[%s3652_s1 + $0x178] sm:$0xff]   ;;  %v809_v40 = vrot.slane %v3281_v36, 1 }
  0x37   : > { %2504 = vmatprep.mubr.msk.bf16.mxu0 %vm2968_vm0, %v2967_v1  ;;  %2540 = vmatprep.mubr.msk.bf16.mxu1 %vm2968_vm0, %v2967_v1 }
  0x38   : > { %2558 = vmatprep.subr.bf16.mxu0 %v2967_v1  ;;  %2593 = vmatpush3.bf16.msra.mxu1 %v2874_v42  ;;  %v607_v42 = vsel %vm598_vm2, %v604_v29, %v606_v38 }
  0x39   : > { %2594 = vmatprep.subr.bf16.mxu1 %v2967_v1 }
  0x3a   : > { %2559 = vmatpush3.bf16.msra.mxu0 %v2873_v44 }
  0x3b   : > { %2560 = vmatprep.subr.bf16.mxu0 %v2967_v1 }
  0x3c   : > { %2595 = vmatpush3.bf16.msra.mxu1 %v2876_v47  ;;  %v608_v47 = vrot.slane %v3159_v53, 1  ;;  %v2907_v53 = vld [vmem:[%s3652_s1 + $0x100] sm:$0xff]  }
  0x3d   : > { %2505 = vmatmul.mubr.bf16.gmra.mxu0 %v308_v49  ;;  %2596 = vmatprep.subr.bf16.mxu1 %v2967_v1  ;;  %v975_v49 = vshll.u32 %v3207_v9, 16 }
  0x3e   : > { %2541 = vmatmul.mubr.bf16.gmra.mxu1 %v3091_v27  ;;  %2561 = vmatpush3.bf16.msra.mxu0 %v2875_v48  ;;  %v3254_v27 = vld [vmem:[%s3049_s8 + $0x1c] sm:$0xff]   ;;  %v972_v48 = vshrl.u32 %v3207_v9, 16 }
  0x3f   : > { %2508 = vmatprep.mubr.msk.bf16.mxu0 %vm2968_vm0, %v2967_v1  ;;  %2544 = vmatprep.mubr.msk.bf16.mxu1 %vm2968_vm0, %v2967_v1  ;;  %v807_v31 = vrot.slane %v3254_v27, 1  ;;  %v998_v14 = vshrl.u32 %v3254_v27, 16 }
  0x40   : > { %2562 = vmatprep.subr.bf16.mxu0 %v2967_v1  ;;  %2597 = vmatpush3.bf16.msra.mxu1 %v2878_v52  ;;  %v811_v52 = vrot.slane %v2905_v43, 1  ;;  %v2921_v43 = vld [vmem:[%s3652_s1 + $0x1d0] sm:$0xff]  }
  0x41   : > { %2598 = vmatprep.subr.bf16.mxu1 %v2967_v1  ;;  %v808_v35 = vsel %vm598_vm2, %v805_v22, %v807_v31  ;;  %v810_v44 = vsel %vm598_vm2, %v807_v31, %v809_v40 }
  0x42   : > { %2563 = vmatpush3.bf16.msra.mxu0 %v2879_v56  ;;  %v609_v56 = vsel %vm598_vm2, %v606_v38, %v608_v47 }
  0x43   : > { %2564 = vmatprep.subr.bf16.mxu0 %v2967_v1 }
  0x44   : > { %2599 = vmatpush3.bf16.msra.mxu1 %v2880_v57  ;;  %v974_v57 = vrot.slane %v972_v48, 1 }
  0x45   : > { %2509 = vmatmul.mubr.bf16.gmra.mxu0 %v316_v58  ;;  %2600 = vmatprep.subr.bf16.mxu1 %v2967_v1  ;;  %v977_v58 = vrot.slane %v975_v49, 2 }
  0x46   : > { %2545 = vmatmul.mubr.bf16.gmra.mxu1 %v3107_v33  ;;  %2512 = vmatprep.mubr.msk.bf16.mxu0 %vm2968_vm0, %v2967_v1  ;;  %v605_v33 = vsel %vm598_vm2, %v602_v21, %v604_v29  ;;  %v1000_v21 = vrot.slane %v998_v14, 1  ;;  %v1187_v29 = vrot.slane %v3254_v27, 2 }
  0x47   : > { %2548 = vmatprep.mubr.msk.bf16.mxu1 %vm2968_vm0, %v2967_v1  ;;  %2565 = vmatpush3.bf16.msra.mxu0 %v2881_v61  ;;  %v812_v61 = vsel %vm598_vm2, %v809_v40, %v811_v52  ;;  %v2924_v52 = vld [vmem:[%s3652_s1 + $0x1c8] sm:$0xff]  }
  0x48   : > { %2601 = vmatpush3.bf16.msra.mxu1 %v2883_v62  ;;  %2566 = vmatprep.subr.bf16.mxu0 %v2967_v1  ;;  %v2222_v62 = vcombine.low %v1160_v55, %v3201_v6  ;;  %v2925_v55 = vld [vmem:[%s3652_s1 + $0x180] sm:$0xff]  }
  0x49   : > { %2602 = vmatprep.subr.bf16.mxu1 %v2967_v1 }
  0x4a   : > { %v1182_v4 = vrot.slane %v2222_v62, 2 }
  0x4b   : > { %2567 = vmatpush3.bf16.msra.mxu0 %v2884_v63  ;;  %v978_v63 = vor.u32 %v977_v58, %v974_v57  ;;  %v1563_v58 = vshrl.u32 %v3426_v51, 16 }
  0x4c   : > { %2603 = vmatpush3.bf16.msra.mxu1 %v2885_v3  ;;  %2624 = vmatprep.subr.bf16.mxu0 %v2967_v1  ;;  %v992_v3 = vshll.u32 %v3228_v19, 16  ;;  %v1184_v11 = vsel %vm1181_vm4, %v1182_v4, %v1183_v5  ;;  %v3449_v4 = vld [vmem:[%s3049_s8 + $0x18] sm:$0xff]  }
  0x4d   : > { %2513 = vmatmul.mubr.bf16.gmra.mxu0 %v324_v7  ;;  %2660 = vmatprep.subr.bf16.mxu1 %v2967_v1  ;;  %v987_v6 = vsel %vm970_vm3, %v978_v63, %v986_v0  ;;  %v2910_v7 = vld [vmem:[%s3652_s1 + $0x1b8] sm:$0xff]   ;;  %v1565_v2 = vrot.slane %v1563_v58, 2 }
  0x4e   : > { %2549 = vmatmul.mubr.bf16.gmra.mxu1 %v3136_v45  ;;  %2568 = vmatprep.mubr.msk.bf16.mxu0 %vm2968_vm0, %v2967_v1  ;;  %v2904_v45 = vld [vmem:[%s3652_s1 + $0x108] sm:$0xff]   ;;  %v994_v9 = vrot.slane %v992_v3, 2  ;;  %v1568_v3 = vrot.slane %v1566_v59, 3 }
  0x4f   : > { %2604 = vmatprep.mubr.msk.bf16.mxu1 %vm2968_vm0, %v2967_v1 }
  0x50   : > { %v995_v13 = vor.u32 %v994_v9, %v991_v8  ;;  %v1569_v8 = vor.u32 %v1568_v3, %v1565_v2  ;;  %v1572_v9 = vshrl.u32 %v3449_v4, 16 }
  0x52   : > { %v1574_v14 = vrot.slane %v1572_v9, 2 }
  0x55   : > { %2569 = vmatmul.mubr.bf16.vlgmr.msra.gmra.mxu0 %v601_v16  ;;  %v1001_v16 = vshll.u32 %v3254_v27, 16 }
  0x56   : > { %2605 = vmatmul.mubr.bf16.vlgmr.msra.gmra.mxu1 %v804_v18  ;;  %2625 = vmatpush3.bf16.msra.mxu0 %v2889_v17  ;;  %v1185_v17 = vrot.slane %v3228_v19, 2  ;;  %v2914_v18 = vld [vmem:[%s3652_s1 + $0x1f0] sm:$0xff]  }
  0x57   : > { %2626 = vmatprep.subr.bf16.mxu0 %v2967_v1  ;;  %2572 = vmatprep.mubr.msk.bf16.mxu0 %vm2968_vm0, %v2967_v1  ;;  %v1003_v22 = vrot.slane %v1001_v16, 2 }
  0x58   : > { %2608 = vmatprep.mubr.msk.bf16.mxu1 %vm2968_vm0, %v2967_v1  ;;  %2661 = vmatpush3.bf16.msra.mxu1 %v2892_v15  ;;  %v996_v15 = vsel %vm970_vm3, %v986_v0, %v995_v13  ;;  %v1186_v19 = vsel %vm1181_vm4, %v1183_v5, %v1185_v17  ;;  %v1188_v27 = vsel %vm1181_vm4, %v1185_v17, %v1187_v29  ;;  %v3466_v17 = vld [vmem:[%s3049_s8 + $0x20] sm:$0xff]  }
  0x59   : > { %2662 = vmatprep.subr.bf16.mxu1 %v2967_v1 }
  0x5a   : > { %2627 = vmatpush3.bf16.msra.mxu0 %v2890_v20  ;;  %v2913_v20 = vld [vmem:[%s3652_s1 + $0x1a8] sm:$0xff]  }
  0x5b   : > { %2628 = vmatprep.subr.bf16.mxu0 %v2967_v1 }
  0x5c   : > { %2663 = vmatpush3.bf16.msra.mxu1 %v2894_v23  ;;  %v2916_v23 = vld [vmem:[%s3652_s1 + $0x1e8] sm:$0xff]  }
  0x5d   : > { %2573 = vmatmul.mubr.bf16.gmra.mxu0 %v603_v24  ;;  %2664 = vmatprep.subr.bf16.mxu1 %v2967_v1  ;;  %v1004_v24 = vor.u32 %v1003_v22, %v1000_v21  ;;  %v1581_v21 = vshrl.u32 %v3466_v17, 16  ;;  %v1584_v22 = vshll.u32 %v3466_v17, 16 }
  0x5e   : > { %2609 = vmatmul.mubr.bf16.gmra.mxu1 %v806_v26  ;;  %2629 = vmatpush3.bf16.msra.mxu0 %v2893_v25  ;;  %v2915_v25 = vld [vmem:[%s3652_s1 + $0x1a0] sm:$0xff]   ;;  %v1007_v26 = vshrl.u32 %v3281_v36, 16 }
  0x5f   : > { %2576 = vmatprep.mubr.msk.bf16.mxu0 %vm2968_vm0, %v2967_v1  ;;  %2612 = vmatprep.mubr.msk.bf16.mxu1 %vm2968_vm0, %v2967_v1  ;;  %v1005_v31 = vsel %vm970_vm3, %v995_v13, %v1004_v24 }
  0x60   : > { %2630 = vmatprep.subr.bf16.mxu0 %v2967_v1  ;;  %2665 = vmatpush3.bf16.msra.mxu1 %v2897_v28  ;;  %v1010_v28 = vshll.u32 %v3281_v36, 16 }
  0x61   : > { %2666 = vmatprep.subr.bf16.mxu1 %v2967_v1 }
  0x62   : > { %2631 = vmatpush3.bf16.msra.mxu0 %v2896_v30  ;;  %v2918_v30 = vld [vmem:[%s3652_s1 + $0x1e0] sm:$0xff]  }
  0x63   : > { %2632 = vmatprep.subr.bf16.mxu0 %v2967_v1 }
  0x64   : > { %2667 = vmatpush3.bf16.msra.mxu1 %v2899_v32  ;;  %v2917_v32 = vld [vmem:[%s3652_s1 + $0x198] sm:$0xff]  }
  0x65   : > { %2577 = vmatmul.mubr.bf16.gmra.mxu0 %v605_v33  ;;  %2668 = vmatprep.subr.bf16.mxu1 %v2967_v1  ;;  %v1009_v33 = vrot.slane %v1007_v26, 1  ;;  %v1586_v26 = vrot.slane %v1584_v22, 3 }
  0x66   : > { %2613 = vmatmul.mubr.bf16.gmra.mxu1 %v808_v35  ;;  %2633 = vmatpush3.bf16.msra.mxu0 %v2898_v34  ;;  %v1012_v34 = vrot.slane %v1010_v28, 2  ;;  %v2923_v35 = vld [vmem:[%s3049_s8 + $0x2c] ss:$0 sps:$4 sm:$0x33]  }
  0x67   : > { %2580 = vmatprep.mubr.msk.bf16.mxu0 %vm2968_vm0, %v2967_v1  ;;  %2616 = vmatprep.mubr.msk.bf16.mxu1 %vm2968_vm0, %v2967_v1  ;;  %v1016_v40 = vshrl.u32 %v2923_v35, 16  ;;  %v3487_v28 = vld [vmem:[%s3049_s8 + $0x28] sm:$0xff]  }
  0x68   : > { %2634 = vmatprep.subr.bf16.mxu0 %v2967_v1  ;;  %2669 = vmatpush3.bf16.msra.mxu1 %v2901_v37  ;;  %v2919_v37 = vld [vmem:[%s3652_s1 + $0x1d8] sm:$0xff]   ;;  %v1013_v38 = vor.u32 %v1012_v34, %v1009_v33  ;;  %v1593_v33 = vshll.u32 %v3487_v28, 16 }
  0x69   : > { %2670 = vmatprep.subr.bf16.mxu1 %v2967_v1  ;;  %v1018_v47 = vrot.slane %v1016_v40, 1  ;;  %v1392_v40 = vrot.slane %v3487_v28, 2 }
  0x6a   : > { %2635 = vmatpush3.bf16.msra.mxu0 %v2902_v39  ;;  %v2920_v39 = vld [vmem:[%s3652_s1 + $0x190] sm:$0xff]  }
  0x6b   : > { %2636 = vmatprep.subr.bf16.mxu0 %v2967_v1 }
  0x6c   : > { %2671 = vmatpush3.bf16.msra.mxu1 %v2903_v41  ;;  %v1019_v41 = vshll.u32 %v2923_v35, 16 }
  0x6d   : > { %2581 = vmatmul.mubr.bf16.gmra.mxu0 %v607_v42  ;;  %2672 = vmatprep.subr.bf16.mxu1 %v2967_v1  ;;  %v1189_v42 = vrot.slane %v3281_v36, 2  ;;  %v2922_v36 = vld [vmem:[%s3652_s1 + $0x188] sm:$0xff]  }
  0x6e   : > { %2617 = vmatmul.mubr.bf16.gmra.mxu1 %v810_v44  ;;  %2584 = vmatprep.mubr.msk.bf16.mxu0 %vm2968_vm0, %v2967_v1  ;;  %v1329_v44 = vld [vmem:[%s3049_s8 + $0x8] sm:$0xc]  ;;  %v1021_v48 = vrot.slane %v1019_v41, 2  ;;  %v2937_v41 = vld [vmem:[%s3652_s1 + $0x210] sm:$0xff]  }
  0x6f   : > { %2620 = vmatprep.mubr.msk.bf16.mxu1 %vm2968_vm0, %v2967_v1  ;;  %2637 = vmatpush3.bf16.msra.mxu0 %v2904_v45  ;;  %v3415_v45 = vld [vmem:[%s3049_s8 + $0xc] sm:$0xf]  ;;  %v1190_v49 = vsel %vm1181_vm4, %v1187_v29, %v1189_v42  ;;  %v1390_v29 = vrot.slane %v3466_v17, 2 }
  0x70   : > { %2673 = vmatpush3.bf16.msra.mxu1 %v2906_v46  ;;  %2638 = vmatprep.subr.bf16.mxu0 %v2967_v1  ;;  %v1014_v46 = vsel %vm970_vm3, %v1004_v24, %v1013_v38  ;;  %v2247_v50 = vcombine.low %v1329_v44, %v3415_v45 }
  0x71   : > { %2674 = vmatprep.subr.bf16.mxu1 %v2967_v1 }
  0x72   : > { %v1558_v57 = vshll.u32 %v2247_v50, 16  ;;  %v1385_v5 = vrot.slane %v2247_v50, 2 }
  0x73   : > { %2639 = vmatpush3.bf16.msra.mxu0 %v2907_v53  ;;  %v1022_v53 = vor.u32 %v1021_v48, %v1018_v47  ;;  %v2939_v47 = vld [vmem:[%s3049_s8 + $0x30] ss:$0 sps:$4 sm:$0x33]  }
  0x74   : > { %2675 = vmatpush3.bf16.msra.mxu1 %v2908_v54  ;;  %2696 = vmatprep.subr.bf16.mxu0 %v2967_v1  ;;  %v1191_v54 = vrot.slane %v2923_v35, 2  ;;  %v1560_v0 = vrot.slane %v1558_v57, 3  ;;  %v2935_v35 = vld [vmem:[%s3652_s1 + $0x218] sm:$0xff]  }
  0x75   : > { %2585 = vmatmul.mubr.bf16.gmra.mxu0 %v609_v56  ;;  %2732 = vmatprep.subr.bf16.mxu1 %v2967_v1  ;;  %v1555_v56 = vshrl.u32 %v2247_v50, 16 }
  0x76   : > { %2621 = vmatmul.mubr.bf16.gmra.mxu1 %v812_v61  ;;  %2640 = vmatprep.mubr.msk.bf16.mxu0 %vm2968_vm0, %v2967_v1  ;;  %v1023_v61 = vsel %vm970_vm3, %v1013_v38, %v1022_v53  ;;  %v1192_v62 = vsel %vm1181_vm4, %v1189_v42, %v1191_v54  ;;  %v1595_v38 = vrot.slane %v1593_v33, 3  ;;  %v2941_v54 = vld [vmem:[%s3652_s1 + $0x200] sm:$0xff]  }
  0x77   : > { %2676 = vmatprep.mubr.msk.bf16.mxu1 %vm2968_vm0, %v2967_v1  ;;  %v1557_v63 = vrot.slane %v1555_v56, 2 }
  0x7d   : > { %2641 = vmatmul.mubr.bf16.vlgmr.msra.gmra.mxu0 %v987_v6  ;;  %v1386_v6 = vrot.slane %v3426_v51, 2 }
  0x7e   : > { %2677 = vmatmul.mubr.bf16.vlgmr.msra.gmra.mxu1 %v1184_v11  ;;  %2697 = vmatpush3.bf16.msra.mxu0 %v2910_v7  ;;  %v1561_v7 = vor.u32 %v1560_v0, %v1557_v63  ;;  %v1575_v11 = vshll.u32 %v3449_v4, 16  ;;  %v1768_v0 = vrot.slane %v3449_v4, 3 }
  0x7f   : > { %2698 = vmatprep.subr.bf16.mxu0 %v2967_v1  ;;  %2644 = vmatprep.mubr.msk.bf16.mxu0 %vm2968_vm0, %v2967_v1 }
  0x80   : > { %2680 = vmatprep.mubr.msk.bf16.mxu1 %vm2968_vm0, %v2967_v1  ;;  %2733 = vmatpush3.bf16.msra.mxu1 %v2912_v12  ;;  %v1387_v12 = vsel %vm1181_vm4, %v1385_v5, %v1386_v6  ;;  %v1570_v13 = vsel %vm1553_vm5, %v1561_v7, %v1569_v8  ;;  %v1577_v16 = vrot.slane %v1575_v11, 3 }
  0x81   : > { %2734 = vmatprep.subr.bf16.mxu1 %v2967_v1 }
  0x82   : > { %2699 = vmatpush3.bf16.msra.mxu0 %v2911_v10  ;;  %v2929_v10 = vld [vmem:[%s3652_s1 + $0x238] sm:$0xff]  }
  0x83   : > { %2700 = vmatprep.subr.bf16.mxu0 %v2967_v1 }
  0x84   : > { %2735 = vmatpush3.bf16.msra.mxu1 %v2914_v18  ;;  %v2930_v18 = vld [vmem:[%s3652_s1 + $0x230] sm:$0xff]  }
  0x85   : > { %2645 = vmatmul.mubr.bf16.gmra.mxu0 %v996_v15  ;;  %2736 = vmatprep.subr.bf16.mxu1 %v2967_v1  ;;  %v1388_v15 = vrot.slane %v3449_v4, 2 }
  0x86   : > { %2681 = vmatmul.mubr.bf16.gmra.mxu1 %v1186_v19  ;;  %2701 = vmatpush3.bf16.msra.mxu0 %v2913_v20  ;;  %v1578_v20 = vor.u32 %v1577_v16, %v1574_v14 }
  0x87   : > { %2648 = vmatprep.mubr.msk.bf16.mxu0 %vm2968_vm0, %v2967_v1  ;;  %2684 = vmatprep.mubr.msk.bf16.mxu1 %vm2968_vm0, %v2967_v1  ;;  %v1389_v19 = vsel %vm1181_vm4, %v1386_v6, %v1388_v15  ;;  %v1391_v34 = vsel %vm1181_vm4, %v1388_v15, %v1390_v29 }
  0x88   : > { %2702 = vmatprep.subr.bf16.mxu0 %v2967_v1  ;;  %2737 = vmatpush3.bf16.msra.mxu1 %v2916_v23  ;;  %v2932_v23 = vld [vmem:[%s3652_s1 + $0x228] sm:$0xff]   ;;  %v1579_v24 = vsel %vm1553_vm5, %v1569_v8, %v1578_v20 }
  0x89   : > { %2738 = vmatprep.subr.bf16.mxu1 %v2967_v1 }
  0x8a   : > { %2703 = vmatpush3.bf16.msra.mxu0 %v2915_v25  ;;  %v1583_v25 = vrot.slane %v1581_v21, 2 }
  0x8b   : > { %2704 = vmatprep.subr.bf16.mxu0 %v2967_v1 }
  0x8c   : > { %2739 = vmatpush3.bf16.msra.mxu1 %v2918_v30  ;;  %v2934_v30 = vld [vmem:[%s3652_s1 + $0x220] sm:$0xff]  }
  0x8d   : > { %2649 = vmatmul.mubr.bf16.gmra.mxu0 %v1005_v31  ;;  %2740 = vmatprep.subr.bf16.mxu1 %v2967_v1  ;;  %v1587_v31 = vor.u32 %v1586_v26, %v1583_v25 }
  0x8e   : > { %2685 = vmatmul.mubr.bf16.gmra.mxu1 %v1188_v27  ;;  %2705 = vmatpush3.bf16.msra.mxu0 %v2917_v32  ;;  %v1590_v32 = vshrl.u32 %v3487_v28, 16 }
  0x8f   : > { %2652 = vmatprep.mubr.msk.bf16.mxu0 %vm2968_vm0, %v2967_v1  ;;  %2688 = vmatprep.mubr.msk.bf16.mxu1 %vm2968_vm0, %v2967_v1  ;;  %v1588_v27 = vsel %vm1553_vm5, %v1578_v20, %v1587_v31 }
  0x90   : > { %2706 = vmatprep.subr.bf16.mxu0 %v2967_v1  ;;  %2741 = vmatpush3.bf16.msra.mxu1 %v2919_v37  ;;  %v1592_v37 = vrot.slane %v1590_v32, 2 }
  0x91   : > { %2742 = vmatprep.subr.bf16.mxu1 %v2967_v1 }
  0x92   : > { %2707 = vmatpush3.bf16.msra.mxu0 %v2920_v39  ;;  %v3509_v39 = vld [vmem:[%s3049_s8 + $0x30] ss:$0 sps:$4 sm:$0x77]   ;;  %v1596_v42 = vor.u32 %v1595_v38, %v1592_v37 }
  0x93   : > { %2708 = vmatprep.subr.bf16.mxu0 %v2967_v1  ;;  %v1602_v44 = vshll.u32 %v3509_v39, 16 }
  0x94   : > { %2743 = vmatpush3.bf16.msra.mxu1 %v2921_v43  ;;  %v1599_v43 = vshrl.u32 %v3509_v39, 16  ;;  %v1597_v48 = vsel %vm1553_vm5, %v1587_v31, %v1596_v42 }
  0x95   : > { %2653 = vmatmul.mubr.bf16.gmra.mxu0 %v1014_v46  ;;  %2744 = vmatprep.subr.bf16.mxu1 %v2967_v1  ;;  %v1393_v46 = vsel %vm1181_vm4, %v1390_v29, %v1392_v40  ;;  %v1604_v50 = vrot.slane %v1602_v44, 3 }
  0x96   : > { %2689 = vmatmul.mubr.bf16.gmra.mxu1 %v1190_v49  ;;  %2656 = vmatprep.mubr.msk.bf16.mxu0 %vm2968_vm0, %v2967_v1  ;;  %v2938_v49 = vld [vmem:[%s3652_s1 + $0x208] sm:$0xff]  }
  0x97   : > { %2692 = vmatprep.mubr.msk.bf16.mxu1 %vm2968_vm0, %v2967_v1  ;;  %2709 = vmatpush3.bf16.msra.mxu0 %v2922_v36  ;;  %v1601_v36 = vrot.slane %v1599_v43, 2 }
  0x98   : > { %2745 = vmatpush3.bf16.msra.mxu1 %v2924_v52  ;;  %2710 = vmatprep.subr.bf16.mxu0 %v2967_v1  ;;  %v1394_v52 = vrot.slane %v2939_v47, 2 }
  0x99   : > { %2746 = vmatprep.subr.bf16.mxu1 %v2967_v1  ;;  %v1605_v53 = vor.u32 %v1604_v50, %v1601_v36 }
  0x9a   : > { %v1395_v56 = vsel %vm1181_vm4, %v1392_v40, %v1394_v52 }
  0x9b   : > { %2711 = vmatpush3.bf16.msra.mxu0 %v2925_v55  ;;  %v1743_v55 = vld [vmem:[%s3049_s8 + $0x8] sm:$0x8]  ;;  %v1606_v58 = vsel %vm1553_vm5, %v1596_v42, %v1605_v53 }
  0x9c   : > { %2747 = vmatpush3.bf16.msra.mxu1 %v2926_v60  ;;  %2768 = vmatprep.subr.bf16.mxu0 %v2967_v1  ;;  %v2302_v57 = vcombine.low %v1743_v55, %v3415_v45  ;;  %v1766_v60 = vrot.slane %v3426_v51, 3  ;;  %v1772_v45 = vrot.slane %v3487_v28, 3  ;;  %v1774_v51 = vrot.slane %v3509_v39, 3 }
  0x9d   : > { %2657 = vmatmul.mubr.bf16.gmra.mxu0 %v1023_v61  ;;  %2804 = vmatprep.subr.bf16.mxu1 %v2967_v1  ;;  %v1770_v61 = vrot.slane %v3466_v17, 3 }
  0x9e   : > { %2693 = vmatmul.mubr.bf16.gmra.mxu1 %v1192_v62  ;;  %2712 = vmatprep.mubr.msk.bf16.mxu0 %vm2968_vm0, %v2967_v1  ;;  %v1765_v59 = vrot.slane %v2302_v57, 3  ;;  %v1769_v2 = vsel %vm1764_vm6, %v1766_v60, %v1768_v0  ;;  %v1775_v3 = vsel %vm1764_vm6, %v1772_v45, %v1774_v51 }
  0x9f   : > { %2748 = vmatprep.mubr.msk.bf16.mxu1 %vm2968_vm0, %v2967_v1  ;;  %v1773_v63 = vsel %vm1764_vm6, %v1770_v61, %v1772_v45  ;;  %v1771_v5 = vsel %vm1764_vm6, %v1768_v0, %v1770_v61 }
  0xa0   : > { %v1767_v62 = vsel %vm1764_vm6, %v1765_v59, %v1766_v60 }
  0xa5   : > { %2713 = vmatmul.mubr.bf16.vlgmr.msra.gmra.mxu0 %v1387_v12 }
  0xa6   : > { %2749 = vmatmul.mubr.bf16.vlgmr.msra.gmra.mxu1 %v1570_v13  ;;  %2769 = vmatpush3.bf16.msra.mxu0 %v2929_v10 }
  0xa7   : > { %2770 = vmatprep.subr.bf16.mxu0 %v2967_v1  ;;  %2716 = vmatprep.mubr.msk.bf16.mxu0 %vm2968_vm0, %v2967_v1 }
  0xa8   : > { %2752 = vmatprep.mubr.msk.bf16.mxu1 %vm2968_vm0, %v2967_v1  ;;  %2812 = vmatpush3.bf16.msra.mxu1 %v2929_v10 }
  0xa9   : > { %2805 = vmatprep.subr.bf16.mxu1 %v2967_v1 }
  0xaa   : > { %2771 = vmatpush3.bf16.msra.mxu0 %v2930_v18 }
  0xab   : > { %2772 = vmatprep.subr.bf16.mxu0 %v2967_v1 }
  0xac   : > { %2813 = vmatpush3.bf16.msra.mxu1 %v2930_v18 }
  0xad   : > { %2717 = vmatmul.mubr.bf16.gmra.mxu0 %v1389_v19  ;;  %2806 = vmatprep.subr.bf16.mxu1 %v2967_v1 }
  0xae   : > { %2753 = vmatmul.mubr.bf16.gmra.mxu1 %v1579_v24  ;;  %2773 = vmatpush3.bf16.msra.mxu0 %v2932_v23 }
  0xaf   : > { %2720 = vmatprep.mubr.msk.bf16.mxu0 %vm2968_vm0, %v2967_v1  ;;  %2756 = vmatprep.mubr.msk.bf16.mxu1 %vm2968_vm0, %v2967_v1 }
  0xb0   : > { %2774 = vmatprep.subr.bf16.mxu0 %v2967_v1  ;;  %2814 = vmatpush3.bf16.msra.mxu1 %v2932_v23 }
  0xb1   : > { %2807 = vmatprep.subr.bf16.mxu1 %v2967_v1 }
  0xb2   : > { %2775 = vmatpush3.bf16.msra.mxu0 %v2934_v30 }
  0xb3   : > { %2776 = vmatprep.subr.bf16.mxu0 %v2967_v1 }
  0xb4   : > { %2815 = vmatpush3.bf16.msra.mxu1 %v2934_v30 }
  0xb5   : > { %2721 = vmatmul.mubr.bf16.gmra.mxu0 %v1391_v34  ;;  %2808 = vmatprep.subr.bf16.mxu1 %v2967_v1 }
  0xb6   : > { %2757 = vmatmul.mubr.bf16.gmra.mxu1 %v1588_v27  ;;  %2777 = vmatpush3.bf16.msra.mxu0 %v2935_v35 }
  0xb7   : > { %2724 = vmatprep.mubr.msk.bf16.mxu0 %vm2968_vm0, %v2967_v1  ;;  %2760 = vmatprep.mubr.msk.bf16.mxu1 %vm2968_vm0, %v2967_v1 }
  0xb8   : > { %2816 = vmatpush3.bf16.msra.mxu1 %v2935_v35  ;;  %2778 = vmatprep.subr.bf16.mxu0 %v2967_v1 }
  0xb9   : > { %2809 = vmatprep.subr.bf16.mxu1 %v2967_v1 }
  0xba   : > { %2779 = vmatpush3.bf16.msra.mxu0 %v2937_v41 }
  0xbb   : > { %2780 = vmatprep.subr.bf16.mxu0 %v2967_v1 }
  0xbc   : > { %2817 = vmatpush3.bf16.msra.mxu1 %v2937_v41 }
  0xbd   : > { %2725 = vmatmul.mubr.bf16.gmra.mxu0 %v1393_v46  ;;  %2810 = vmatprep.subr.bf16.mxu1 %v2967_v1 }
  0xbe   : > { %2761 = vmatmul.mubr.bf16.gmra.mxu1 %v1597_v48  ;;  %2728 = vmatprep.mubr.msk.bf16.mxu0 %vm2968_vm0, %v2967_v1 }
  0xbf   : > { %2764 = vmatprep.mubr.msk.bf16.mxu1 %vm2968_vm0, %v2967_v1  ;;  %2781 = vmatpush3.bf16.msra.mxu0 %v2938_v49 }
  0xc0   : > { %2818 = vmatpush3.bf16.msra.mxu1 %v2938_v49  ;;  %2782 = vmatprep.subr.bf16.mxu0 %v2967_v1 }
  0xc1   : > { %2811 = vmatprep.subr.bf16.mxu1 %v2967_v1 }
  0xc3   : > { %2783 = vmatpush3.bf16.msra.mxu0 %v2941_v54 }
  0xc4   : > { %2819 = vmatpush3.bf16.msra.mxu1 %v2941_v54 }
  0xc5   : > { %2729 = vmatmul.mubr.bf16.gmra.mxu0 %v1395_v56 }
  0xc6   : > { %2765 = vmatmul.mubr.bf16.gmra.mxu1 %v1606_v58  ;;  %2784 = vmatprep.mubr.msk.bf16.mxu0 %vm2968_vm0, %v2967_v1 }
  0xc7   : > { %2796 = vmatprep.mubr.msk.bf16.mxu1 %vm2968_vm0, %v2967_v1 }
  0xcd   : > { %2785 = vmatmul.mubr.bf16.vlgmr.msra.gmra.mxu0 %v1767_v62 }
  0xce   : > { %2797 = vmatmul.mubr.bf16.vlgmr.msra.gmra.mxu1 %v1773_v63  ;;  %2788 = vmatprep.mubr.msk.bf16.mxu0 %vm2968_vm0, %v2967_v1 }
  0xcf   : > { %2800 = vmatprep.mubr.msk.bf16.mxu1 %vm2968_vm0, %v2967_v1 }
  0xd5   : > { %2789 = vmatmul.mubr.bf16.gmra.mxu0 %v1769_v2 }
  0xd6   : > { %2801 = vmatmul.mubr.bf16.gmra.mxu1 %v1775_v3  ;;  %2792 = vmatprep.mubr.msk.bf16.mxu0 %vm2968_vm0, %v2967_v1 }
  0xdd   : > { %2793 = vmatmul.mubr.bf16.gmra.mxu0 %v1771_v5 }
  0xed   : > { %v412_v6 = vpop.f32.mrf.mxu0 }
  0xee   : > { %v538_v7 = vpop.f32.mrf.mxu1 }
  0xef   : > { %v539_v4 = vadd.f32 %v538_v7, %v412_v6  ;;  %v2498_v8 = vpop.f32.mrf.mxu0 }
  0xf0   : > { %v2534_v9 = vpop.f32.mrf.mxu1 }
  0xf1   : > { %v415_v11 = vpop.f32.mrf.mxu0 }
  0xf2   : > { %v541_v12 = vpop.f32.mrf.mxu1 }
  0xf3   : > { %v542_v10 = vadd.f32 %v541_v12, %v415_v11  ;;  %v2499_v13 = vpop.f32.mrf.mxu0 }
  0xf4   : > { %v2535_v14 = vpop.f32.mrf.mxu1 }
  0xf5   : > { %v420_v16 = vpop.f32.mrf.mxu0 }
  0xf6   : > { %v546_v17 = vpop.f32.mrf.mxu1 }
  0xf7   : > { %v547_v18 = vadd.f32 %v546_v17, %v420_v16  ;;  %v2502_v15 = vpop.f32.mrf.mxu0 }
  0xf8   : > { %v2538_v20 = vpop.f32.mrf.mxu1 }
  0xf9   : > { %v423_v21 = vpop.f32.mrf.mxu0 }
  0xfa   : > { %v549_v1 = vpop.f32.mrf.mxu1 }
  0xfb   : > { %v550_v22 = vadd.f32 %v549_v1, %v423_v21  ;;  %v2503_v19 = vpop.f32.mrf.mxu0 }
  0xfc   : > { %v2539_v23 = vpop.f32.mrf.mxu1 }
  0xfd   : > { %v428_v24 = vpop.f32.mrf.mxu0 }
  0xfe   : > { %v554_v25 = vpop.f32.mrf.mxu1 }
  0xff   : > { %v555_v26 = vadd.f32 %v554_v25, %v428_v24  ;;  %v2506_v28 = vpop.f32.mrf.mxu0 }
 0x100   : > { %v2542_v29 = vpop.f32.mrf.mxu1 }
 0x101   : > { %v431_v30 = vpop.f32.mrf.mxu0 }
 0x102   : > { %v557_v31 = vpop.f32.mrf.mxu1 }
 0x103   : > { %v558_v32 = vadd.f32 %v557_v31, %v431_v30  ;;  %v2507_v33 = vpop.f32.mrf.mxu0 }
 0x104   : > { %v2543_v34 = vpop.f32.mrf.mxu1 }
 0x105   : > { %v436_v35 = vpop.f32.mrf.mxu0 }
 0x106   : > { %v562_v27 = vpop.f32.mrf.mxu1 }
 0x107   : > { %v563_v37 = vadd.f32 %v562_v27, %v436_v35  ;;  %v2510_v38 = vpop.f32.mrf.mxu0 }
 0x108   : > { %v2546_v39 = vpop.f32.mrf.mxu1 }
 0x109   : > { %v439_v40 = vpop.f32.mrf.mxu0 }
 0x10a   : > { %v565_v41 = vpop.f32.mrf.mxu1 }
 0x10b   : > { %v566_v42 = vadd.f32 %v565_v41, %v439_v40  ;;  %v2511_v43 = vpop.f32.mrf.mxu0 }
 0x10c   : > { %v2547_v44 = vpop.f32.mrf.mxu1 }
 0x10d   : > { %v444_v46 = vpop.f32.mrf.mxu0 }
 0x10e   : > { %v570_v47 = vpop.f32.mrf.mxu1 }
 0x10f   : > { %v571_v48 = vadd.f32 %v570_v47, %v444_v46  ;;  %v2514_v49 = vpop.f32.mrf.mxu0 }
 0x110   : > { %v2550_v36 = vpop.f32.mrf.mxu1 }
 0x111   : > { %v447_v50 = vpop.f32.mrf.mxu0 }
 0x112   : > { %v573_v52 = vpop.f32.mrf.mxu1 }
 0x113   : > { %v574_v53 = vadd.f32 %v573_v52, %v447_v50  ;;  %v2515_v54 = vpop.f32.mrf.mxu0 }
 0x114   : > { %v2551_v55 = vpop.f32.mrf.mxu1 }
 0x115   : > { %v697_v56 = vpop.f32.mrf.mxu0 }
 0x116   : > { %v736_v57 = vadd.f32 %v697_v56, %v539_v4  ;;  %v900_v58 = vpop.f32.mrf.mxu1 }
 0x117   : > { %v2570_v59 = vpop.f32.mrf.mxu0 }
 0x118   : > { %v939_v60 = vadd.f32 %v900_v58, %v736_v57  ;;  %v2606_v61 = vpop.f32.mrf.mxu1 }
 0x119   : > { %v700_v45 = vpop.f32.mrf.mxu0 }
 0x11a   : > { %v737_v62 = vadd.f32 %v700_v45, %v542_v10  ;;  %v903_v63 = vpop.f32.mrf.mxu1 }
 0x11b   : > { %v2571_v0 = vpop.f32.mrf.mxu0 }
 0x11c   : > { %v940_v51 = vadd.f32 %v903_v63, %v737_v62  ;;  %v2607_v2 = vpop.f32.mrf.mxu1 }
 0x11d   : > { %v705_v3 = vpop.f32.mrf.mxu0 }
 0x11e   : > { %v738_v5 = vadd.f32 %v705_v3, %v547_v18  ;;  %v908_v6 = vpop.f32.mrf.mxu1 }
 0x11f   : > { %v2574_v7 = vpop.f32.mrf.mxu0 }
 0x120   : > { %v941_v8 = vadd.f32 %v908_v6, %v738_v5  ;;  %v2610_v9 = vpop.f32.mrf.mxu1 }
 0x121   : > { %v708_v11 = vpop.f32.mrf.mxu0 }
 0x122   : > { %v739_v12 = vadd.f32 %v708_v11, %v550_v22  ;;  %v911_v13 = vpop.f32.mrf.mxu1 }
 0x123   : > { %v2575_v4 = vpop.f32.mrf.mxu0 }
 0x124   : > { %v942_v14 = vadd.f32 %v911_v13, %v739_v12  ;;  %v2611_v16 = vpop.f32.mrf.mxu1 }
 0x125   : > { %v713_v17 = vpop.f32.mrf.mxu0 }
 0x126   : > { %v740_v15 = vadd.f32 %v713_v17, %v555_v26  ;;  %v916_v20 = vpop.f32.mrf.mxu1 }
 0x127   : > { %v2578_v10 = vpop.f32.mrf.mxu0 }
 0x128   : > { %v943_v21 = vadd.f32 %v916_v20, %v740_v15  ;;  %v2614_v1 = vpop.f32.mrf.mxu1 }
 0x129   : > { %v716_v19 = vpop.f32.mrf.mxu0 }
 0x12a   : > { %v741_v23 = vadd.f32 %v716_v19, %v558_v32  ;;  %v919_v24 = vpop.f32.mrf.mxu1 }
 0x12b   : > { %v2579_v18 = vpop.f32.mrf.mxu0 }
 0x12c   : > { %v944_v25 = vadd.f32 %v919_v24, %v741_v23  ;;  %v2615_v28 = vpop.f32.mrf.mxu1 }
 0x12d   : > { %v721_v29 = vpop.f32.mrf.mxu0 }
 0x12e   : > { %v742_v30 = vadd.f32 %v721_v29, %v563_v37  ;;  %v924_v31 = vpop.f32.mrf.mxu1 }
 0x12f   : > { %v2582_v22 = vpop.f32.mrf.mxu0 }
 0x130   : > { %v3565_v33 = vadd.f32 %v924_v31, %v742_v30  ;;  %v2618_v34 = vpop.f32.mrf.mxu1 }
 0x131   : > { %v724_v35 = vpop.f32.mrf.mxu0 }
 0x132   : > { %v743_v27 = vadd.f32 %v724_v35, %v566_v42  ;;  %v927_v26 = vpop.f32.mrf.mxu1 }
 0x133   : > { %v2583_v38 = vpop.f32.mrf.mxu0 }
 0x134   : > { %v3567_v39 = vadd.f32 %v927_v26, %v743_v27  ;;  %v2619_v40 = vpop.f32.mrf.mxu1 }
 0x135   : > { %v729_v41 = vpop.f32.mrf.mxu0 }
 0x136   : > { %v744_v32 = vadd.f32 %v729_v41, %v571_v48  ;;  %v932_v43 = vpop.f32.mrf.mxu1 }
 0x137   : > { %v2586_v44 = vpop.f32.mrf.mxu0 }
 0x138   : > { %v3569_v46 = vadd.f32 %v932_v43, %v744_v32  ;;  %v2622_v47 = vpop.f32.mrf.mxu1 }
 0x139   : > { %v732_v37 = vpop.f32.mrf.mxu0 }
 0x13a   : > { %v745_v49 = vadd.f32 %v732_v37, %v574_v53  ;;  %v935_v36 = vpop.f32.mrf.mxu1 }
 0x13b   : > { %v2587_v50 = vpop.f32.mrf.mxu0 }
 0x13c   : > { %v3571_v52 = vadd.f32 %v935_v36, %v745_v49  ;;  %v2623_v54 = vpop.f32.mrf.mxu1 }
 0x13d   : > { %v1111_v42 = vpop.f32.mrf.mxu0 }
 0x13e   : > { %v1150_v55 = vadd.f32 %v1111_v42, %v939_v60  ;;  %v1280_v56 = vpop.f32.mrf.mxu1 }
 0x13f   : > { %v2642_v57 = vpop.f32.mrf.mxu0 }
 0x140   : > { %v3573_v58 = vadd.f32 %v1280_v56, %v1150_v55  ;;  %v2678_v59 = vpop.f32.mrf.mxu1 }
 0x141   : > { %v1114_v48 = vpop.f32.mrf.mxu0 }
 0x142   : > { %v1151_v61 = vadd.f32 %v1114_v48, %v940_v51  ;;  %v1283_v45 = vpop.f32.mrf.mxu1 }
 0x143   : > { %v2643_v62 = vpop.f32.mrf.mxu0 }
 0x144   : > { %v3575_v63 = vadd.f32 %v1283_v45, %v1151_v61  ;;  %v2679_v0 = vpop.f32.mrf.mxu1 }
 0x145   : > { %v1119_v53 = vpop.f32.mrf.mxu0 }
 0x146   : > { %v1152_v2 = vadd.f32 %v1119_v53, %v941_v8  ;;  %v1288_v3 = vpop.f32.mrf.mxu1 }
 0x147   : > { %v2646_v5 = vpop.f32.mrf.mxu0 }
 0x148   : > { %v3577_v6 = vadd.f32 %v1288_v3, %v1152_v2  ;;  %v2682_v7 = vpop.f32.mrf.mxu1 }
 0x149   : > { %v1122_v60 = vpop.f32.mrf.mxu0 }
 0x14a   : > { %v1153_v9 = vadd.f32 %v1122_v60, %v942_v14  ;;  %v1291_v11 = vpop.f32.mrf.mxu1 }
 0x14b   : > { %v2647_v12 = vpop.f32.mrf.mxu0 }
 0x14c   : > { %v3579_v13 = vadd.f32 %v1291_v11, %v1153_v9  ;;  %v2683_v4 = vpop.f32.mrf.mxu1 }
 0x14d   : > { %v1127_v51 = vpop.f32.mrf.mxu0 }
 0x14e   : > { %v1154_v16 = vadd.f32 %v1127_v51, %v943_v21  ;;  %v1296_v17 = vpop.f32.mrf.mxu1 }
 0x14f   : > { %v2650_v15 = vpop.f32.mrf.mxu0 }
 0x150   : > { %v3581_v20 = vadd.f32 %v1296_v17, %v1154_v16  ;;  %v2686_v10 = vpop.f32.mrf.mxu1 }
 0x151   : > { %v1130_v8 = vpop.f32.mrf.mxu0 }
 0x152   : > { %v1155_v1 = vadd.f32 %v1130_v8, %v944_v25  ;;  %v1299_v19 = vpop.f32.mrf.mxu1 }
 0x153   : > { %v2651_v23 = vpop.f32.mrf.mxu0 }
 0x154   : > { %v3583_v24 = vadd.f32 %v1299_v19, %v1155_v1  ;;  %v2687_v18 = vpop.f32.mrf.mxu1 }
 0x155   : > { %v1135_v14 = vpop.f32.mrf.mxu0 }
 0x156   : > { %v1304_v28 = vpop.f32.mrf.mxu1  ;;  %v1156_v17 = vadd.f32 %v1135_v14, %v3565_v33 }
 0x157   : > { %v2654_v29 = vpop.f32.mrf.mxu0 }
 0x158   : > { %v2690_v30 = vpop.f32.mrf.mxu1  ;;  %v1325_v19 = vadd.f32 %v1304_v28, %v1156_v17 }
 0x159   : > { %v1138_v31 = vpop.f32.mrf.mxu0 }
 0x15a   : > { %v1307_v22 = vpop.f32.mrf.mxu1  ;;  %v1157_v23 = vadd.f32 %v1138_v31, %v3567_v39 }
 0x15b   : > { %v2655_v34 = vpop.f32.mrf.mxu0 }
 0x15c   : > { %v2691_v21 = vpop.f32.mrf.mxu1 }
 0x15d   : > { %v1143_v35 = vpop.f32.mrf.mxu0 }
 0x15e   : > { %v1312_v27 = vpop.f32.mrf.mxu1 }
 0x15f   : > { %v2658_v26 = vpop.f32.mrf.mxu0 }
 0x160   : > { %v2694_v38 = vpop.f32.mrf.mxu1 }
 0x161   : > { %v1146_v40 = vpop.f32.mrf.mxu0  ;;  %v1326_v38 = vadd.f32 %v1307_v22, %v1157_v23  ;;  %v3608_v22 = vld [vmem:[%s3653_s2] ss:$0 sm:$0xff] }
 0x162   : > { %v3585_v41 = vpop.f32.mrf.mxu1 }
 0x163   : > { %v2659_v25 = vpop.f32.mrf.mxu0 }
 0x164   : > { %v2695_v32 = vpop.f32.mrf.mxu1  ;;  %v1158_v25 = vadd.f32 %v1143_v35, %v3569_v46 }
 0x165   : > { %v1483_v43 = vpop.f32.mrf.mxu0 }
 0x166   : > { %v1694_v44 = vpop.f32.mrf.mxu1  ;;  %v1522_v29 = vadd.f32 %v1483_v43, %v3573_v58  ;;  %v1327_v31 = vadd.f32 %v1312_v27, %v1158_v25  ;;  %v1159_v58 = vadd.f32 %v1146_v40, %v3571_v52 }
 0x167   : > { %v2714_v47 = vpop.f32.mrf.mxu0 }
 0x168   : > { %v2750_v37 = vpop.f32.mrf.mxu1  ;;  %v1733_v47 = vadd.f32 %v1694_v44, %v1522_v29  ;;  %v1328_v52 = vadd.f32 %v3585_v41, %v1159_v58 }
 0x169   : > { %v1486_v49 = vpop.f32.mrf.mxu0 }
 0x16a   : > { %v1697_v36 = vpop.f32.mrf.mxu1  ;;  %v1523_v33 = vadd.f32 %v1486_v49, %v3575_v63 }
 0x16b   : > { %v2715_v50 = vpop.f32.mrf.mxu0 }
 0x16c   : > { %v2751_v54 = vpop.f32.mrf.mxu1  ;;  %v1734_v43 = vadd.f32 %v1697_v36, %v1523_v33 }
 0x16d   : > { %v1491_v42 = vpop.f32.mrf.mxu0 }
 0x16e   : > { %v3587_v55 = vpop.f32.mrf.mxu1  ;;  %v1524_v63 = vadd.f32 %v1491_v42, %v3577_v6 }
 0x16f   : > { %v2718_v56 = vpop.f32.mrf.mxu0 }
 0x170   : > { %v2754_v57 = vpop.f32.mrf.mxu1 }
 0x171   : > { %v1494_v59 = vpop.f32.mrf.mxu0 }
 0x172   : > { %v3589_v48 = vpop.f32.mrf.mxu1  ;;  %v1525_v36 = vadd.f32 %v1494_v59, %v3579_v13 }
 0x173   : > { %v2719_v61 = vpop.f32.mrf.mxu0 }
 0x174   : > { %v2755_v45 = vpop.f32.mrf.mxu1 }
 0x175   : > { %v3591_v62 = vpop.f32.mrf.mxu0 }
 0x176   : > { %v3593_v0 = vpop.f32.mrf.mxu1 }
 0x177   : > { %v2722_v53 = vpop.f32.mrf.mxu0 }
 0x178   : > { %v2758_v2 = vpop.f32.mrf.mxu1 }
 0x179   : > { %v3595_v3 = vpop.f32.mrf.mxu0 }
 0x17a   : > { %v3597_v5 = vpop.f32.mrf.mxu1 }
 0x17b   : > { %v2723_v7 = vpop.f32.mrf.mxu0 }
 0x17c   : > { %v2759_v60 = vpop.f32.mrf.mxu1  ;;  %v1735_v7 = vadd.f32 %v3587_v55, %v1524_v63 }
 0x17d   : > { %v1507_v9 = vpop.f32.mrf.mxu0 }
 0x17e   : > { %v1718_v11 = vpop.f32.mrf.mxu1  ;;  %v1528_v34 = vadd.f32 %v1507_v9, %v1325_v19 }
 0x17f   : > { %v2726_v12 = vpop.f32.mrf.mxu0 }
 0x180   : > { %v2762_v4 = vpop.f32.mrf.mxu1  ;;  %v1739_v37 = vadd.f32 %v1718_v11, %v1528_v34 }
 0x181   : > { %v1510_v51 = vpop.f32.mrf.mxu0 }
 0x182   : > { %v1721_v16 = vpop.f32.mrf.mxu1  ;;  %v1529_v50 = vadd.f32 %v1510_v51, %v1326_v38 }
 0x183   : > { %v2727_v15 = vpop.f32.mrf.mxu0 }
 0x184   : > { %v2763_v10 = vpop.f32.mrf.mxu1  ;;  %v1740_v49 = vadd.f32 %v1721_v16, %v1529_v50  ;;  %v1736_v15 = vadd.f32 %v3589_v48, %v1525_v36 }
 0x185   : > { %v1515_v8 = vpop.f32.mrf.mxu0  ;;  %v1526_v10 = vadd.f32 %v3591_v62, %v3581_v20  ;;  %v1527_v20 = vadd.f32 %v3595_v3, %v3583_v24 }
 0x186   : > { %v1726_v1 = vpop.f32.mrf.mxu1  ;;  %v1530_v56 = vadd.f32 %v1515_v8, %v1327_v31 }
 0x187   : > { %v2730_v18 = vpop.f32.mrf.mxu0  ;;  %v1737_v48 = vadd.f32 %v3593_v0, %v1526_v10  ;;  %v1738_v0 = vadd.f32 %v3597_v5, %v1527_v20 }
 0x188   : > { %v2766_v30 = vpop.f32.mrf.mxu1  ;;  %v1741_v60 = vadd.f32 %v1726_v1, %v1530_v56 }
 0x189   : > { %v1518_v21 = vpop.f32.mrf.mxu0 }
 0x18a   : > { %v1729_v26 = vpop.f32.mrf.mxu1  ;;  %v1531_v9 = vadd.f32 %v1518_v21, %v1328_v52 }
 0x18b   : > { %v2731_v32 = vpop.f32.mrf.mxu0 }
 0x18c   : > { %v2767_v14 = vpop.f32.mrf.mxu1  ;;  %v1742_v19 = vadd.f32 %v1729_v26, %v1531_v9 }
 0x18d   : > { %v1863_v28 = vpop.f32.mrf.mxu0 }
 0x18e   : > { %v1902_v54 = vadd.f32 %v1863_v28, %v1733_v47  ;;  %v1887_v39 = vpop.f32.mrf.mxu1 }
 0x18f   : > { %v1908_v46 = vadd.f32 %v1887_v39, %v1739_v37  ;;  %v2786_v35 = vpop.f32.mrf.mxu0 }
 0x190   : > { %v2798_v44 = vpop.f32.mrf.mxu1  ;;  %v1919_v61 = vadd.f32 %v3608_v22, %v1902_v54 }
 0x191   : > { %v1866_v57 = vpop.f32.mrf.mxu0  ;;  %v1925_v40 = vadd.f32 %v3608_v22, %v1908_v46 }
 0x192   : > { %v1903_v27 = vadd.f32 %v1866_v57, %v1734_v43  ;;  %v1890_v45 = vpop.f32.mrf.mxu1  ;;  %v1929_v4 = vmax.f32 %v1919_v61, 0.0 }
 0x193   : > { %v1909_v53 = vadd.f32 %v1890_v45, %v1740_v49  ;;  %v2787_v2 = vpop.f32.mrf.mxu0  ;;  %v1935_v17 = vmax.f32 %v1925_v40, 0.0 }
 0x194   : > { %v1920_v6 = vadd.f32 %v3608_v22, %v1903_v27  ;;  %v2799_v42 = vpop.f32.mrf.mxu1 }
 0x195   : > { %v1926_v11 = vadd.f32 %v3608_v22, %v1909_v53  ;;  %v1871_v12 = vpop.f32.mrf.mxu0 }
 0x196   : > { %v1930_v51 = vmax.f32 %v1920_v6, 0.0  ;;  %v1904_v41 = vadd.f32 %v1871_v12, %v1735_v7  ;;  %v1895_v16 = vpop.f32.mrf.mxu1 }
 0x197   : > { %v1936_v13 = vmax.f32 %v1926_v11, 0.0  ;;  %v1910_v55 = vadd.f32 %v1895_v16, %v1741_v60  ;;  %v2790_v59 = vpop.f32.mrf.mxu0 }
 0x198   : > { %v2337_v8 = vpack.c.bf16 %v1930_v51, %v1929_v4  ;;  %v2802_v1 = vpop.f32.mrf.mxu1  ;;  %v1921_v29 = vadd.f32 %v3608_v22, %v1904_v41 }
 0x199   : > { %v2352_v23 = vpack.c.bf16 %v1936_v13, %v1935_v17  ;;  %v1874_v18 = vpop.f32.mrf.mxu0  ;;  %v1927_v21 = vadd.f32 %v3608_v22, %v1910_v55 }
 0x19a   : > { %2338 = vst [vmem:[%s3622_s7] sm:$0xff] %v2337_v8   ;;  %v1905_v30 = vadd.f32 %v1874_v18, %v1736_v15  ;;  %v1898_v34 = vpop.f32.mrf.mxu1  ;;  %v1931_v33 = vmax.f32 %v1921_v29, 0.0 }
 0x19b   : > { %2361 = vst [vmem:[%s3622_s7 + $0x18] sm:$0xff] %v2352_v23   ;;  %v1911_v38 = vadd.f32 %v1898_v34, %v1742_v19  ;;  %v2791_v25 = vpop.f32.mrf.mxu0  ;;  %v1937_v50 = vmax.f32 %v1927_v21, 0.0 }
 0x19c   : > { %v1922_v62 = vadd.f32 %v3608_v22, %v1905_v30  ;;  %v2803_v26 = vpop.f32.mrf.mxu1 }
 0x19d   : > { %v1928_v32 = vadd.f32 %v3608_v22, %v1911_v38  ;;  %v1879_v47 = vpop.f32.mrf.mxu0 }
 0x19e   : > { %v1932_v14 = vmax.f32 %v1922_v62, 0.0  ;;  %v1906_v37 = vadd.f32 %v1879_v47, %v1737_v48 }
 0x19f   : > { %v1938_v28 = vmax.f32 %v1928_v32, 0.0  ;;  %v2794_v54 = vpop.f32.mrf.mxu0 }
 0x1a0   : > { %v2342_v39 = vpack.c.bf16 %v1932_v14, %v1931_v33  ;;  %v1923_v24 = vadd.f32 %v3608_v22, %v1906_v37 }
 0x1a1   : > { %v2357_v31 = vpack.c.bf16 %v1938_v28, %v1937_v50  ;;  %v1882_v58 = vpop.f32.mrf.mxu0 }
 0x1a2   : > { %2359 = vst [vmem:[%s3622_s7 + $0x8] sm:$0xff] %v2342_v39   ;;  %v1907_v3 = vadd.f32 %v1882_v58, %v1738_v0  ;;  %v1933_v43 = vmax.f32 %v1923_v24, 0.0 }
 0x1a3   : > { %2362 = vst [vmem:[%s3622_s7 + $0x20] sm:$0xff] %v2357_v31   ;;  %v2795_v46 = vpop.f32.mrf.mxu0 }
 0x1a4   : > { %v1924_v35 = vadd.f32 %v3608_v22, %v1907_v3 }
 0x1a6   : > { %v1934_v63 = vmax.f32 %v1924_v35, 0.0 }
 0x1a8   : > { %v2347_v44 = vpack.c.bf16 %v1934_v63, %v1933_v43 }
 0x1aa   : > { %2360 = vst [vmem:[%s3622_s7 + $0x10] sm:$0xff] %v2347_v44  }
 0x1ab PF: > { %s13_s14 = sadd.s32 1, %s2965_s14   ;;  %s3655_s12 = smov %s2961_s13 }
 0x1ac   : > { %p10_p5 = scmp.ge.s32.totalorder %s13_s14, 4   ;;  %s3656_s13 = smov %s3658_s15 }
 0x1ae   :  { %12 = sbr.rel (!%p10_p5) target bundleno = 2 (0x2), region = 70 }

// kernel: unet_encoder_forward.14
= control target key start
LH: loop header
LB: loop body
LE: loop exit
PB: predicated region body
PF: predicated region fallthrough
CT: control target
= control target key end

     0   :  { %s2165_s12 = smov 0   ;;  %s2167_s13 = smov 0   ;;  %s2489_s0 = inlined_call_operand.vmem [shape: bf16[2,1,38,128], index: 0, kind: input, shape index: {}]   ;;  %s2490_s1 = inlined_call_operand.vmem [shape: bf16[9,128,128], index: 1, kind: input, shape index: {}]   ;;  %s2491_s2 = inlined_call_operand.vmem [shape: f32[1,128], index: 2, kind: input, shape index: {}]   ;;  %s2492_s3 = inlined_call_operand.vmem [shape: bf16[2,1,24,128], index: 3, kind: output, shape index: {}]  }
   0x1   :  { %s2169_s14 = smov 0  }
   0x2 LB: > { %s25_s15 = sadd.s32 1, %s2139_s13  ;;  %p1510_p0 = scmp.ge.s32.totalorder %s2143_s14, 1  ;;  %s2143_s14 = sphi %s2169_s14, %s13_s14   ;;  %s2139_s13 = sphi %s2167_s13, %s2494_s13   ;;  %s2135_s12 = sphi %s2165_s12, %s2493_s12  }
   0x3   : > { %p27_p1 = scmp.ge.s32.totalorder %s25_s15, 2  ;;  %p157_p2 = scmp.lt.s32.totalorder %s2143_s14, 3 }
   0x5   : > { %s2496_s15 = smov (%p27_p1, %s25_s15), 0  ;;  %p158_p3 = pnand %p1510_p0, %p157_p2 }
   0x6   : > { %p189_p4 = scmp.lt.s32.totalorder (!%p158_p3), %s2135_s12, 1 }
   0x7   : > { %161 = sbr.rel (%p158_p3) target bundleno = 381 (0x17d), region = 32 }
   0xc   : > { %v2036_v0 = vld [vmem:[%s2490_s1 + $0x78] sm:$0xff]   ;;  %v2038_v2 = vld [vmem:[%s2490_s1 + $0x70] sm:$0xff]   ;;  %v2040_v4 = vld [vmem:[%s2490_s1 + $0x68] sm:$0xff]   ;;  %s2498_s12 = smov (!%p189_p4, %s2135_s12), 1  ;;  %vm255_vm0 = vsmask.f32 7424 }
   0xd   : > { %v2037_v1 = vld [vmem:[%s2490_s1 + $0x38] sm:$0xff]   ;;  %1830 = vmatprep.subr.bf16.mxu0 %v2036_v0  ;;  %v2039_v3 = vld [vmem:[%s2490_s1 + $0x30] sm:$0xff]   ;;  %v2041_v5 = vld [vmem:[%s2490_s1 + $0x28] sm:$0xff]   ;;  %s2010_s5 = smul.u32 20, %s2498_s12  ;;  %vm489_vm1 = vcmask 1046528   ;;  %vm619_vm2 = vcmask 1044480  }
   0xe   : > { %1850 = vmatprep.subr.bf16.mxu1 %v2037_v1  ;;  %1831 = vmatpush3.bf16.msra.mxu0 %v2036_v0  ;;  %v2042_v6 = vld [vmem:[%s2490_s1 + $0x60] sm:$0xff]   ;;  %v2044_v8 = vld [vmem:[%s2490_s1 + $0x58] sm:$0xff]   ;;  %v2046_v10 = vld [vmem:[%s2490_s1 + $0x50] sm:$0xff]   ;;  %vm745_vm3 = vsmask.f32 4352  ;;  %vm1015_vm4 = vcmask 1045504  }
   0xf   : > { %1851 = vmatpush3.bf16.msra.mxu1 %v2037_v1  ;;  %1832 = vmatprep.subr.bf16.mxu0 %v2038_v2  ;;  %v2043_v7 = vld [vmem:[%s2490_s1 + $0x20] sm:$0xff]   ;;  %v2045_v9 = vld [vmem:[%s2490_s1 + $0x18] sm:$0xff]   ;;  %s2219_s16 = scalar_lea.vmem %s2489_s0, %s2010_s5  ;;  %v2047_v14 = vld [vmem:[%s2490_s1 + $0x10] sm:$0xff]   ;;  %vm1141_vm5 = vsmask.f32 5376  ;;  %s2011_s30 = smul.u32 12, %s2498_s12 }
  0x10   : > { %1852 = vmatprep.subr.bf16.mxu1 %v2039_v3  ;;  %v208_v11 = vld [vmem:[%s2219_s16] sm:$0xf]  ;;  %v2226_v12 = vld [vmem:[%s2219_s16 + $0x4] sm:$0xf]  ;;  %v2229_v13 = vld [vmem:[%s2219_s16 + $0x8] sm:$0xf] }
  0x11   : > { %v227_v15 = vld [vmem:[%s2219_s16 + $0xc] sm:$0x1]  ;;  %v1529_v16 = vcombine.low %v208_v11, %v2226_v12  ;;  %v2050_v26 = vld [vmem:[%s2490_s1 + $0x40] sm:$0xff]   ;;  %v2055_v30 = vld [vmem:[%s2490_s1 + $0xb8] sm:$0xff]   ;;  %v1539_v33 = vcombine.low %v2229_v13, %v2229_v13  ;;  %s206_s6 = scalar_lea.vmem %s2492_s3, %s2011_s30 }
  0x12   : > { %1833 = vmatpush3.bf16.msra.mxu0 %v2038_v2  ;;  %v2237_v17 = vcombine.low %v2229_v13, %v227_v15  ;;  %v2048_v20 = vld [vmem:[%s2490_s1 + $0x48] sm:$0xff]   ;;  %v2051_v27 = vld [vmem:[%s2490_s1] sm:$0xff]   ;;  %v2056_v31 = vld [vmem:[%s2490_s1 + $0xf8] sm:$0xff]   ;;  %v1640_v15 = vcombine.low %v2226_v12, %v2229_v13 }
  0x13   : > { %1853 = vmatpush3.bf16.msra.mxu1 %v2039_v3  ;;  %1834 = vmatprep.subr.bf16.mxu0 %v2040_v4  ;;  %v257_v18 = vshrl.u32 %v1529_v16, 16  ;;  %v259_v19 = vshll.u32 %v1529_v16, 16  ;;  %v2049_v22 = vld [vmem:[%s2490_s1 + $0x8] sm:$0xff]   ;;  %v2057_v34 = vld [vmem:[%s2490_s1 + $0xb0] sm:$0xff]   ;;  %v468_v36 = vld [vmem:[%s2219_s16] sm:$0xe] }
  0x14   : > { %1854 = vmatprep.subr.bf16.mxu1 %v2041_v5  ;;  %1866 = vmatprep.mubr.bf16.mxu1 %v1529_v16  ;;  %v264_v21 = vshll.u32 %v2237_v17, 16  ;;  %v268_v29 = vshrl.u32 %v2237_v17, 16  ;;  %v2058_v35 = vld [vmem:[%s2490_s1 + $0xf0] sm:$0xff]   ;;  %v1564_v37 = vcombine.low %v468_v36, %v2226_v12  ;;  %v491_v38 = vrot.slane %v2237_v17, 1  ;;  %v594_v39 = vld [vmem:[%s2219_s16] sm:$0x8] }
  0x15   : > { %v261_v23 = vrot.slane %v259_v19, 1  ;;  %v595_v40 = vld [vmem:[%s2219_s16 + $0xc] sm:$0x7]  ;;  %v1589_v42 = vcombine.low %v594_v39, %v2226_v12  ;;  %v2061_v49 = vld [vmem:[%s2490_s1 + $0xa0] sm:$0xff]   ;;  %v2063_v52 = vld [vmem:[%s2490_s1 + $0x98] sm:$0xff]  }
  0x16   : > { %1835 = vmatpush3.bf16.msra.mxu0 %v2040_v4  ;;  %v266_v24 = vrot.slane %v264_v21, 1  ;;  %v2059_v41 = vld [vmem:[%s2490_s1 + $0xa8] sm:$0xff]   ;;  %v1590_v43 = vcombine.low %v2229_v13, %v595_v40  ;;  %v490_v45 = vrot.slane %v1564_v37, 1  ;;  %v2062_v51 = vld [vmem:[%s2490_s1 + $0xe0] sm:$0xff]   ;;  %v2064_v53 = vld [vmem:[%s2490_s1 + $0xd8] sm:$0xff]  }
  0x17   : > { %1855 = vmatpush3.bf16.msra.mxu1 %v2041_v5  ;;  %1836 = vmatprep.subr.bf16.mxu0 %v2042_v6  ;;  %v262_v25 = vor.u32 %v261_v23, %v257_v18  ;;  %v2060_v44 = vld [vmem:[%s2490_s1 + $0xe8] sm:$0xff]   ;;  %v620_v46 = vrot.slane %v1589_v42, 3  ;;  %v2065_v54 = vld [vmem:[%s2490_s1 + $0x90] sm:$0xff]   ;;  %v747_v58 = vshrl.u32 %v1589_v42, 16  ;;  %v750_v59 = vshll.u32 %v1589_v42, 16  ;;  %v2069_v0 = vld [vmem:[%s2490_s1 + $0x80] sm:$0xff]  }
  0x18   : > { %1856 = vmatprep.subr.bf16.mxu1 %v2043_v7  ;;  %v270_v32 = vor.u32 %v268_v29, %v266_v24  ;;  %v2281_v47 = vrot.slane %v1590_v43, 3  ;;  %v492_v48 = vsel %vm489_vm1, %v490_v45, %v491_v38  ;;  %v2066_v55 = vld [vmem:[%s2490_s1 + $0xd0] sm:$0xff]   ;;  %v2067_v56 = vld [vmem:[%s2490_s1 + $0x88] sm:$0xff]   ;;  %v2070_v1 = vld [vmem:[%s2490_s1 + $0xc0] sm:$0xff]  }
  0x19   : > { %v267_v28 = vsel %vm255_vm0, %v262_v25, %v266_v24  ;;  %v2310_v57 = vld [vmem:[%s2219_s16 + $0xc] sm:$0xf]  ;;  %v749_v2 = vrot.slane %v747_v58, 3  ;;  %v752_v3 = vrot.slane %v750_v59, 4  ;;  %v2077_v11 = vld [vmem:[%s2490_s1 + $0x170] sm:$0xff]   ;;  %v2080_v12 = vld [vmem:[%s2490_s1 + $0x120] sm:$0xff]  }
  0x1a   : > { %1837 = vmatpush3.bf16.msra.mxu0 %v2042_v6  ;;  %1846 = vmatprep.mubr.bf16.mxu0 %v267_v28  ;;  %v622_v50 = vsel %vm619_vm2, %v620_v46, %v2281_v47  ;;  %v1615_v60 = vcombine.low %v2229_v13, %v2310_v57  ;;  %v2068_v61 = vld [vmem:[%s2490_s1 + $0xc8] sm:$0xff]   ;;  %v2072_v6 = vld [vmem:[%s2490_s1 + $0x138] sm:$0xff]   ;;  %v2081_v13 = vld [vmem:[%s2490_s1 + $0x160] sm:$0xff]  }
  0x1b   : > { %1857 = vmatpush3.bf16.msra.mxu1 %v2043_v7  ;;  %1838 = vmatprep.subr.bf16.mxu0 %v2044_v8  ;;  %v2075_v7 = vld [vmem:[%s2490_s1 + $0x178] sm:$0xff]   ;;  %v2078_v16 = vld [vmem:[%s2490_s1 + $0x128] sm:$0xff]   ;;  %v1120_v19 = vld [vmem:[%s2219_s16 + $0x10] sm:$0x7] }
  0x1c   : > { %1858 = vmatprep.subr.bf16.mxu1 %v2045_v9  ;;  %v755_v62 = vshrl.u32 %v1615_v60, 16  ;;  %v758_v63 = vshll.u32 %v1615_v60, 16  ;;  %v2079_v17 = vld [vmem:[%s2490_s1 + $0x168] sm:$0xff]   ;;  %v2083_v21 = vld [vmem:[%s2490_s1 + $0x158] sm:$0xff]   ;;  %v1260_v24 = vld [vmem:[%s2219_s16 + $0x4] sm:$0x8] }
  0x1d   : > { %v986_v18 = vld [vmem:[%s2219_s16 + $0xc] sm:$0xf]  ;;  %v985_v23 = vld [vmem:[%s2219_s16 + $0x8] sm:$0xf]  ;;  %v984_v28 = vld [vmem:[%s2219_s16 + $0x4] sm:$0xc] }
  0x1e   : > { %1839 = vmatpush3.bf16.msra.mxu0 %v2044_v8  ;;  %v757_v4 = vrot.slane %v755_v62, 3  ;;  %v760_v5 = vrot.slane %v758_v63, 4  ;;  %v753_v8 = vor.u32 %v752_v3, %v749_v2  ;;  %v1717_v25 = vcombine.low %v1260_v24, %v985_v23  ;;  %v2085_v29 = vld [vmem:[%s2490_s1 + $0x150] sm:$0xff]   ;;  %v2088_v40 = vld [vmem:[%s2490_s1 + $0x100] sm:$0xff]   ;;  %v2097_v58 = vld [vmem:[%s2490_s1 + $0x1a8] sm:$0xff]  }
  0x1f   : > { %1859 = vmatpush3.bf16.msra.mxu1 %v2045_v9  ;;  %1840 = vmatprep.subr.bf16.mxu0 %v2046_v10  ;;  %v2098_v59 = vld [vmem:[%s2490_s1 + $0x1e8] sm:$0xff]   ;;  %v2099_v60 = vld [vmem:[%s2490_s1 + $0x1a0] sm:$0xff]   ;;  %v2101_v62 = vld [vmem:[%s2490_s1 + $0x198] sm:$0xff]  }
  0x20   : > { %1860 = vmatprep.subr.bf16.mxu1 %v2047_v14  ;;  %v2329_v9 = vor.u32 %v760_v5, %v757_v4  ;;  %v2102_v63 = vld [vmem:[%s2490_s1 + $0x1d8] sm:$0xff]   ;;  %v2105_v2 = vld [vmem:[%s2490_s1 + $0x188] sm:$0xff]   ;;  %v2107_v4 = vld [vmem:[%s2490_s1 + $0x180] sm:$0xff]  }
  0x21   : > { %v2106_v3 = vld [vmem:[%s2490_s1 + $0x1c8] sm:$0xff]   ;;  %v2108_v5 = vld [vmem:[%s2490_s1 + $0x1c0] sm:$0xff]  }
  0x22   : > { %1841 = vmatpush3.bf16.msra.mxu0 %v2046_v10  ;;  %v2076_v10 = vld [vmem:[%s2490_s1 + $0x130] sm:$0xff]  }
  0x23   : > { %1861 = vmatpush3.bf16.msra.mxu1 %v2047_v14  ;;  %1842 = vmatprep.subr.bf16.mxu0 %v2048_v20  ;;  %v762_v14 = vsel %vm745_vm3, %v753_v8, %v2329_v9  ;;  %v2114_v8 = vld [vmem:[%s2490_s1 + $0x228] sm:$0xff]  }
  0x24   : > { %1862 = vmatprep.subr.bf16.mxu1 %v2049_v22 }
  0x26   : > { %1843 = vmatpush3.bf16.msra.mxu0 %v2048_v20  ;;  %v2082_v20 = vld [vmem:[%s2490_s1 + $0x118] sm:$0xff]  }
  0x27   : > { %1863 = vmatpush3.bf16.msra.mxu1 %v2049_v22  ;;  %1844 = vmatprep.subr.bf16.mxu0 %v2050_v26  ;;  %v2363_v22 = vcombine.low %v986_v18, %v1120_v19 }
  0x28   : > { %1864 = vmatprep.subr.bf16.mxu1 %v2051_v27 }
  0x29   : > { %v1154_v39 = vshll.u32 %v2363_v22, 16 }
  0x2a   : > { %1845 = vmatpush3.bf16.msra.mxu0 %v2050_v26  ;;  %v1282_v26 = vrot.slane %v2363_v22, 3 }
  0x2b   : > { %1865 = vmatpush3.bf16.msra.mxu1 %v2051_v27  ;;  %1870 = vmatprep.subr.bf16.mxu0 %v2055_v30  ;;  %v2084_v27 = vld [vmem:[%s2490_s1 + $0x110] sm:$0xff]   ;;  %v1156_v46 = vrot.slane %v1154_v39, 3 }
  0x2c   : > { %1890 = vmatprep.subr.bf16.mxu1 %v2056_v31 }
  0x2d   : > { %1847 = vmatmul.mubr.bf16.vlgmr.msra.gmra.mxu0 %v270_v32 }
  0x2e   : > { %1867 = vmatmul.mubr.bf16.vlgmr.msra.gmra.mxu1 %v1539_v33  ;;  %1871 = vmatpush3.bf16.msra.mxu0 %v2055_v30  ;;  %v1281_v30 = vrot.slane %v1717_v25, 3  ;;  %v2086_v33 = vld [vmem:[%s2490_s1 + $0x108] sm:$0xff]  }
  0x2f   : > { %1891 = vmatpush3.bf16.msra.mxu1 %v2056_v31  ;;  %1872 = vmatprep.subr.bf16.mxu0 %v2057_v34  ;;  %v1666_v31 = vcombine.low %v984_v28, %v985_v23 }
  0x30   : > { %1892 = vmatprep.subr.bf16.mxu1 %v2058_v35  ;;  %1886 = vmatprep.mubr.bf16.mxu0 %v492_v48  ;;  %v2378_v32 = vsel %vm619_vm2, %v1281_v30, %v1282_v26  ;;  %v2094_v48 = vld [vmem:[%s2490_s1 + $0x1f8] sm:$0xff]  }
  0x31   : > { %1906 = vmatprep.mubr.bf16.mxu1 %v622_v50  ;;  %v1143_v36 = vshrl.u32 %v1666_v31, 16  ;;  %v1146_v37 = vshll.u32 %v1666_v31, 16 }
  0x32   : > { %1873 = vmatpush3.bf16.msra.mxu0 %v2057_v34  ;;  %v2087_v34 = vld [vmem:[%s2490_s1 + $0x148] sm:$0xff]  }
  0x33   : > { %1893 = vmatpush3.bf16.msra.mxu1 %v2058_v35  ;;  %1874 = vmatprep.subr.bf16.mxu0 %v2059_v41  ;;  %v987_v35 = vld [vmem:[%s2219_s16 + $0x10] sm:$0x3]  ;;  %v1145_v43 = vrot.slane %v1143_v36, 2 }
  0x34   : > { %1894 = vmatprep.subr.bf16.mxu1 %v2060_v44  ;;  %v1667_v42 = vcombine.low %v986_v18, %v987_v35 }
  0x36   : > { %1875 = vmatpush3.bf16.msra.mxu0 %v2059_v41  ;;  %v2089_v41 = vld [vmem:[%s2490_s1 + $0x140] sm:$0xff]   ;;  %v1017_v50 = vrot.slane %v1667_v42, 2 }
  0x37   : > { %1895 = vmatpush3.bf16.msra.mxu1 %v2060_v44  ;;  %1876 = vmatprep.subr.bf16.mxu0 %v2061_v49  ;;  %v1148_v44 = vrot.slane %v1146_v37, 3 }
  0x38   : > { %1896 = vmatprep.subr.bf16.mxu1 %v2062_v51 }
  0x3a   : > { %1877 = vmatpush3.bf16.msra.mxu0 %v2061_v49  ;;  %v1016_v49 = vrot.slane %v1666_v31, 2 }
  0x3b   : > { %1897 = vmatpush3.bf16.msra.mxu1 %v2062_v51  ;;  %1878 = vmatprep.subr.bf16.mxu0 %v2063_v52  ;;  %v1641_v51 = vcombine.low %v2310_v57, %v2310_v57 }
  0x3c   : > { %1898 = vmatprep.subr.bf16.mxu1 %v2064_v53 }
  0x3e   : > { %1879 = vmatpush3.bf16.msra.mxu0 %v2063_v52  ;;  %v1149_v52 = vor.u32 %v1148_v44, %v1145_v43 }
  0x3f   : > { %1899 = vmatpush3.bf16.msra.mxu1 %v2064_v53  ;;  %1880 = vmatprep.subr.bf16.mxu0 %v2065_v54 }
  0x40   : > { %1900 = vmatprep.subr.bf16.mxu1 %v2066_v55 }
  0x42   : > { %1881 = vmatpush3.bf16.msra.mxu0 %v2065_v54  ;;  %v2095_v54 = vld [vmem:[%s2490_s1 + $0x1b0] sm:$0xff]  }
  0x43   : > { %1901 = vmatpush3.bf16.msra.mxu1 %v2066_v55  ;;  %1882 = vmatprep.subr.bf16.mxu0 %v2067_v56  ;;  %v2096_v55 = vld [vmem:[%s2490_s1 + $0x1f0] sm:$0xff]  }
  0x44   : > { %1902 = vmatprep.subr.bf16.mxu1 %v2068_v61 }
  0x46   : > { %1883 = vmatpush3.bf16.msra.mxu0 %v2067_v56  ;;  %v1018_v56 = vsel %vm1015_vm4, %v1016_v49, %v1017_v50 }
  0x47   : > { %1903 = vmatpush3.bf16.msra.mxu1 %v2068_v61  ;;  %1884 = vmatprep.subr.bf16.mxu0 %v2069_v0  ;;  %v2100_v61 = vld [vmem:[%s2490_s1 + $0x1e0] sm:$0xff]  }
  0x48   : > { %1904 = vmatprep.subr.bf16.mxu1 %v2070_v1 }
  0x4a   : > { %1885 = vmatpush3.bf16.msra.mxu0 %v2069_v0  ;;  %v2103_v0 = vld [vmem:[%s2490_s1 + $0x190] sm:$0xff]  }
  0x4b   : > { %1905 = vmatpush3.bf16.msra.mxu1 %v2070_v1  ;;  %1910 = vmatprep.subr.bf16.mxu0 %v2072_v6  ;;  %v2104_v1 = vld [vmem:[%s2490_s1 + $0x1d0] sm:$0xff]  }
  0x4c   : > { %1930 = vmatprep.subr.bf16.mxu1 %v2075_v7 }
  0x4d   : > { %1887 = vmatmul.mubr.bf16.vlgmr.msra.gmra.mxu0 %v491_v38  ;;  %v1151_v38 = vshrl.u32 %v2363_v22, 16 }
  0x4e   : > { %1911 = vmatpush3.bf16.msra.mxu0 %v2072_v6  ;;  %1907 = vmatmul.mubr.bf16.vlgmr.msra.gmra.mxu1 %v2281_v47  ;;  %v2091_v47 = vld [vmem:[%s2490_s1 + $0x1b8] sm:$0xff]  }
  0x4f   : > { %1931 = vmatpush3.bf16.msra.mxu1 %v2075_v7  ;;  %1912 = vmatprep.subr.bf16.mxu0 %v2076_v10  ;;  %v1153_v45 = vrot.slane %v1151_v38, 2  ;;  %v2112_v6 = vld [vmem:[%s2490_s1 + $0x238] sm:$0xff]   ;;  %v2113_v7 = vld [vmem:[%s2490_s1 + $0x230] sm:$0xff]  }
  0x50   : > { %1932 = vmatprep.subr.bf16.mxu1 %v2077_v11  ;;  %1926 = vmatprep.mubr.bf16.mxu0 %v762_v14  ;;  %v2118_v14 = vld [vmem:[%s2490_s1 + $0x208] sm:$0xff]  }
  0x51   : > { %1946 = vmatprep.mubr.bf16.mxu1 %v1640_v15  ;;  %v1157_v53 = vor.u32 %v1156_v46, %v1153_v45  ;;  %v2119_v15 = vld [vmem:[%s2490_s1 + $0x200] sm:$0xff]  }
  0x52   : > { %1913 = vmatpush3.bf16.msra.mxu0 %v2076_v10  ;;  %v2116_v10 = vld [vmem:[%s2490_s1 + $0x218] sm:$0xff]  }
  0x53   : > { %1933 = vmatpush3.bf16.msra.mxu1 %v2077_v11  ;;  %1914 = vmatprep.subr.bf16.mxu0 %v2078_v16  ;;  %v1158_v57 = vsel %vm1141_vm5, %v1149_v52, %v1157_v53  ;;  %v2117_v11 = vld [vmem:[%s2490_s1 + $0x210] sm:$0xff]  }
  0x54   : > { %1934 = vmatprep.subr.bf16.mxu1 %v2079_v17 }
  0x56   : > { %1915 = vmatpush3.bf16.msra.mxu0 %v2078_v16 }
  0x57   : > { %1935 = vmatpush3.bf16.msra.mxu1 %v2079_v17  ;;  %1916 = vmatprep.subr.bf16.mxu0 %v2080_v12 }
  0x58   : > { %1936 = vmatprep.subr.bf16.mxu1 %v2081_v13 }
  0x5a   : > { %1917 = vmatpush3.bf16.msra.mxu0 %v2080_v12 }
  0x5b   : > { %1937 = vmatpush3.bf16.msra.mxu1 %v2081_v13  ;;  %1918 = vmatprep.subr.bf16.mxu0 %v2082_v20 }
  0x5c   : > { %1938 = vmatprep.subr.bf16.mxu1 %v2083_v21 }
  0x5e   : > { %1919 = vmatpush3.bf16.msra.mxu0 %v2082_v20 }
  0x5f   : > { %1939 = vmatpush3.bf16.msra.mxu1 %v2083_v21  ;;  %1920 = vmatprep.subr.bf16.mxu0 %v2084_v27 }
  0x60   : > { %1940 = vmatprep.subr.bf16.mxu1 %v2085_v29 }
  0x62   : > { %1921 = vmatpush3.bf16.msra.mxu0 %v2084_v27 }
  0x63   : > { %1941 = vmatpush3.bf16.msra.mxu1 %v2085_v29  ;;  %1922 = vmatprep.subr.bf16.mxu0 %v2086_v33 }
  0x64   : > { %1942 = vmatprep.subr.bf16.mxu1 %v2087_v34 }
  0x66   : > { %1923 = vmatpush3.bf16.msra.mxu0 %v2086_v33 }
  0x67   : > { %1943 = vmatpush3.bf16.msra.mxu1 %v2087_v34  ;;  %1924 = vmatprep.subr.bf16.mxu0 %v2088_v40 }
  0x68   : > { %1944 = vmatprep.subr.bf16.mxu1 %v2089_v41 }
  0x6a   : > { %1925 = vmatpush3.bf16.msra.mxu0 %v2088_v40 }
  0x6b   : > { %1945 = vmatpush3.bf16.msra.mxu1 %v2089_v41  ;;  %1950 = vmatprep.subr.bf16.mxu0 %v2091_v47 }
  0x6c   : > { %1970 = vmatprep.subr.bf16.mxu1 %v2094_v48 }
  0x6d   : > { %1927 = vmatmul.mubr.bf16.vlgmr.msra.gmra.mxu0 %v2329_v9  ;;  %v2115_v9 = vld [vmem:[%s2490_s1 + $0x220] sm:$0xff]  }
  0x6e   : > { %1951 = vmatpush3.bf16.msra.mxu0 %v2091_v47  ;;  %1947 = vmatmul.mubr.bf16.vlgmr.msra.gmra.mxu1 %v1641_v51 }
  0x6f   : > { %1971 = vmatpush3.bf16.msra.mxu1 %v2094_v48  ;;  %1952 = vmatprep.subr.bf16.mxu0 %v2095_v54 }
  0x70   : > { %1972 = vmatprep.subr.bf16.mxu1 %v2096_v55  ;;  %1966 = vmatprep.mubr.bf16.mxu0 %v1018_v56 }
  0x71   : > { %1986 = vmatprep.mubr.bf16.mxu1 %v1158_v57 }
  0x72   : > { %1953 = vmatpush3.bf16.msra.mxu0 %v2095_v54 }
  0x73   : > { %1973 = vmatpush3.bf16.msra.mxu1 %v2096_v55  ;;  %1954 = vmatprep.subr.bf16.mxu0 %v2097_v58 }
  0x74   : > { %1974 = vmatprep.subr.bf16.mxu1 %v2098_v59 }
  0x76   : > { %1955 = vmatpush3.bf16.msra.mxu0 %v2097_v58 }
  0x77   : > { %1975 = vmatpush3.bf16.msra.mxu1 %v2098_v59  ;;  %1956 = vmatprep.subr.bf16.mxu0 %v2099_v60 }
  0x78   : > { %1976 = vmatprep.subr.bf16.mxu1 %v2100_v61 }
  0x7a   : > { %1957 = vmatpush3.bf16.msra.mxu0 %v2099_v60 }
  0x7b   : > { %1977 = vmatpush3.bf16.msra.mxu1 %v2100_v61  ;;  %1958 = vmatprep.subr.bf16.mxu0 %v2101_v62 }
  0x7c   : > { %1978 = vmatprep.subr.bf16.mxu1 %v2102_v63 }
  0x7e   : > { %1959 = vmatpush3.bf16.msra.mxu0 %v2101_v62 }
  0x7f   : > { %1979 = vmatpush3.bf16.msra.mxu1 %v2102_v63  ;;  %1960 = vmatprep.subr.bf16.mxu0 %v2103_v0 }
  0x80   : > { %1980 = vmatprep.subr.bf16.mxu1 %v2104_v1 }
  0x82   : > { %1961 = vmatpush3.bf16.msra.mxu0 %v2103_v0  ;;  %v1726_v0 = vld [vmem:[%s2491_s2] ss:$0 sm:$0xff] }
  0x83   : > { %1981 = vmatpush3.bf16.msra.mxu1 %v2104_v1  ;;  %1962 = vmatprep.subr.bf16.mxu0 %v2105_v2 }
  0x84   : > { %1982 = vmatprep.subr.bf16.mxu1 %v2106_v3 }
  0x86   : > { %1963 = vmatpush3.bf16.msra.mxu0 %v2105_v2 }
  0x87   : > { %1983 = vmatpush3.bf16.msra.mxu1 %v2106_v3  ;;  %1964 = vmatprep.subr.bf16.mxu0 %v2107_v4 }
  0x88   : > { %1984 = vmatprep.subr.bf16.mxu1 %v2108_v5 }
  0x8a   : > { %1965 = vmatpush3.bf16.msra.mxu0 %v2107_v4 }
  0x8b   : > { %1985 = vmatpush3.bf16.msra.mxu1 %v2108_v5  ;;  %1990 = vmatprep.subr.bf16.mxu0 %v2112_v6 }
  0x8d   : > { %1967 = vmatmul.mubr.bf16.vlgmr.msra.gmra.mxu0 %v1017_v50 }
  0x8e   : > { %1991 = vmatpush3.bf16.msra.mxu0 %v2112_v6  ;;  %1987 = vmatmul.mubr.bf16.vlgmr.msra.gmra.mxu1 %v1157_v53 }
  0x8f   : > { %1992 = vmatprep.subr.bf16.mxu0 %v2113_v7  ;;  %2006 = vmatprep.mubr.bf16.mxu0 %v2378_v32 }
  0x92   : > { %1993 = vmatpush3.bf16.msra.mxu0 %v2113_v7 }
  0x93   : > { %1994 = vmatprep.subr.bf16.mxu0 %v2114_v8 }
  0x96   : > { %1995 = vmatpush3.bf16.msra.mxu0 %v2114_v8 }
  0x97   : > { %1996 = vmatprep.subr.bf16.mxu0 %v2115_v9 }
  0x9a   : > { %1997 = vmatpush3.bf16.msra.mxu0 %v2115_v9 }
  0x9b   : > { %1998 = vmatprep.subr.bf16.mxu0 %v2116_v10 }
  0x9e   : > { %1999 = vmatpush3.bf16.msra.mxu0 %v2116_v10 }
  0x9f   : > { %2000 = vmatprep.subr.bf16.mxu0 %v2117_v11 }
  0xa2   : > { %2001 = vmatpush3.bf16.msra.mxu0 %v2117_v11 }
  0xa3   : > { %2002 = vmatprep.subr.bf16.mxu0 %v2118_v14 }
  0xa6   : > { %2003 = vmatpush3.bf16.msra.mxu0 %v2118_v14 }
  0xa7   : > { %2004 = vmatprep.subr.bf16.mxu0 %v2119_v15 }
  0xaa   : > { %2005 = vmatpush3.bf16.msra.mxu0 %v2119_v15 }
  0xad   : > { %2007 = vmatmul.mubr.bf16.vlgmr.msra.gmra.mxu0 %v1282_v26 }
  0xed   : > { %v1848_v16 = vpop.f32.mrf.mxu0 }
  0xee   : > { %v1868_v17 = vpop.f32.mrf.mxu1 }
  0xef   : > { %v463_v12 = vadd.f32 %v1868_v17, %v1848_v16  ;;  %v355_v13 = vpop.f32.mrf.mxu0 }
  0xf0   : > { %v454_v18 = vpop.f32.mrf.mxu1 }
  0xf1   : > { %v455_v19 = vadd.f32 %v454_v18, %v355_v13  ;;  %v1849_v20 = vpop.f32.mrf.mxu0 }
  0xf2   : > { %v1869_v21 = vpop.f32.mrf.mxu1 }
  0xf3   : > { %v358_v23 = vpop.f32.mrf.mxu0 }
  0xf4   : > { %v457_v24 = vpop.f32.mrf.mxu1 }
  0xf5   : > { %v458_v25 = vadd.f32 %v457_v24, %v358_v23 }
 0x10d   : > { %v1888_v27 = vpop.f32.mrf.mxu0 }
 0x10e   : > { %v593_v28 = vadd.f32 %v1888_v27, %v463_v12  ;;  %v1908_v29 = vpop.f32.mrf.mxu1 }
 0x10f   : > { %v577_v30 = vpop.f32.mrf.mxu0 }
 0x110   : > { %v591_v31 = vadd.f32 %v577_v30, %v455_v19  ;;  %v723_v32 = vadd.f32 %v1908_v29, %v593_v28  ;;  %v707_v33 = vpop.f32.mrf.mxu1 }
 0x111   : > { %v1889_v22 = vpop.f32.mrf.mxu0 }
 0x112   : > { %v721_v26 = vadd.f32 %v707_v33, %v591_v31  ;;  %v1909_v34 = vpop.f32.mrf.mxu1 }
 0x113   : > { %v580_v35 = vpop.f32.mrf.mxu0 }
 0x114   : > { %v710_v36 = vpop.f32.mrf.mxu1  ;;  %v592_v51 = vadd.f32 %v580_v35, %v458_v25 }
 0x116   : > { %v722_v54 = vadd.f32 %v710_v36, %v592_v51 }
 0x12d   : > { %v1928_v37 = vpop.f32.mrf.mxu0 }
 0x12e   : > { %v1948_v38 = vpop.f32.mrf.mxu1  ;;  %v863_v52 = vadd.f32 %v1928_v37, %v723_v32 }
 0x12f   : > { %v847_v39 = vpop.f32.mrf.mxu0 }
 0x130   : > { %v967_v40 = vpop.f32.mrf.mxu1  ;;  %v861_v53 = vadd.f32 %v847_v39, %v721_v26  ;;  %v983_v55 = vadd.f32 %v1948_v38, %v863_v52 }
 0x131   : > { %v1929_v41 = vpop.f32.mrf.mxu0 }
 0x132   : > { %v1949_v42 = vpop.f32.mrf.mxu1  ;;  %v981_v56 = vadd.f32 %v967_v40, %v861_v53 }
 0x133   : > { %v850_v43 = vpop.f32.mrf.mxu0 }
 0x134   : > { %v970_v44 = vpop.f32.mrf.mxu1  ;;  %v862_v57 = vadd.f32 %v850_v43, %v722_v54 }
 0x136   : > { %v982_v61 = vadd.f32 %v970_v44, %v862_v57 }
 0x14d   : > { %v1968_v45 = vpop.f32.mrf.mxu0 }
 0x14e   : > { %v1988_v46 = vpop.f32.mrf.mxu1  ;;  %v1119_v58 = vadd.f32 %v1968_v45, %v983_v55 }
 0x14f   : > { %v1103_v47 = vpop.f32.mrf.mxu0 }
 0x150   : > { %v1243_v48 = vpop.f32.mrf.mxu1  ;;  %v1117_v59 = vadd.f32 %v1103_v47, %v981_v56  ;;  %v1259_v62 = vadd.f32 %v1988_v46, %v1119_v58 }
 0x151   : > { %v1969_v49 = vpop.f32.mrf.mxu0 }
 0x152   : > { %v1989_v50 = vpop.f32.mrf.mxu1  ;;  %v1257_v1 = vadd.f32 %v1243_v48, %v1117_v59 }
 0x153   : > { %v1106_v60 = vpop.f32.mrf.mxu0 }
 0x154   : > { %v1118_v2 = vadd.f32 %v1106_v60, %v982_v61  ;;  %v1246_v4 = vpop.f32.mrf.mxu1 }
 0x156   : > { %v1258_v9 = vadd.f32 %v1246_v4, %v1118_v2 }
 0x16d   : > { %v2008_v63 = vpop.f32.mrf.mxu0 }
 0x16e   : > { %v1384_v3 = vadd.f32 %v2008_v63, %v1259_v62 }
 0x16f   : > { %v1368_v5 = vpop.f32.mrf.mxu0 }
 0x170   : > { %v1394_v6 = vadd.f32 %v1726_v0, %v1384_v3  ;;  %v1382_v7 = vadd.f32 %v1368_v5, %v1257_v1 }
 0x171   : > { %v2009_v8 = vpop.f32.mrf.mxu0 }
 0x172   : > { %v1397_v10 = vmax.f32 %v1394_v6, 0.0  ;;  %v1392_v15 = vadd.f32 %v1726_v0, %v1382_v7 }
 0x173   : > { %v1371_v11 = vpop.f32.mrf.mxu0 }
 0x174   : > { %v1734_v14 = vpack.c.bf16 %v1397_v10, %v1397_v10  ;;  %v1383_v16 = vadd.f32 %v1371_v11, %v1258_v9  ;;  %v1395_v12 = vmax.f32 %v1392_v15, 0.0 }
 0x176   : > { %1413 = vst [vmem:[%s206_s6 + $0x8] sm:$0xf] %v1734_v14  ;;  %v1393_v17 = vadd.f32 %v1726_v0, %v1383_v16 }
 0x178   : > { %v1396_v13 = vmax.f32 %v1393_v17, 0.0 }
 0x17a   : > { %v1738_v18 = vpack.c.bf16 %v1396_v13, %v1395_v12 }
 0x17c   : > { %1739 = vst [vmem:[%s206_s6] sm:$0xff] %v1738_v18  }
 0x17d PF: > { %s13_s14 = sadd.s32 1, %s2143_s14   ;;  %s2493_s12 = smov %s2139_s13 }
 0x17e   : > { %p10_p5 = scmp.ge.s32.totalorder %s13_s14, 4   ;;  %s2494_s13 = smov %s2496_s15 }
 0x180   :  { %12 = sbr.rel (!%p10_p5) target bundleno = 2 (0x2), region = 70 }

</bundles_post_ra>
